<compile_context>
chip_gen: v5e
topology: v5e:2x2
jax: 0.10.0
libtpu: 0.0.40
codegen_flags: <defaults>
</compile_context>

<pallas_src>
import functools

import jax
import jax.numpy as jnp
from jax.experimental import pallas as pl
from jax.experimental.pallas import tpu as pltpu


# ----------------------------------------------------------------------------
# Constant side-inputs (built once in the wrapper, outside the kernel)
# ----------------------------------------------------------------------------
def _tap_masks(H, W):
    """(9, 1, H*W) f32 validity masks for the 3x3 'SAME' conv taps.

    A lane that would read an out-of-bounds (or, after a circular roll,
    wrapped-around) pixel is exactly a lane whose mask is zero."""
    HW = H * W
    idx = jnp.arange(HW, dtype=jnp.int32)
    row = idx // W
    col = idx % W
    ms = []
    for ky in range(3):
        for kx in range(3):
            dy, dx = ky - 1, kx - 1
            ok = ((row + dy >= 0) & (row + dy < H) &
                  (col + dx >= 0) & (col + dx < W))
            ms.append(ok.astype(jnp.float32))
    return jnp.stack(ms, axis=0).reshape(9, 1, HW)


def _group_avg_matrix(C, G, HW):
    """(C, C) matrix A with A[c,c'] = 1/(Cg*HW) if c, c' share a group else 0."""
    Cg = C // G
    gid = jnp.arange(C, dtype=jnp.int32) // Cg
    same = (gid[:, None] == gid[None, :]).astype(jnp.float32)
    return same / float(Cg * HW)


# ----------------------------------------------------------------------------
# Fused encoder kernel (one grid step == NB samples, everything stays in VMEM)
# ----------------------------------------------------------------------------
def _make_encoder_kernel(*, H, W, NB, Cim, C0, n_layers, layer_cout, Ccat,
                         vec_cols, mat_slots, eps, mm_dtype):
    HW = H * W

    # Static tap metadata: (mask index, non-negative circular roll amount).
    taps = []
    for ky in range(3):
        for kx in range(3):
            d = (ky - 1) * W + (kx - 1)          # input offset for this tap
            taps.append((ky * 3 + kx, (-d) % HW))

    def kernel(x_ref, msg_ref, mask_ref, vecs_ref, mats_ref, o_ref):
        masks = mask_ref[...]                                     # (9, 1, HW) f32

        def vec(name, c):
            j = vec_cols[name]
            return vecs_ref[0:c, j:j + 1]                          # (c, 1) f32

        def mat(name):
            r0, rows, cols = mat_slots[name]
            return mats_ref[r0:r0 + rows, 0:cols]

        # Hoist every weight out of the per-sample loop; cast MXU operands once.
        w_in = mat("w_in").astype(mm_dtype)                        # (C0, Cim)
        w_msg = vec("w_msg", C0)                                   # (C0, 1)
        b_in = vec("b_in", C0)
        layer_params = []
        for i in range(n_layers):
            cout = layer_cout[i]
            layer_params.append((mat(f"w9_{i}").astype(mm_dtype),  # (cout, 9*cin)
                                 vec(f"b_{i}", cout),
                                 mat(f"A_{i}"),                    # f32 (GN stats)
                                 vec(f"g_{i}", cout),
                                 vec(f"be_{i}", cout)))
        A_out = mat("A_out")
        g_out = vec("g_out", Ccat)
        be_out = vec("be_out", Ccat)
        w_out = mat("w_out").astype(mm_dtype)                      # (Cim, Ccat)
        b_out = vec("b_out", Cim)

        def gn_silu(h, A, gamma, beta):
            # Lane-reduce first (XLU), then group-average via a tiny (C,C)@(C,2)
            # matmul; var = E[x^2] - mean^2.  All statistics kept in f32.
            s = jnp.sum(h, axis=1, keepdims=True)                  # (C, 1)
            s2 = jnp.sum(h * h, axis=1, keepdims=True)             # (C, 1)
            stats = jnp.dot(A, jnp.concatenate([s, s2], axis=1),
                            preferred_element_type=jnp.float32)    # (C, 2)
            gmean = stats[:, 0:1]
            gex2 = stats[:, 1:2]
            inv = jax.lax.rsqrt(gex2 - gmean * gmean + eps)
            y = (h - gmean) * inv * gamma + beta
            return y * jax.nn.sigmoid(y)                           # SiLU

        def conv3x3(h, w9, b):
            # 3x3 'SAME' conv as ONE (Cout, 9*Cin) @ (9*Cin, HW) MXU matmul over a
            # stacked tap matrix.  Each tap is an XLU roll of h with out-of-bounds
            # / wrapped lanes zeroed by its validity mask (center tap needs none).
            pieces = []
            for t, shift in taps:
                if shift == 0:
                    pieces.append(h)                               # center tap
                else:
                    pieces.append(pltpu.roll(h, shift=shift, axis=1) * masks[t])
            T = jnp.concatenate(pieces, axis=0)                    # (9*cin, HW)
            acc = jnp.dot(w9, T.astype(mm_dtype),
                          preferred_element_type=jnp.float32)
            return acc + b

        for s_i in range(NB):                                      # unrolled
            x = x_ref[s_i]                                         # (Cim, HW)
            m = msg_ref[s_i]                                       # (1, HW)
            # conv_in (1x1) with the x/message concat folded in.
            h = jnp.dot(w_in, x.astype(mm_dtype),
                        preferred_element_type=jnp.float32)
            h = h + w_msg * m + b_in
            store = h
            for (w9, b, A, g, be) in layer_params:
                h = conv3x3(h, w9, b)
                h = gn_silu(h, A, g, be)
            hcat = jnp.concatenate([h, store], axis=0)             # (Ccat, HW)
            y = gn_silu(hcat, A_out, g_out, be_out)
            out = jnp.dot(w_out, y.astype(mm_dtype),
                          preferred_element_type=jnp.float32) + b_out
            o_ref[s_i] = out.astype(o_ref.dtype)

    return kernel


# ----------------------------------------------------------------------------
# Wrapper: packs side inputs, builds BlockSpecs and calls pallas_call once
# ----------------------------------------------------------------------------
def encoder_forward(params, x_nchw, msg_nchw, num_groups, *,
                    matmul_dtype=jnp.bfloat16):
    N, Cim, H, W = x_nchw.shape
    HW = H * W
    f32 = jnp.float32

    C0 = params["conv_in_w"].shape[0]
    layer_cout = [lp["conv_w"].shape[0] for lp in params["layers"]]
    n_layers = len(layer_cout)
    Clast = layer_cout[-1] if layer_cout else C0
    Ccat = Clast + C0

    w_in_full = params["conv_in_w"].reshape(C0, Cim + 1)

    # ---- pack every per-channel vector into one (Cvmax, NV) side input -----
    vec_list = [("b_in", params["conv_in_b"].reshape(-1)),
                ("w_msg", w_in_full[:, Cim])]
    for i, lp in enumerate(params["layers"]):
        vec_list += [(f"b_{i}", lp["conv_b"].reshape(-1)),
                     (f"g_{i}", lp["gn_w"].reshape(-1)),
                     (f"be_{i}", lp["gn_b"].reshape(-1))]
    vec_list += [("g_out", params["out_gn_w"].reshape(-1)),
                 ("be_out", params["out_gn_b"].reshape(-1)),
                 ("b_out", params["conv_out_b"].reshape(-1))]
    Cvmax = max(int(v.shape[0]) for _, v in vec_list)
    vecs = jnp.zeros((Cvmax, len(vec_list)), f32)
    vec_cols = {}
    for j, (name, v) in enumerate(vec_list):
        vecs = vecs.at[:v.shape[0], j].set(v.astype(f32))
        vec_cols[name] = j

    # ---- pack every weight matrix into one sublane-aligned side input ------
    mat_list = [("w_in", w_in_full[:, :Cim])]
    for i, lp in enumerate(params["layers"]):
        cout, cin = lp["conv_w"].shape[0], lp["conv_w"].shape[1]
        # tap-major, then cin:  W9[:, t*cin + c] = conv_w[:, c, ky, kx], t = 3*ky+kx
        w9 = jnp.transpose(lp["conv_w"], (0, 2, 3, 1)).reshape(cout, 9 * cin)
        mat_list += [(f"w9_{i}", w9),
                     (f"A_{i}", _group_avg_matrix(cout, num_groups, HW))]
    mat_list += [("A_out", _group_avg_matrix(Ccat, num_groups, HW)),
                 ("w_out", params["conv_out_w"].reshape(Cim, Ccat))]

    def pad8(n):
        return -(-n // 8) * 8

    WMAX = max(int(m.shape[1]) for _, m in mat_list)
    RTOT = sum(pad8(int(m.shape[0])) for _, m in mat_list)
    mats = jnp.zeros((RTOT, WMAX), f32)
    mat_slots = {}
    r = 0
    for name, m in mat_list:
        rows, cols = int(m.shape[0]), int(m.shape[1])
        mats = mats.at[r:r + rows, :cols].set(m.astype(f32))
        mat_slots[name] = (r, rows, cols)          # 8-aligned sublane offsets
        r += pad8(rows)

    masks = _tap_masks(H, W)

    # ---- lane-dense (C, HW) activations; NB samples per grid step ----------
    NB = next(d for d in (8, 4, 2, 1) if N % d == 0)
    x = x_nchw.reshape(N, Cim, HW).astype(f32)      # pure reshape, no concat copy
    msg = msg_nchw.reshape(N, 1, HW).astype(f32)

    kernel = _make_encoder_kernel(
        H=H, W=W, NB=NB, Cim=Cim, C0=C0, n_layers=n_layers,
        layer_cout=layer_cout, Ccat=Ccat, vec_cols=vec_cols,
        mat_slots=mat_slots, eps=1e-5, mm_dtype=matmul_dtype)

    out = pl.pallas_call(
        kernel,
        out_shape=jax.ShapeDtypeStruct((N, Cim, HW), f32),
        grid=(N // NB,),
        in_specs=[
            pl.BlockSpec((NB, Cim, HW), lambda n: (n, 0, 0)),
            pl.BlockSpec((NB, 1, HW), lambda n: (n, 0, 0)),
            pl.BlockSpec((9, 1, HW), lambda n: (0, 0, 0)),
            pl.BlockSpec(vecs.shape, lambda n: (0, 0)),
            pl.BlockSpec(mats.shape, lambda n: (0, 0)),
        ],
        out_specs=pl.BlockSpec((NB, Cim, HW), lambda n: (n, 0, 0)),
        compiler_params=pltpu.CompilerParams(
            dimension_semantics=("parallel",)),
    )(x, msg, masks, vecs, mats)
    return out.reshape(N, Cim, H, W)


# ----------------------------------------------------------------------------
# Pure-JAX reference (same math, no Pallas) for a correctness check
# ----------------------------------------------------------------------------
def _ref_gn_silu(x, gamma, beta, G, eps=1e-5):
    N, H, W, C = x.shape
    Cg = C // G
    xg = x.reshape(N, H * W, G, Cg).transpose(0, 2, 1, 3)
    mean = xg.mean(axis=(2, 3), keepdims=True)
    var = jnp.square(xg - mean).mean(axis=(2, 3), keepdims=True)
    xn = (xg - mean) / jnp.sqrt(var + eps)
    xn = xn.transpose(0, 2, 1, 3).reshape(N, H, W, C)
    y = xn * gamma + beta
    return y * jax.nn.sigmoid(y)


def _ref_forward(params, x_nchw, msg_nchw, num_groups):
    x = jnp.transpose(x_nchw, (0, 2, 3, 1))
    m = jnp.transpose(msg_nchw, (0, 2, 3, 1))
    out = jnp.concatenate([x, m], axis=-1)

    def c1x1(z, w, b):
        return jnp.einsum("nhwc,oc->nhwo", z, w.reshape(w.shape[0], w.shape[1])) + b

    def c3x3(z, w, b):
        w_hwio = jnp.transpose(w, (2, 3, 1, 0))
        return jax.lax.conv_general_dilated(
            z, w_hwio, (1, 1), "SAME",
            dimension_numbers=("NHWC", "HWIO", "NHWC")) + b

    out = c1x1(out, params["conv_in_w"], params["conv_in_b"])
    store = out
    for lp in params["layers"]:
        out = c3x3(out, lp["conv_w"], lp["conv_b"])
        out = _ref_gn_silu(out, lp["gn_w"], lp["gn_b"], num_groups)
    out = jnp.concatenate([out, store], axis=-1)
    out = _ref_gn_silu(out, params["out_gn_w"], params["out_gn_b"], num_groups)
    out = c1x1(out, params["conv_out_w"], params["conv_out_b"])
    return jnp.transpose(out, (0, 3, 1, 2))


# ----------------------------------------------------------------------------
# Deterministic parameter init
# ----------------------------------------------------------------------------
def init_params(key, im_channels, channels, depth, num_groups):
    keys = jax.random.split(key, 4 + 2 * (depth - 1))
    k_iter = iter(keys)
    f32 = jnp.float32

    def nrm(k, shape, scale=0.05):
        return (scale * jax.random.normal(k, shape)).astype(f32)

    params = {
        "conv_in_w": nrm(next(k_iter), (channels[0], im_channels + 1, 1, 1)),
        "conv_in_b": jnp.zeros((channels[0],), f32),
        "layers": [],
    }
    for i in range(depth - 1):
        cin, cout = channels[i], channels[i + 1]
        params["layers"].append({
            "conv_w": nrm(next(k_iter), (cout, cin, 3, 3)),
            "conv_b": nrm(next(k_iter), (cout,), 0.01),
            "gn_w": jnp.ones((cout,), f32),
            "gn_b": jnp.zeros((cout,), f32),
        })
    c_cat = channels[-1] + channels[0]
    params["out_gn_w"] = jnp.ones((c_cat,), f32)
    params["out_gn_b"] = jnp.zeros((c_cat,), f32)
    params["conv_out_w"] = nrm(next(k_iter), (im_channels, c_cat, 1, 1))
    params["conv_out_b"] = nrm(next(k_iter), (im_channels,), 0.01)
    return params


# ----------------------------------------------------------------------------
# Main
# ----------------------------------------------------------------------------
if __name__ == "__main__":
    im_channels = 3
    channels = [8, 16, 16]
    depth = 3
    num_groups = 4
    B, H, W = 2, 16, 16

    key = jax.random.PRNGKey(0)
    kx, km, kp = jax.random.split(key, 3)
    x = jax.random.normal(kx, (B, im_channels, H, W), dtype=jnp.float32)
    message = jax.random.normal(km, (B, 1, H, W), dtype=jnp.float32)
    params = init_params(kp, im_channels, channels, depth, num_groups)

    ref = jax.block_until_ready(_ref_forward(params, x, message, num_groups))

    # f32 MXU-operand path: strict validation against the f32 reference.
    fwd_f32 = jax.jit(functools.partial(
        encoder_forward, num_groups=num_groups, matmul_dtype=jnp.float32))
    out_f32 = jax.block_until_ready(fwd_f32(params, x, message))
    assert out_f32.shape == (B, im_channels, H, W)
    err_f32 = float(jnp.max(jnp.abs(out_f32 - ref)))
    assert err_f32 < 1e-3, f"f32 mismatch vs reference, max abs err = {err_f32}"

    # bf16 MXU-operand path (production default): looser tolerance.
    fwd_bf16 = jax.jit(functools.partial(
        encoder_forward, num_groups=num_groups, matmul_dtype=jnp.bfloat16))
    out_bf16 = jax.block_until_ready(fwd_bf16(params, x, message))
    err_bf16 = float(jnp.max(jnp.abs(out_bf16 - ref)))
    assert err_bf16 < 1e-1, f"bf16 mismatch vs reference, max abs err = {err_bf16}"

    print("KERNEL_OK")
</pallas_src>

<mosaic_0001>
module attributes {stable_mosaic.version = 11 : i64} {
  func.func @kernel(%arg0: i32, %arg1: memref<2x3x256xf32, #tpu.memory_space<vmem>>, %arg2: memref<2x1x256xf32, #tpu.memory_space<vmem>>, %arg3: memref<9x1x256xf32, #tpu.memory_space<vmem>>, %arg4: memref<24x11xf32, #tpu.memory_space<vmem>>, %arg5: memref<104x144xf32, #tpu.memory_space<vmem>>, %arg6: memref<2x3x256xf32, #tpu.memory_space<vmem>>) attributes {dimension_semantics = [#tpu.dimension_semantics<parallel>], iteration_bounds = array<i64: 1>, scalar_prefetch = 0 : i64, scratch_operands = 0 : i64, tpu.core_type = #tpu.core_type<tc>, window_params = [{transform_indices = @transform_0, window_bounds = array<i64: 2, 3, 256>}, {transform_indices = @transform_1, window_bounds = array<i64: 2, 1, 256>}, {pipeline_mode = #tpu.pipeline_mode<synchronous>, transform_indices = @transform_2, window_bounds = array<i64: 9, 1, 256>}, {pipeline_mode = #tpu.pipeline_mode<synchronous>, transform_indices = @transform_3, window_bounds = array<i64: 24, 11>}, {pipeline_mode = #tpu.pipeline_mode<synchronous>, transform_indices = @transform_4, window_bounds = array<i64: 104, 144>}, {transform_indices = @transform_5, window_bounds = array<i64: 2, 3, 256>}]} {
    %c0 = arith.constant 0 : index
    %c0_0 = arith.constant 0 : index
    %c0_1 = arith.constant 0 : index
    %0 = vector.load %arg3[%c0, %c0_0, %c0_1] : memref<9x1x256xf32, #tpu.memory_space<vmem>>, vector<9x1x256xf32>
    %c0_2 = arith.constant 0 : index
    %c0_3 = arith.constant 0 : index
    %1 = vector.load %arg5[%c0_2, %c0_3] : memref<104x144xf32, #tpu.memory_space<vmem>>, vector<8x3xf32>
    %c0_4 = arith.constant 0 : index
    %c1 = arith.constant 1 : index
    %2 = vector.load %arg4[%c0_4, %c1] : memref<24x11xf32, #tpu.memory_space<vmem>>, vector<8x1xf32>
    %c0_5 = arith.constant 0 : index
    %c0_6 = arith.constant 0 : index
    %3 = vector.load %arg4[%c0_5, %c0_6] : memref<24x11xf32, #tpu.memory_space<vmem>>, vector<8x1xf32>
    %c8 = arith.constant 8 : index
    %c0_7 = arith.constant 0 : index
    %4 = vector.load %arg5[%c8, %c0_7] : memref<104x144xf32, #tpu.memory_space<vmem>>, vector<16x72xf32>
    %c0_8 = arith.constant 0 : index
    %c2 = arith.constant 2 : index
    %5 = vector.load %arg4[%c0_8, %c2] : memref<24x11xf32, #tpu.memory_space<vmem>>, vector<16x1xf32>
    %c24 = arith.constant 24 : index
    %c0_9 = arith.constant 0 : index
    %6 = vector.load %arg5[%c24, %c0_9] : memref<104x144xf32, #tpu.memory_space<vmem>>, vector<16x16xf32>
    %c0_10 = arith.constant 0 : index
    %c3 = arith.constant 3 : index
    %7 = vector.load %arg4[%c0_10, %c3] : memref<24x11xf32, #tpu.memory_space<vmem>>, vector<16x1xf32>
    %c0_11 = arith.constant 0 : index
    %c4 = arith.constant 4 : index
    %8 = vector.load %arg4[%c0_11, %c4] : memref<24x11xf32, #tpu.memory_space<vmem>>, vector<16x1xf32>
    %c40 = arith.constant 40 : index
    %c0_12 = arith.constant 0 : index
    %9 = vector.load %arg5[%c40, %c0_12] : memref<104x144xf32, #tpu.memory_space<vmem>>, vector<16x144xf32>
    %c0_13 = arith.constant 0 : index
    %c5 = arith.constant 5 : index
    %10 = vector.load %arg4[%c0_13, %c5] : memref<24x11xf32, #tpu.memory_space<vmem>>, vector<16x1xf32>
    %c56 = arith.constant 56 : index
    %c0_14 = arith.constant 0 : index
    %11 = vector.load %arg5[%c56, %c0_14] : memref<104x144xf32, #tpu.memory_space<vmem>>, vector<16x16xf32>
    %c0_15 = arith.constant 0 : index
    %c6 = arith.constant 6 : index
    %12 = vector.load %arg4[%c0_15, %c6] : memref<24x11xf32, #tpu.memory_space<vmem>>, vector<16x1xf32>
    %c0_16 = arith.constant 0 : index
    %c7 = arith.constant 7 : index
    %13 = vector.load %arg4[%c0_16, %c7] : memref<24x11xf32, #tpu.memory_space<vmem>>, vector<16x1xf32>
    %c72 = arith.constant 72 : index
    %c0_17 = arith.constant 0 : index
    %14 = vector.load %arg5[%c72, %c0_17] : memref<104x144xf32, #tpu.memory_space<vmem>>, vector<24x24xf32>
    %c0_18 = arith.constant 0 : index
    %c8_19 = arith.constant 8 : index
    %15 = vector.load %arg4[%c0_18, %c8_19] : memref<24x11xf32, #tpu.memory_space<vmem>>, vector<24x1xf32>
    %c0_20 = arith.constant 0 : index
    %c9 = arith.constant 9 : index
    %16 = vector.load %arg4[%c0_20, %c9] : memref<24x11xf32, #tpu.memory_space<vmem>>, vector<24x1xf32>
    %c96 = arith.constant 96 : index
    %c0_21 = arith.constant 0 : index
    %17 = vector.load %arg5[%c96, %c0_21] : memref<104x144xf32, #tpu.memory_space<vmem>>, vector<3x24xf32>
    %c0_22 = arith.constant 0 : index
    %c10 = arith.constant 10 : index
    %18 = vector.load %arg4[%c0_22, %c10] : memref<24x11xf32, #tpu.memory_space<vmem>>, vector<3x1xf32>
    %c0_23 = arith.constant 0 : index
    %c0_24 = arith.constant 0 : index
    %c0_25 = arith.constant 0 : index
    %19 = vector.load %arg1[%c0_23, %c0_24, %c0_25] : memref<2x3x256xf32, #tpu.memory_space<vmem>>, vector<1x3x256xf32>
    %20 = vector.shape_cast %19 : vector<1x3x256xf32> to vector<3x256xf32>
    %c0_26 = arith.constant 0 : index
    %c0_27 = arith.constant 0 : index
    %c0_28 = arith.constant 0 : index
    %21 = vector.load %arg2[%c0_26, %c0_27, %c0_28] : memref<2x1x256xf32, #tpu.memory_space<vmem>>, vector<1x1x256xf32>
    %22 = vector.shape_cast %21 : vector<1x1x256xf32> to vector<1x256xf32>
    %cst = arith.constant dense<0.000000e+00> : vector<8x256xf32>
    %23 = tpu.matmul %1, %20, %cst {dimension_numbers = #tpu.dot_dimension_numbers<[1], [0], [0], [1], [0, 0, 1, 1], [], []>} : vector<8x3xf32>, vector<3x256xf32>, vector<8x256xf32> -> vector<8x256xf32>
    %24 = vector.broadcast %2 : vector<8x1xf32> to vector<8x256xf32>
    %25 = vector.broadcast %22 : vector<1x256xf32> to vector<8x256xf32>
    %26 = arith.mulf %24, %25 : vector<8x256xf32>
    %27 = arith.addf %23, %26 : vector<8x256xf32>
    %28 = vector.broadcast %3 : vector<8x1xf32> to vector<8x256xf32>
    %29 = arith.addf %27, %28 : vector<8x256xf32>
    %c17_i32 = arith.constant 17 : i32
    %30 = tpu.dynamic_rotate %29 by %c17_i32 dim 1 : vector<8x256xf32>, i32 -> vector<8x256xf32>
    %31 = vector.extract_strided_slice %0 {offsets = [0, 0, 0], sizes = [1, 1, 256], strides = [1, 1, 1]} : vector<9x1x256xf32> to vector<1x1x256xf32>
    %32 = vector.shape_cast %31 : vector<1x1x256xf32> to vector<1x256xf32>
    %33 = vector.broadcast %32 : vector<1x256xf32> to vector<8x256xf32>
    %34 = arith.mulf %30, %33 : vector<8x256xf32>
    %c16_i32 = arith.constant 16 : i32
    %35 = tpu.dynamic_rotate %29 by %c16_i32 dim 1 : vector<8x256xf32>, i32 -> vector<8x256xf32>
    %36 = vector.extract_strided_slice %0 {offsets = [1, 0, 0], sizes = [1, 1, 256], strides = [1, 1, 1]} : vector<9x1x256xf32> to vector<1x1x256xf32>
    %37 = vector.shape_cast %36 : vector<1x1x256xf32> to vector<1x256xf32>
    %38 = vector.broadcast %37 : vector<1x256xf32> to vector<8x256xf32>
    %39 = arith.mulf %35, %38 : vector<8x256xf32>
    %c15_i32 = arith.constant 15 : i32
    %40 = tpu.dynamic_rotate %29 by %c15_i32 dim 1 : vector<8x256xf32>, i32 -> vector<8x256xf32>
    %41 = vector.extract_strided_slice %0 {offsets = [2, 0, 0], sizes = [1, 1, 256], strides = [1, 1, 1]} : vector<9x1x256xf32> to vector<1x1x256xf32>
    %42 = vector.shape_cast %41 : vector<1x1x256xf32> to vector<1x256xf32>
    %43 = vector.broadcast %42 : vector<1x256xf32> to vector<8x256xf32>
    %44 = arith.mulf %40, %43 : vector<8x256xf32>
    %c1_i32 = arith.constant 1 : i32
    %45 = tpu.dynamic_rotate %29 by %c1_i32 dim 1 : vector<8x256xf32>, i32 -> vector<8x256xf32>
    %46 = vector.extract_strided_slice %0 {offsets = [3, 0, 0], sizes = [1, 1, 256], strides = [1, 1, 1]} : vector<9x1x256xf32> to vector<1x1x256xf32>
    %47 = vector.shape_cast %46 : vector<1x1x256xf32> to vector<1x256xf32>
    %48 = vector.broadcast %47 : vector<1x256xf32> to vector<8x256xf32>
    %49 = arith.mulf %45, %48 : vector<8x256xf32>
    %c255_i32 = arith.constant 255 : i32
    %50 = tpu.dynamic_rotate %29 by %c255_i32 dim 1 : vector<8x256xf32>, i32 -> vector<8x256xf32>
    %51 = vector.extract_strided_slice %0 {offsets = [5, 0, 0], sizes = [1, 1, 256], strides = [1, 1, 1]} : vector<9x1x256xf32> to vector<1x1x256xf32>
    %52 = vector.shape_cast %51 : vector<1x1x256xf32> to vector<1x256xf32>
    %53 = vector.broadcast %52 : vector<1x256xf32> to vector<8x256xf32>
    %54 = arith.mulf %50, %53 : vector<8x256xf32>
    %c241_i32 = arith.constant 241 : i32
    %55 = tpu.dynamic_rotate %29 by %c241_i32 dim 1 : vector<8x256xf32>, i32 -> vector<8x256xf32>
    %56 = vector.extract_strided_slice %0 {offsets = [6, 0, 0], sizes = [1, 1, 256], strides = [1, 1, 1]} : vector<9x1x256xf32> to vector<1x1x256xf32>
    %57 = vector.shape_cast %56 : vector<1x1x256xf32> to vector<1x256xf32>
    %58 = vector.broadcast %57 : vector<1x256xf32> to vector<8x256xf32>
    %59 = arith.mulf %55, %58 : vector<8x256xf32>
    %c240_i32 = arith.constant 240 : i32
    %60 = tpu.dynamic_rotate %29 by %c240_i32 dim 1 : vector<8x256xf32>, i32 -> vector<8x256xf32>
    %61 = vector.extract_strided_slice %0 {offsets = [7, 0, 0], sizes = [1, 1, 256], strides = [1, 1, 1]} : vector<9x1x256xf32> to vector<1x1x256xf32>
    %62 = vector.shape_cast %61 : vector<1x1x256xf32> to vector<1x256xf32>
    %63 = vector.broadcast %62 : vector<1x256xf32> to vector<8x256xf32>
    %64 = arith.mulf %60, %63 : vector<8x256xf32>
    %c239_i32 = arith.constant 239 : i32
    %65 = tpu.dynamic_rotate %29 by %c239_i32 dim 1 : vector<8x256xf32>, i32 -> vector<8x256xf32>
    %66 = vector.extract_strided_slice %0 {offsets = [8, 0, 0], sizes = [1, 1, 256], strides = [1, 1, 1]} : vector<9x1x256xf32> to vector<1x1x256xf32>
    %67 = vector.shape_cast %66 : vector<1x1x256xf32> to vector<1x256xf32>
    %68 = vector.broadcast %67 : vector<1x256xf32> to vector<8x256xf32>
    %69 = arith.mulf %65, %68 : vector<8x256xf32>
    %70 = tpu.concatenate %34, %39, %44, %49, %29, %54, %59, %64, %69 in 0 : vector<8x256xf32>, vector<8x256xf32>, vector<8x256xf32>, vector<8x256xf32>, vector<8x256xf32>, vector<8x256xf32>, vector<8x256xf32>, vector<8x256xf32>, vector<8x256xf32> -> vector<72x256xf32>
    %cst_29 = arith.constant dense<0.000000e+00> : vector<16x256xf32>
    %71 = tpu.matmul %4, %70, %cst_29 {dimension_numbers = #tpu.dot_dimension_numbers<[1], [0], [0], [1], [0, 0, 1, 1], [], []>} : vector<16x72xf32>, vector<72x256xf32>, vector<16x256xf32> -> vector<16x256xf32>
    %72 = vector.broadcast %5 : vector<16x1xf32> to vector<16x256xf32>
    %73 = arith.addf %71, %72 : vector<16x256xf32>
    %cst_30 = arith.constant dense<0.000000e+00> : vector<16xf32>
    %74 = vector.multi_reduction <add>, %73, %cst_30 [1] : vector<16x256xf32> to vector<16xf32>
    %75 = vector.shape_cast %74 : vector<16xf32> to vector<16x1xf32>
    %76 = arith.mulf %73, %73 : vector<16x256xf32>
    %cst_31 = arith.constant dense<0.000000e+00> : vector<16xf32>
    %77 = vector.multi_reduction <add>, %76, %cst_31 [1] : vector<16x256xf32> to vector<16xf32>
    %78 = vector.shape_cast %77 : vector<16xf32> to vector<16x1xf32>
    %79 = tpu.concatenate %75, %78 in 1 : vector<16x1xf32>, vector<16x1xf32> -> vector<16x2xf32>
    %cst_32 = arith.constant dense<0.000000e+00> : vector<16x2xf32>
    %80 = tpu.matmul %6, %79, %cst_32 {dimension_numbers = #tpu.dot_dimension_numbers<[1], [0], [0], [1], [0, 0, 1, 1], [], []>} : vector<16x16xf32>, vector<16x2xf32>, vector<16x2xf32> -> vector<16x2xf32>
    %81 = vector.extract_strided_slice %80 {offsets = [0, 0], sizes = [16, 1], strides = [1, 1]} : vector<16x2xf32> to vector<16x1xf32>
    %82 = vector.extract_strided_slice %80 {offsets = [0, 1], sizes = [16, 1], strides = [1, 1]} : vector<16x2xf32> to vector<16x1xf32>
    %83 = arith.mulf %81, %81 : vector<16x1xf32>
    %84 = arith.subf %82, %83 : vector<16x1xf32>
    %cst_33 = arith.constant 9.99999974E-6 : f32
    %85 = vector.broadcast %cst_33 : f32 to vector<16x1xf32>
    %86 = arith.addf %84, %85 : vector<16x1xf32>
    %87 = math.rsqrt %86 : vector<16x1xf32>
    %88 = vector.broadcast %81 : vector<16x1xf32> to vector<16x256xf32>
    %89 = arith.subf %73, %88 : vector<16x256xf32>
    %90 = vector.broadcast %87 : vector<16x1xf32> to vector<16x256xf32>
    %91 = arith.mulf %89, %90 : vector<16x256xf32>
    %92 = vector.broadcast %7 : vector<16x1xf32> to vector<16x256xf32>
    %93 = arith.mulf %91, %92 : vector<16x256xf32>
    %94 = vector.broadcast %8 : vector<16x1xf32> to vector<16x256xf32>
    %95 = arith.addf %93, %94 : vector<16x256xf32>
    %96 = arith.negf %95 : vector<16x256xf32>
    %97 = math.exp %96 : vector<16x256xf32>
    %cst_34 = arith.constant 1.000000e+00 : f32
    %98 = vector.broadcast %cst_34 : f32 to vector<16x256xf32>
    %99 = arith.addf %98, %97 : vector<16x256xf32>
    %100 = arith.divf %98, %99 : vector<16x256xf32>
    %101 = arith.mulf %95, %100 : vector<16x256xf32>
    %c17_i32_35 = arith.constant 17 : i32
    %102 = tpu.dynamic_rotate %101 by %c17_i32_35 dim 1 : vector<16x256xf32>, i32 -> vector<16x256xf32>
    %103 = vector.extract_strided_slice %0 {offsets = [0, 0, 0], sizes = [1, 1, 256], strides = [1, 1, 1]} : vector<9x1x256xf32> to vector<1x1x256xf32>
    %104 = vector.shape_cast %103 : vector<1x1x256xf32> to vector<1x256xf32>
    %105 = vector.broadcast %104 : vector<1x256xf32> to vector<16x256xf32>
    %106 = arith.mulf %102, %105 : vector<16x256xf32>
    %c16_i32_36 = arith.constant 16 : i32
    %107 = tpu.dynamic_rotate %101 by %c16_i32_36 dim 1 : vector<16x256xf32>, i32 -> vector<16x256xf32>
    %108 = vector.extract_strided_slice %0 {offsets = [1, 0, 0], sizes = [1, 1, 256], strides = [1, 1, 1]} : vector<9x1x256xf32> to vector<1x1x256xf32>
    %109 = vector.shape_cast %108 : vector<1x1x256xf32> to vector<1x256xf32>
    %110 = vector.broadcast %109 : vector<1x256xf32> to vector<16x256xf32>
    %111 = arith.mulf %107, %110 : vector<16x256xf32>
    %c15_i32_37 = arith.constant 15 : i32
    %112 = tpu.dynamic_rotate %101 by %c15_i32_37 dim 1 : vector<16x256xf32>, i32 -> vector<16x256xf32>
    %113 = vector.extract_strided_slice %0 {offsets = [2, 0, 0], sizes = [1, 1, 256], strides = [1, 1, 1]} : vector<9x1x256xf32> to vector<1x1x256xf32>
    %114 = vector.shape_cast %113 : vector<1x1x256xf32> to vector<1x256xf32>
    %115 = vector.broadcast %114 : vector<1x256xf32> to vector<16x256xf32>
    %116 = arith.mulf %112, %115 : vector<16x256xf32>
    %c1_i32_38 = arith.constant 1 : i32
    %117 = tpu.dynamic_rotate %101 by %c1_i32_38 dim 1 : vector<16x256xf32>, i32 -> vector<16x256xf32>
    %118 = vector.extract_strided_slice %0 {offsets = [3, 0, 0], sizes = [1, 1, 256], strides = [1, 1, 1]} : vector<9x1x256xf32> to vector<1x1x256xf32>
    %119 = vector.shape_cast %118 : vector<1x1x256xf32> to vector<1x256xf32>
    %120 = vector.broadcast %119 : vector<1x256xf32> to vector<16x256xf32>
    %121 = arith.mulf %117, %120 : vector<16x256xf32>
    %c255_i32_39 = arith.constant 255 : i32
    %122 = tpu.dynamic_rotate %101 by %c255_i32_39 dim 1 : vector<16x256xf32>, i32 -> vector<16x256xf32>
    %123 = vector.extract_strided_slice %0 {offsets = [5, 0, 0], sizes = [1, 1, 256], strides = [1, 1, 1]} : vector<9x1x256xf32> to vector<1x1x256xf32>
    %124 = vector.shape_cast %123 : vector<1x1x256xf32> to vector<1x256xf32>
    %125 = vector.broadcast %124 : vector<1x256xf32> to vector<16x256xf32>
    %126 = arith.mulf %122, %125 : vector<16x256xf32>
    %c241_i32_40 = arith.constant 241 : i32
    %127 = tpu.dynamic_rotate %101 by %c241_i32_40 dim 1 : vector<16x256xf32>, i32 -> vector<16x256xf32>
    %128 = vector.extract_strided_slice %0 {offsets = [6, 0, 0], sizes = [1, 1, 256], strides = [1, 1, 1]} : vector<9x1x256xf32> to vector<1x1x256xf32>
    %129 = vector.shape_cast %128 : vector<1x1x256xf32> to vector<1x256xf32>
    %130 = vector.broadcast %129 : vector<1x256xf32> to vector<16x256xf32>
    %131 = arith.mulf %127, %130 : vector<16x256xf32>
    %c240_i32_41 = arith.constant 240 : i32
    %132 = tpu.dynamic_rotate %101 by %c240_i32_41 dim 1 : vector<16x256xf32>, i32 -> vector<16x256xf32>
    %133 = vector.extract_strided_slice %0 {offsets = [7, 0, 0], sizes = [1, 1, 256], strides = [1, 1, 1]} : vector<9x1x256xf32> to vector<1x1x256xf32>
    %134 = vector.shape_cast %133 : vector<1x1x256xf32> to vector<1x256xf32>
    %135 = vector.broadcast %134 : vector<1x256xf32> to vector<16x256xf32>
    %136 = arith.mulf %132, %135 : vector<16x256xf32>
    %c239_i32_42 = arith.constant 239 : i32
    %137 = tpu.dynamic_rotate %101 by %c239_i32_42 dim 1 : vector<16x256xf32>, i32 -> vector<16x256xf32>
    %138 = vector.extract_strided_slice %0 {offsets = [8, 0, 0], sizes = [1, 1, 256], strides = [1, 1, 1]} : vector<9x1x256xf32> to vector<1x1x256xf32>
    %139 = vector.shape_cast %138 : vector<1x1x256xf32> to vector<1x256xf32>
    %140 = vector.broadcast %139 : vector<1x256xf32> to vector<16x256xf32>
    %141 = arith.mulf %137, %140 : vector<16x256xf32>
    %142 = tpu.concatenate %106, %111, %116, %121, %101, %126, %131, %136, %141 in 0 : vector<16x256xf32>, vector<16x256xf32>, vector<16x256xf32>, vector<16x256xf32>, vector<16x256xf32>, vector<16x256xf32>, vector<16x256xf32>, vector<16x256xf32>, vector<16x256xf32> -> vector<144x256xf32>
    %cst_43 = arith.constant dense<0.000000e+00> : vector<16x256xf32>
    %143 = tpu.matmul %9, %142, %cst_43 {dimension_numbers = #tpu.dot_dimension_numbers<[1], [0], [0], [1], [0, 0, 1, 1], [], []>} : vector<16x144xf32>, vector<144x256xf32>, vector<16x256xf32> -> vector<16x256xf32>
    %144 = vector.broadcast %10 : vector<16x1xf32> to vector<16x256xf32>
    %145 = arith.addf %143, %144 : vector<16x256xf32>
    %cst_44 = arith.constant dense<0.000000e+00> : vector<16xf32>
    %146 = vector.multi_reduction <add>, %145, %cst_44 [1] : vector<16x256xf32> to vector<16xf32>
    %147 = vector.shape_cast %146 : vector<16xf32> to vector<16x1xf32>
    %148 = arith.mulf %145, %145 : vector<16x256xf32>
    %cst_45 = arith.constant dense<0.000000e+00> : vector<16xf32>
    %149 = vector.multi_reduction <add>, %148, %cst_45 [1] : vector<16x256xf32> to vector<16xf32>
    %150 = vector.shape_cast %149 : vector<16xf32> to vector<16x1xf32>
    %151 = tpu.concatenate %147, %150 in 1 : vector<16x1xf32>, vector<16x1xf32> -> vector<16x2xf32>
    %cst_46 = arith.constant dense<0.000000e+00> : vector<16x2xf32>
    %152 = tpu.matmul %11, %151, %cst_46 {dimension_numbers = #tpu.dot_dimension_numbers<[1], [0], [0], [1], [0, 0, 1, 1], [], []>} : vector<16x16xf32>, vector<16x2xf32>, vector<16x2xf32> -> vector<16x2xf32>
    %153 = vector.extract_strided_slice %152 {offsets = [0, 0], sizes = [16, 1], strides = [1, 1]} : vector<16x2xf32> to vector<16x1xf32>
    %154 = vector.extract_strided_slice %152 {offsets = [0, 1], sizes = [16, 1], strides = [1, 1]} : vector<16x2xf32> to vector<16x1xf32>
    %155 = arith.mulf %153, %153 : vector<16x1xf32>
    %156 = arith.subf %154, %155 : vector<16x1xf32>
    %cst_47 = arith.constant 9.99999974E-6 : f32
    %157 = vector.broadcast %cst_47 : f32 to vector<16x1xf32>
    %158 = arith.addf %156, %157 : vector<16x1xf32>
    %159 = math.rsqrt %158 : vector<16x1xf32>
    %160 = vector.broadcast %153 : vector<16x1xf32> to vector<16x256xf32>
    %161 = arith.subf %145, %160 : vector<16x256xf32>
    %162 = vector.broadcast %159 : vector<16x1xf32> to vector<16x256xf32>
    %163 = arith.mulf %161, %162 : vector<16x256xf32>
    %164 = vector.broadcast %12 : vector<16x1xf32> to vector<16x256xf32>
    %165 = arith.mulf %163, %164 : vector<16x256xf32>
    %166 = vector.broadcast %13 : vector<16x1xf32> to vector<16x256xf32>
    %167 = arith.addf %165, %166 : vector<16x256xf32>
    %168 = arith.negf %167 : vector<16x256xf32>
    %169 = math.exp %168 : vector<16x256xf32>
    %cst_48 = arith.constant 1.000000e+00 : f32
    %170 = vector.broadcast %cst_48 : f32 to vector<16x256xf32>
    %171 = arith.addf %170, %169 : vector<16x256xf32>
    %172 = arith.divf %170, %171 : vector<16x256xf32>
    %173 = arith.mulf %167, %172 : vector<16x256xf32>
    %174 = tpu.concatenate %173, %29 in 0 : vector<16x256xf32>, vector<8x256xf32> -> vector<24x256xf32>
    %cst_49 = arith.constant dense<0.000000e+00> : vector<24xf32>
    %175 = vector.multi_reduction <add>, %174, %cst_49 [1] : vector<24x256xf32> to vector<24xf32>
    %176 = vector.shape_cast %175 : vector<24xf32> to vector<24x1xf32>
    %177 = arith.mulf %174, %174 : vector<24x256xf32>
    %cst_50 = arith.constant dense<0.000000e+00> : vector<24xf32>
    %178 = vector.multi_reduction <add>, %177, %cst_50 [1] : vector<24x256xf32> to vector<24xf32>
    %179 = vector.shape_cast %178 : vector<24xf32> to vector<24x1xf32>
    %180 = tpu.concatenate %176, %179 in 1 : vector<24x1xf32>, vector<24x1xf32> -> vector<24x2xf32>
    %cst_51 = arith.constant dense<0.000000e+00> : vector<24x2xf32>
    %181 = tpu.matmul %14, %180, %cst_51 {dimension_numbers = #tpu.dot_dimension_numbers<[1], [0], [0], [1], [0, 0, 1, 1], [], []>} : vector<24x24xf32>, vector<24x2xf32>, vector<24x2xf32> -> vector<24x2xf32>
    %182 = vector.extract_strided_slice %181 {offsets = [0, 0], sizes = [24, 1], strides = [1, 1]} : vector<24x2xf32> to vector<24x1xf32>
    %183 = vector.extract_strided_slice %181 {offsets = [0, 1], sizes = [24, 1], strides = [1, 1]} : vector<24x2xf32> to vector<24x1xf32>
    %184 = arith.mulf %182, %182 : vector<24x1xf32>
    %185 = arith.subf %183, %184 : vector<24x1xf32>
    %cst_52 = arith.constant 9.99999974E-6 : f32
    %186 = vector.broadcast %cst_52 : f32 to vector<24x1xf32>
    %187 = arith.addf %185, %186 : vector<24x1xf32>
    %188 = math.rsqrt %187 : vector<24x1xf32>
    %189 = vector.broadcast %182 : vector<24x1xf32> to vector<24x256xf32>
    %190 = arith.subf %174, %189 : vector<24x256xf32>
    %191 = vector.broadcast %188 : vector<24x1xf32> to vector<24x256xf32>
    %192 = arith.mulf %190, %191 : vector<24x256xf32>
    %193 = vector.broadcast %15 : vector<24x1xf32> to vector<24x256xf32>
    %194 = arith.mulf %192, %193 : vector<24x256xf32>
    %195 = vector.broadcast %16 : vector<24x1xf32> to vector<24x256xf32>
    %196 = arith.addf %194, %195 : vector<24x256xf32>
    %197 = arith.negf %196 : vector<24x256xf32>
    %198 = math.exp %197 : vector<24x256xf32>
    %cst_53 = arith.constant 1.000000e+00 : f32
    %199 = vector.broadcast %cst_53 : f32 to vector<24x256xf32>
    %200 = arith.addf %199, %198 : vector<24x256xf32>
    %201 = arith.divf %199, %200 : vector<24x256xf32>
    %202 = arith.mulf %196, %201 : vector<24x256xf32>
    %cst_54 = arith.constant dense<0.000000e+00> : vector<3x256xf32>
    %203 = tpu.matmul %17, %202, %cst_54 {dimension_numbers = #tpu.dot_dimension_numbers<[1], [0], [0], [1], [0, 0, 1, 1], [], []>} : vector<3x24xf32>, vector<24x256xf32>, vector<3x256xf32> -> vector<3x256xf32>
    %204 = vector.broadcast %18 : vector<3x1xf32> to vector<3x256xf32>
    %205 = arith.addf %203, %204 : vector<3x256xf32>
    %c0_55 = arith.constant 0 : index
    %c0_56 = arith.constant 0 : index
    %c0_57 = arith.constant 0 : index
    %206 = vector.load %arg6[%c0_55, %c0_56, %c0_57] : memref<2x3x256xf32, #tpu.memory_space<vmem>>, vector<1x3x256xf32>
    %207 = vector.shape_cast %206 : vector<1x3x256xf32> to vector<3x256xf32>
    %208 = vector.shape_cast %205 : vector<3x256xf32> to vector<1x3x256xf32>
    tpu.vector_store %arg6[%c0_55, %c0_56, %c0_57], %208 {strides = array<i32>} : memref<2x3x256xf32, #tpu.memory_space<vmem>>, vector<1x3x256xf32>,
    %c1_58 = arith.constant 1 : index
    %c0_59 = arith.constant 0 : index
    %c0_60 = arith.constant 0 : index
    %209 = vector.load %arg1[%c1_58, %c0_59, %c0_60] : memref<2x3x256xf32, #tpu.memory_space<vmem>>, vector<1x3x256xf32>
    %210 = vector.shape_cast %209 : vector<1x3x256xf32> to vector<3x256xf32>
    %c1_61 = arith.constant 1 : index
    %c0_62 = arith.constant 0 : index
    %c0_63 = arith.constant 0 : index
    %211 = vector.load %arg2[%c1_61, %c0_62, %c0_63] : memref<2x1x256xf32, #tpu.memory_space<vmem>>, vector<1x1x256xf32>
    %212 = vector.shape_cast %211 : vector<1x1x256xf32> to vector<1x256xf32>
    %cst_64 = arith.constant dense<0.000000e+00> : vector<8x256xf32>
    %213 = tpu.matmul %1, %210, %cst_64 {dimension_numbers = #tpu.dot_dimension_numbers<[1], [0], [0], [1], [0, 0, 1, 1], [], []>} : vector<8x3xf32>, vector<3x256xf32>, vector<8x256xf32> -> vector<8x256xf32>
    %214 = vector.broadcast %2 : vector<8x1xf32> to vector<8x256xf32>
    %215 = vector.broadcast %212 : vector<1x256xf32> to vector<8x256xf32>
    %216 = arith.mulf %214, %215 : vector<8x256xf32>
    %217 = arith.addf %213, %216 : vector<8x256xf32>
    %218 = vector.broadcast %3 : vector<8x1xf32> to vector<8x256xf32>
    %219 = arith.addf %217, %218 : vector<8x256xf32>
    %c17_i32_65 = arith.constant 17 : i32
    %220 = tpu.dynamic_rotate %219 by %c17_i32_65 dim 1 : vector<8x256xf32>, i32 -> vector<8x256xf32>
    %221 = vector.extract_strided_slice %0 {offsets = [0, 0, 0], sizes = [1, 1, 256], strides = [1, 1, 1]} : vector<9x1x256xf32> to vector<1x1x256xf32>
    %222 = vector.shape_cast %221 : vector<1x1x256xf32> to vector<1x256xf32>
    %223 = vector.broadcast %222 : vector<1x256xf32> to vector<8x256xf32>
    %224 = arith.mulf %220, %223 : vector<8x256xf32>
    %c16_i32_66 = arith.constant 16 : i32
    %225 = tpu.dynamic_rotate %219 by %c16_i32_66 dim 1 : vector<8x256xf32>, i32 -> vector<8x256xf32>
    %226 = vector.extract_strided_slice %0 {offsets = [1, 0, 0], sizes = [1, 1, 256], strides = [1, 1, 1]} : vector<9x1x256xf32> to vector<1x1x256xf32>
    %227 = vector.shape_cast %226 : vector<1x1x256xf32> to vector<1x256xf32>
    %228 = vector.broadcast %227 : vector<1x256xf32> to vector<8x256xf32>
    %229 = arith.mulf %225, %228 : vector<8x256xf32>
    %c15_i32_67 = arith.constant 15 : i32
    %230 = tpu.dynamic_rotate %219 by %c15_i32_67 dim 1 : vector<8x256xf32>, i32 -> vector<8x256xf32>
    %231 = vector.extract_strided_slice %0 {offsets = [2, 0, 0], sizes = [1, 1, 256], strides = [1, 1, 1]} : vector<9x1x256xf32> to vector<1x1x256xf32>
    %232 = vector.shape_cast %231 : vector<1x1x256xf32> to vector<1x256xf32>
    %233 = vector.broadcast %232 : vector<1x256xf32> to vector<8x256xf32>
    %234 = arith.mulf %230, %233 : vector<8x256xf32>
    %c1_i32_68 = arith.constant 1 : i32
    %235 = tpu.dynamic_rotate %219 by %c1_i32_68 dim 1 : vector<8x256xf32>, i32 -> vector<8x256xf32>
    %236 = vector.extract_strided_slice %0 {offsets = [3, 0, 0], sizes = [1, 1, 256], strides = [1, 1, 1]} : vector<9x1x256xf32> to vector<1x1x256xf32>
    %237 = vector.shape_cast %236 : vector<1x1x256xf32> to vector<1x256xf32>
    %238 = vector.broadcast %237 : vector<1x256xf32> to vector<8x256xf32>
    %239 = arith.mulf %235, %238 : vector<8x256xf32>
    %c255_i32_69 = arith.constant 255 : i32
    %240 = tpu.dynamic_rotate %219 by %c255_i32_69 dim 1 : vector<8x256xf32>, i32 -> vector<8x256xf32>
    %241 = vector.extract_strided_slice %0 {offsets = [5, 0, 0], sizes = [1, 1, 256], strides = [1, 1, 1]} : vector<9x1x256xf32> to vector<1x1x256xf32>
    %242 = vector.shape_cast %241 : vector<1x1x256xf32> to vector<1x256xf32>
    %243 = vector.broadcast %242 : vector<1x256xf32> to vector<8x256xf32>
    %244 = arith.mulf %240, %243 : vector<8x256xf32>
    %c241_i32_70 = arith.constant 241 : i32
    %245 = tpu.dynamic_rotate %219 by %c241_i32_70 dim 1 : vector<8x256xf32>, i32 -> vector<8x256xf32>
    %246 = vector.extract_strided_slice %0 {offsets = [6, 0, 0], sizes = [1, 1, 256], strides = [1, 1, 1]} : vector<9x1x256xf32> to vector<1x1x256xf32>
    %247 = vector.shape_cast %246 : vector<1x1x256xf32> to vector<1x256xf32>
    %248 = vector.broadcast %247 : vector<1x256xf32> to vector<8x256xf32>
    %249 = arith.mulf %245, %248 : vector<8x256xf32>
    %c240_i32_71 = arith.constant 240 : i32
    %250 = tpu.dynamic_rotate %219 by %c240_i32_71 dim 1 : vector<8x256xf32>, i32 -> vector<8x256xf32>
    %251 = vector.extract_strided_slice %0 {offsets = [7, 0, 0], sizes = [1, 1, 256], strides = [1, 1, 1]} : vector<9x1x256xf32> to vector<1x1x256xf32>
    %252 = vector.shape_cast %251 : vector<1x1x256xf32> to vector<1x256xf32>
    %253 = vector.broadcast %252 : vector<1x256xf32> to vector<8x256xf32>
    %254 = arith.mulf %250, %253 : vector<8x256xf32>
    %c239_i32_72 = arith.constant 239 : i32
    %255 = tpu.dynamic_rotate %219 by %c239_i32_72 dim 1 : vector<8x256xf32>, i32 -> vector<8x256xf32>
    %256 = vector.extract_strided_slice %0 {offsets = [8, 0, 0], sizes = [1, 1, 256], strides = [1, 1, 1]} : vector<9x1x256xf32> to vector<1x1x256xf32>
    %257 = vector.shape_cast %256 : vector<1x1x256xf32> to vector<1x256xf32>
    %258 = vector.broadcast %257 : vector<1x256xf32> to vector<8x256xf32>
    %259 = arith.mulf %255, %258 : vector<8x256xf32>
    %260 = tpu.concatenate %224, %229, %234, %239, %219, %244, %249, %254, %259 in 0 : vector<8x256xf32>, vector<8x256xf32>, vector<8x256xf32>, vector<8x256xf32>, vector<8x256xf32>, vector<8x256xf32>, vector<8x256xf32>, vector<8x256xf32>, vector<8x256xf32> -> vector<72x256xf32>
    %cst_73 = arith.constant dense<0.000000e+00> : vector<16x256xf32>
    %261 = tpu.matmul %4, %260, %cst_73 {dimension_numbers = #tpu.dot_dimension_numbers<[1], [0], [0], [1], [0, 0, 1, 1], [], []>} : vector<16x72xf32>, vector<72x256xf32>, vector<16x256xf32> -> vector<16x256xf32>
    %262 = vector.broadcast %5 : vector<16x1xf32> to vector<16x256xf32>
    %263 = arith.addf %261, %262 : vector<16x256xf32>
    %cst_74 = arith.constant dense<0.000000e+00> : vector<16xf32>
    %264 = vector.multi_reduction <add>, %263, %cst_74 [1] : vector<16x256xf32> to vector<16xf32>
    %265 = vector.shape_cast %264 : vector<16xf32> to vector<16x1xf32>
    %266 = arith.mulf %263, %263 : vector<16x256xf32>
    %cst_75 = arith.constant dense<0.000000e+00> : vector<16xf32>
    %267 = vector.multi_reduction <add>, %266, %cst_75 [1] : vector<16x256xf32> to vector<16xf32>
    %268 = vector.shape_cast %267 : vector<16xf32> to vector<16x1xf32>
    %269 = tpu.concatenate %265, %268 in 1 : vector<16x1xf32>, vector<16x1xf32> -> vector<16x2xf32>
    %cst_76 = arith.constant dense<0.000000e+00> : vector<16x2xf32>
    %270 = tpu.matmul %6, %269, %cst_76 {dimension_numbers = #tpu.dot_dimension_numbers<[1], [0], [0], [1], [0, 0, 1, 1], [], []>} : vector<16x16xf32>, vector<16x2xf32>, vector<16x2xf32> -> vector<16x2xf32>
    %271 = vector.extract_strided_slice %270 {offsets = [0, 0], sizes = [16, 1], strides = [1, 1]} : vector<16x2xf32> to vector<16x1xf32>
    %272 = vector.extract_strided_slice %270 {offsets = [0, 1], sizes = [16, 1], strides = [1, 1]} : vector<16x2xf32> to vector<16x1xf32>
    %273 = arith.mulf %271, %271 : vector<16x1xf32>
    %274 = arith.subf %272, %273 : vector<16x1xf32>
    %cst_77 = arith.constant 9.99999974E-6 : f32
    %275 = vector.broadcast %cst_77 : f32 to vector<16x1xf32>
    %276 = arith.addf %274, %275 : vector<16x1xf32>
    %277 = math.rsqrt %276 : vector<16x1xf32>
    %278 = vector.broadcast %271 : vector<16x1xf32> to vector<16x256xf32>
    %279 = arith.subf %263, %278 : vector<16x256xf32>
    %280 = vector.broadcast %277 : vector<16x1xf32> to vector<16x256xf32>
    %281 = arith.mulf %279, %280 : vector<16x256xf32>
    %282 = vector.broadcast %7 : vector<16x1xf32> to vector<16x256xf32>
    %283 = arith.mulf %281, %282 : vector<16x256xf32>
    %284 = vector.broadcast %8 : vector<16x1xf32> to vector<16x256xf32>
    %285 = arith.addf %283, %284 : vector<16x256xf32>
    %286 = arith.negf %285 : vector<16x256xf32>
    %287 = math.exp %286 : vector<16x256xf32>
    %cst_78 = arith.constant 1.000000e+00 : f32
    %288 = vector.broadcast %cst_78 : f32 to vector<16x256xf32>
    %289 = arith.addf %288, %287 : vector<16x256xf32>
    %290 = arith.divf %288, %289 : vector<16x256xf32>
    %291 = arith.mulf %285, %290 : vector<16x256xf32>
    %c17_i32_79 = arith.constant 17 : i32
    %292 = tpu.dynamic_rotate %291 by %c17_i32_79 dim 1 : vector<16x256xf32>, i32 -> vector<16x256xf32>
    %293 = vector.extract_strided_slice %0 {offsets = [0, 0, 0], sizes = [1, 1, 256], strides = [1, 1, 1]} : vector<9x1x256xf32> to vector<1x1x256xf32>
    %294 = vector.shape_cast %293 : vector<1x1x256xf32> to vector<1x256xf32>
    %295 = vector.broadcast %294 : vector<1x256xf32> to vector<16x256xf32>
    %296 = arith.mulf %292, %295 : vector<16x256xf32>
    %c16_i32_80 = arith.constant 16 : i32
    %297 = tpu.dynamic_rotate %291 by %c16_i32_80 dim 1 : vector<16x256xf32>, i32 -> vector<16x256xf32>
    %298 = vector.extract_strided_slice %0 {offsets = [1, 0, 0], sizes = [1, 1, 256], strides = [1, 1, 1]} : vector<9x1x256xf32> to vector<1x1x256xf32>
    %299 = vector.shape_cast %298 : vector<1x1x256xf32> to vector<1x256xf32>
    %300 = vector.broadcast %299 : vector<1x256xf32> to vector<16x256xf32>
    %301 = arith.mulf %297, %300 : vector<16x256xf32>
    %c15_i32_81 = arith.constant 15 : i32
    %302 = tpu.dynamic_rotate %291 by %c15_i32_81 dim 1 : vector<16x256xf32>, i32 -> vector<16x256xf32>
    %303 = vector.extract_strided_slice %0 {offsets = [2, 0, 0], sizes = [1, 1, 256], strides = [1, 1, 1]} : vector<9x1x256xf32> to vector<1x1x256xf32>
    %304 = vector.shape_cast %303 : vector<1x1x256xf32> to vector<1x256xf32>
    %305 = vector.broadcast %304 : vector<1x256xf32> to vector<16x256xf32>
    %306 = arith.mulf %302, %305 : vector<16x256xf32>
    %c1_i32_82 = arith.constant 1 : i32
    %307 = tpu.dynamic_rotate %291 by %c1_i32_82 dim 1 : vector<16x256xf32>, i32 -> vector<16x256xf32>
    %308 = vector.extract_strided_slice %0 {offsets = [3, 0, 0], sizes = [1, 1, 256], strides = [1, 1, 1]} : vector<9x1x256xf32> to vector<1x1x256xf32>
    %309 = vector.shape_cast %308 : vector<1x1x256xf32> to vector<1x256xf32>
    %310 = vector.broadcast %309 : vector<1x256xf32> to vector<16x256xf32>
    %311 = arith.mulf %307, %310 : vector<16x256xf32>
    %c255_i32_83 = arith.constant 255 : i32
    %312 = tpu.dynamic_rotate %291 by %c255_i32_83 dim 1 : vector<16x256xf32>, i32 -> vector<16x256xf32>
    %313 = vector.extract_strided_slice %0 {offsets = [5, 0, 0], sizes = [1, 1, 256], strides = [1, 1, 1]} : vector<9x1x256xf32> to vector<1x1x256xf32>
    %314 = vector.shape_cast %313 : vector<1x1x256xf32> to vector<1x256xf32>
    %315 = vector.broadcast %314 : vector<1x256xf32> to vector<16x256xf32>
    %316 = arith.mulf %312, %315 : vector<16x256xf32>
    %c241_i32_84 = arith.constant 241 : i32
    %317 = tpu.dynamic_rotate %291 by %c241_i32_84 dim 1 : vector<16x256xf32>, i32 -> vector<16x256xf32>
    %318 = vector.extract_strided_slice %0 {offsets = [6, 0, 0], sizes = [1, 1, 256], strides = [1, 1, 1]} : vector<9x1x256xf32> to vector<1x1x256xf32>
    %319 = vector.shape_cast %318 : vector<1x1x256xf32> to vector<1x256xf32>
    %320 = vector.broadcast %319 : vector<1x256xf32> to vector<16x256xf32>
    %321 = arith.mulf %317, %320 : vector<16x256xf32>
    %c240_i32_85 = arith.constant 240 : i32
    %322 = tpu.dynamic_rotate %291 by %c240_i32_85 dim 1 : vector<16x256xf32>, i32 -> vector<16x256xf32>
    %323 = vector.extract_strided_slice %0 {offsets = [7, 0, 0], sizes = [1, 1, 256], strides = [1, 1, 1]} : vector<9x1x256xf32> to vector<1x1x256xf32>
    %324 = vector.shape_cast %323 : vector<1x1x256xf32> to vector<1x256xf32>
    %325 = vector.broadcast %324 : vector<1x256xf32> to vector<16x256xf32>
    %326 = arith.mulf %322, %325 : vector<16x256xf32>
    %c239_i32_86 = arith.constant 239 : i32
    %327 = tpu.dynamic_rotate %291 by %c239_i32_86 dim 1 : vector<16x256xf32>, i32 -> vector<16x256xf32>
    %328 = vector.extract_strided_slice %0 {offsets = [8, 0, 0], sizes = [1, 1, 256], strides = [1, 1, 1]} : vector<9x1x256xf32> to vector<1x1x256xf32>
    %329 = vector.shape_cast %328 : vector<1x1x256xf32> to vector<1x256xf32>
    %330 = vector.broadcast %329 : vector<1x256xf32> to vector<16x256xf32>
    %331 = arith.mulf %327, %330 : vector<16x256xf32>
    %332 = tpu.concatenate %296, %301, %306, %311, %291, %316, %321, %326, %331 in 0 : vector<16x256xf32>, vector<16x256xf32>, vector<16x256xf32>, vector<16x256xf32>, vector<16x256xf32>, vector<16x256xf32>, vector<16x256xf32>, vector<16x256xf32>, vector<16x256xf32> -> vector<144x256xf32>
    %cst_87 = arith.constant dense<0.000000e+00> : vector<16x256xf32>
    %333 = tpu.matmul %9, %332, %cst_87 {dimension_numbers = #tpu.dot_dimension_numbers<[1], [0], [0], [1], [0, 0, 1, 1], [], []>} : vector<16x144xf32>, vector<144x256xf32>, vector<16x256xf32> -> vector<16x256xf32>
    %334 = vector.broadcast %10 : vector<16x1xf32> to vector<16x256xf32>
    %335 = arith.addf %333, %334 : vector<16x256xf32>
    %cst_88 = arith.constant dense<0.000000e+00> : vector<16xf32>
    %336 = vector.multi_reduction <add>, %335, %cst_88 [1] : vector<16x256xf32> to vector<16xf32>
    %337 = vector.shape_cast %336 : vector<16xf32> to vector<16x1xf32>
    %338 = arith.mulf %335, %335 : vector<16x256xf32>
    %cst_89 = arith.constant dense<0.000000e+00> : vector<16xf32>
    %339 = vector.multi_reduction <add>, %338, %cst_89 [1] : vector<16x256xf32> to vector<16xf32>
    %340 = vector.shape_cast %339 : vector<16xf32> to vector<16x1xf32>
    %341 = tpu.concatenate %337, %340 in 1 : vector<16x1xf32>, vector<16x1xf32> -> vector<16x2xf32>
    %cst_90 = arith.constant dense<0.000000e+00> : vector<16x2xf32>
    %342 = tpu.matmul %11, %341, %cst_90 {dimension_numbers = #tpu.dot_dimension_numbers<[1], [0], [0], [1], [0, 0, 1, 1], [], []>} : vector<16x16xf32>, vector<16x2xf32>, vector<16x2xf32> -> vector<16x2xf32>
    %343 = vector.extract_strided_slice %342 {offsets = [0, 0], sizes = [16, 1], strides = [1, 1]} : vector<16x2xf32> to vector<16x1xf32>
    %344 = vector.extract_strided_slice %342 {offsets = [0, 1], sizes = [16, 1], strides = [1, 1]} : vector<16x2xf32> to vector<16x1xf32>
    %345 = arith.mulf %343, %343 : vector<16x1xf32>
    %346 = arith.subf %344, %345 : vector<16x1xf32>
    %cst_91 = arith.constant 9.99999974E-6 : f32
    %347 = vector.broadcast %cst_91 : f32 to vector<16x1xf32>
    %348 = arith.addf %346, %347 : vector<16x1xf32>
    %349 = math.rsqrt %348 : vector<16x1xf32>
    %350 = vector.broadcast %343 : vector<16x1xf32> to vector<16x256xf32>
    %351 = arith.subf %335, %350 : vector<16x256xf32>
    %352 = vector.broadcast %349 : vector<16x1xf32> to vector<16x256xf32>
    %353 = arith.mulf %351, %352 : vector<16x256xf32>
    %354 = vector.broadcast %12 : vector<16x1xf32> to vector<16x256xf32>
    %355 = arith.mulf %353, %354 : vector<16x256xf32>
    %356 = vector.broadcast %13 : vector<16x1xf32> to vector<16x256xf32>
    %357 = arith.addf %355, %356 : vector<16x256xf32>
    %358 = arith.negf %357 : vector<16x256xf32>
    %359 = math.exp %358 : vector<16x256xf32>
    %cst_92 = arith.constant 1.000000e+00 : f32
    %360 = vector.broadcast %cst_92 : f32 to vector<16x256xf32>
    %361 = arith.addf %360, %359 : vector<16x256xf32>
    %362 = arith.divf %360, %361 : vector<16x256xf32>
    %363 = arith.mulf %357, %362 : vector<16x256xf32>
    %364 = tpu.concatenate %363, %219 in 0 : vector<16x256xf32>, vector<8x256xf32> -> vector<24x256xf32>
    %cst_93 = arith.constant dense<0.000000e+00> : vector<24xf32>
    %365 = vector.multi_reduction <add>, %364, %cst_93 [1] : vector<24x256xf32> to vector<24xf32>
    %366 = vector.shape_cast %365 : vector<24xf32> to vector<24x1xf32>
    %367 = arith.mulf %364, %364 : vector<24x256xf32>
    %cst_94 = arith.constant dense<0.000000e+00> : vector<24xf32>
    %368 = vector.multi_reduction <add>, %367, %cst_94 [1] : vector<24x256xf32> to vector<24xf32>
    %369 = vector.shape_cast %368 : vector<24xf32> to vector<24x1xf32>
    %370 = tpu.concatenate %366, %369 in 1 : vector<24x1xf32>, vector<24x1xf32> -> vector<24x2xf32>
    %cst_95 = arith.constant dense<0.000000e+00> : vector<24x2xf32>
    %371 = tpu.matmul %14, %370, %cst_95 {dimension_numbers = #tpu.dot_dimension_numbers<[1], [0], [0], [1], [0, 0, 1, 1], [], []>} : vector<24x24xf32>, vector<24x2xf32>, vector<24x2xf32> -> vector<24x2xf32>
    %372 = vector.extract_strided_slice %371 {offsets = [0, 0], sizes = [24, 1], strides = [1, 1]} : vector<24x2xf32> to vector<24x1xf32>
    %373 = vector.extract_strided_slice %371 {offsets = [0, 1], sizes = [24, 1], strides = [1, 1]} : vector<24x2xf32> to vector<24x1xf32>
    %374 = arith.mulf %372, %372 : vector<24x1xf32>
    %375 = arith.subf %373, %374 : vector<24x1xf32>
    %cst_96 = arith.constant 9.99999974E-6 : f32
    %376 = vector.broadcast %cst_96 : f32 to vector<24x1xf32>
    %377 = arith.addf %375, %376 : vector<24x1xf32>
    %378 = math.rsqrt %377 : vector<24x1xf32>
    %379 = vector.broadcast %372 : vector<24x1xf32> to vector<24x256xf32>
    %380 = arith.subf %364, %379 : vector<24x256xf32>
    %381 = vector.broadcast %378 : vector<24x1xf32> to vector<24x256xf32>
    %382 = arith.mulf %380, %381 : vector<24x256xf32>
    %383 = vector.broadcast %15 : vector<24x1xf32> to vector<24x256xf32>
    %384 = arith.mulf %382, %383 : vector<24x256xf32>
    %385 = vector.broadcast %16 : vector<24x1xf32> to vector<24x256xf32>
    %386 = arith.addf %384, %385 : vector<24x256xf32>
    %387 = arith.negf %386 : vector<24x256xf32>
    %388 = math.exp %387 : vector<24x256xf32>
    %cst_97 = arith.constant 1.000000e+00 : f32
    %389 = vector.broadcast %cst_97 : f32 to vector<24x256xf32>
    %390 = arith.addf %389, %388 : vector<24x256xf32>
    %391 = arith.divf %389, %390 : vector<24x256xf32>
    %392 = arith.mulf %386, %391 : vector<24x256xf32>
    %cst_98 = arith.constant dense<0.000000e+00> : vector<3x256xf32>
    %393 = tpu.matmul %17, %392, %cst_98 {dimension_numbers = #tpu.dot_dimension_numbers<[1], [0], [0], [1], [0, 0, 1, 1], [], []>} : vector<3x24xf32>, vector<24x256xf32>, vector<3x256xf32> -> vector<3x256xf32>
    %394 = vector.broadcast %18 : vector<3x1xf32> to vector<3x256xf32>
    %395 = arith.addf %393, %394 : vector<3x256xf32>
    %c1_99 = arith.constant 1 : index
    %c0_100 = arith.constant 0 : index
    %c0_101 = arith.constant 0 : index
    %396 = vector.load %arg6[%c1_99, %c0_100, %c0_101] : memref<2x3x256xf32, #tpu.memory_space<vmem>>, vector<1x3x256xf32>
    %397 = vector.shape_cast %396 : vector<1x3x256xf32> to vector<3x256xf32>
    %398 = vector.shape_cast %395 : vector<3x256xf32> to vector<1x3x256xf32>
    tpu.vector_store %arg6[%c1_99, %c0_100, %c0_101], %398 {strides = array<i32>} : memref<2x3x256xf32, #tpu.memory_space<vmem>>, vector<1x3x256xf32>,
    return
  }
  func.func @transform_0(%arg0: i32) -> (i32, i32, i32) {
    %c0_i32 = arith.constant 0 : i32
    %c0_i32_0 = arith.constant 0 : i32
    %c0_i32_1 = arith.constant 0 : i32
    return %arg0, %c0_i32, %c0_i32_0 : i32, i32, i32
  }
  func.func @transform_1(%arg0: i32) -> (i32, i32, i32) {
    %c0_i32 = arith.constant 0 : i32
    %c0_i32_0 = arith.constant 0 : i32
    %c0_i32_1 = arith.constant 0 : i32
    return %arg0, %c0_i32, %c0_i32_0 : i32, i32, i32
  }
  func.func @transform_2(%arg0: i32) -> (i32, i32, i32) {
    %c0_i32 = arith.constant 0 : i32
    %c0_i32_0 = arith.constant 0 : i32
    %c0_i32_1 = arith.constant 0 : i32
    %c0_i32_2 = arith.constant 0 : i32
    return %c0_i32, %c0_i32_0, %c0_i32_1 : i32, i32, i32
  }
  func.func @transform_3(%arg0: i32) -> (i32, i32) {
    %c0_i32 = arith.constant 0 : i32
    %c0_i32_0 = arith.constant 0 : i32
    %c0_i32_1 = arith.constant 0 : i32
    return %c0_i32, %c0_i32_0 : i32, i32
  }
  func.func @transform_4(%arg0: i32) -> (i32, i32) {
    %c0_i32 = arith.constant 0 : i32
    %c0_i32_0 = arith.constant 0 : i32
    %c0_i32_1 = arith.constant 0 : i32
    return %c0_i32, %c0_i32_0 : i32, i32
  }
  func.func @transform_5(%arg0: i32) -> (i32, i32, i32) {
    %c0_i32 = arith.constant 0 : i32
    %c0_i32_0 = arith.constant 0 : i32
    %c0_i32_1 = arith.constant 0 : i32
    return %arg0, %c0_i32, %c0_i32_0 : i32, i32, i32
  }
}

</mosaic_0001>

<bundles_post_ra>
// kernel: encoder_forward.1
= control target key start
LH: loop header
LB: loop body
LE: loop exit
PB: predicated region body
PF: predicated region fallthrough
CT: control target
= control target key end

     0   :  { %v4159_v1 = vmov 1   ;;  %vm4154_vm0 = vcmask 1042432   ;;  %vm4153_vm1 = vcmask 23552   ;;  %v4157_v7 = vmov 0   ;;  %s2722_s27 = smov 127   ;;  %s2723_s28 = smov 112   ;;  %s4146_s0 = inlined_call_operand.vmem [shape: f32[2,3,256], index: 0, kind: input, shape index: {}]   ;;  %s4147_s3 = inlined_call_operand.vmem [shape: f32[24,11], index: 3, kind: input, shape index: {}]   ;;  %s4148_s4 = inlined_call_operand.vmem [shape: f32[104,144], index: 4, kind: input, shape index: {}]   ;;  %s4149_s1 = inlined_call_operand.vmem [shape: f32[2,1,256], index: 1, kind: input, shape index: {}]   ;;  %s4150_s2 = inlined_call_operand.vmem [shape: f32[9,1,256], index: 2, kind: input, shape index: {}]   ;;  %s4151_s5 = inlined_call_operand.vmem [shape: f32[2,3,256], index: 5, kind: output, shape index: {}]  }
   0x1   :  { %v47_v0 = vld [vmem:[%s4146_s0] sm:$0x77]  ;;  %2522 = vset.pattern.permute.xlu0 %v4159_v1  ;;  %v2463_v3 = vld [vmem:[%s4146_s0 + $0x8] sm:$0x77]  ;;  %s2724_s29 = smov 111   ;;  %s2725_s30 = smov 1   ;;  %v124_v22 = vlaneseq }
   0x2   :  { %62 = vst [vmem:[#allocation1] ss:$2 sm:$0xff] %v47_v0  ;;  %v2776_v2 = vld [vmem:[%s4147_s3] sm:$0xff]  ;;  %s2726_s6 = smov 16   ;;  %s2727_s7 = smov 113   ;;  %v2896_v57 = vld [vmem:[%s4147_s3 + $0x8] sm:$0xff] }
   0x3   :  { %51 = vperm.xlu0 %2522, %v2776_v2   ;;  %v28_v4 = vld [vmem:[%s4148_s4] sm:$0xff]  ;;  %s2728_s8 = smov 17   ;;  %s2729_s9 = smov 15   ;;  %v2838_v25 = vand.u32 127, %v124_v22  ;;  %v27_v26 = vld [vmem:[%s4150_s2 + $0x10] sm:$0x3] }
   0x4   :  { %v48_v9 = vld [vmem:[%s4149_s1] sm:$0x3]  ;;  %v26_v27 = vld [vmem:[%s4150_s2 + $0xe] sm:$0x3]  ;;  %v2847_v28 = vperm.slane %v27_v26, 0  ;;  %v2849_v29 = vperm.slane %v27_v26, 1 }
   0x5   :  { %v55_v10 = vperm.slane %v48_v9, 0  ;;  %v56_v15 = vperm.slane %v48_v9, 1  ;;  %vm224_vm2 = vcmp.lt.s32.totalorder %v2838_v25, 111  ;;  %vm210_vm3 = vcmp.lt.s32.totalorder %v2838_v25, 112  ;;  %v25_v41 = vld [vmem:[%s4150_s2 + $0xc] sm:$0x3] }
   0x6   :  { %v2852_v32 = vperm.slane %v26_v27, 0  ;;  %v2854_v33 = vperm.slane %v26_v27, 1  ;;  %vm196_vm4 = vcmp.lt.s32.totalorder %v2838_v25, 113  ;;  %v2872_v44 = vperm.slane %v25_v41, 0  ;;  %v24_v52 = vld [vmem:[%s4150_s2 + $0xa] sm:$0x3] }
   0x7   :  { %v2874_v45 = vperm.slane %v25_v41, 1  ;;  %vm4185_vm5 = vcmp.lt.s32.totalorder %v2838_v25, 127  ;;  %v2886_v54 = vperm.slane %v24_v52, 0  ;;  %v2888_v55 = vperm.slane %v24_v52, 1  ;;  %v23_v56 = vld [vmem:[%s4150_s2 + $0x6] sm:$0x3] }
   0x8   :  { %vm4184_vm6 = vcmp.lt.s32.totalorder %v2838_v25, 1  ;;  %v2730_v59 = vmov 2   ;;  %v2906_v0 = vperm.slane %v23_v56, 0  ;;  %vm4183_vm7 = vcmp.lt.s32.totalorder %v2838_v25, 15 }
   0x9   :  { %v63_v5 = vld.sshfl [vmem:[#allocation1] sm:$0xff pattern:$0x75316420]  ;;  %v64_v6 = vld.sshfl [vmem:[#allocation1 + $0x8] sm:$0xff pattern:$0x75316420]  ;;  %2524 = vset.pattern.permute.xlu1 %v2730_v59  ;;  %2525 = vset.pattern.permute.xlu2 %v2730_v59 }
   0xa   :  { %2428 = vmatpush.msk.msra.mxu0 %vm4154_vm0, %v63_v5  ;;  %2430 = vmatpush.msk.msra.mxu1 %vm4154_vm0, %v64_v6  ;;  %1338 = vst [vmem:[#allocation1] ss:$2 sm:$0xff] %v2463_v3  ;;  %v2908_v3 = vperm.slane %v23_v56, 1  ;;  %v22_v6 = vld [vmem:[%s4150_s2 + $0x4] sm:$0x3]  ;;  %vm4164_vm8 = vcmp.lt.s32.totalorder %v2838_v25, 16 }
   0xb   :  { %2429 = vmatmul.msk.f32.vlgmr.msra.gmra.mxu0 %vm4153_vm1, %v28_v4  ;;  %2431 = vmatmul.msk.f32.vlgmr.msra.gmra.mxu1 %vm4153_vm1, %v28_v4  ;;  %vm4163_vm9 = vcmp.lt.s32.totalorder %v2838_v25, 17  ;;  %vm4152_vm10 = vcmask 588800   ;;  %vm4155_vm11 = vcmask 7168   ;;  %vm4156_vm12 = vcmask 130048  }
   0xc   :  { %2523 = vset.pattern.permute.xlu0 %v4157_v7 }
   0xd   :  { %115 = vperm.xlu0 %2523, %v2776_v2  }
  0x75   :  { %v2791_v8 = vpop.permute.xlu0 %51 }
  0x76   :  { %v59_v11 = vmul.f32 %v55_v10, %v2791_v8  ;;  %v60_v18 = vmul.f32 %v56_v15, %v2791_v8  ;;  %v2925_v15 = vperm.slane %v22_v6, 1 }
  0x7f   :  { %v2797_v13 = vpop.permute.xlu0 %115 }
  0x88   :  { %v91_v12 = vpop.f32.mrf.mxu0  ;;  %v111_v17 = vpop.f32.mrf.mxu1 }
  0x89   :  { %v92_v14 = vadd.f32 %v91_v12, %v59_v11  ;;  %v112_v19 = vadd.f32 %v111_v17, %v60_v18 }
  0x8b   :  { %v2800_v16 = vadd.f32 %v2797_v13, %v92_v14  ;;  %v2810_v20 = vadd.f32 %v2797_v13, %v112_v19  ;;  %v2923_v14 = vperm.slane %v22_v6, 0 }
  0x8d   :  { %178 = vrot.lane.b32.xlu0 %v2800_v16, %s2722_s27  ;;  %206 = vrot.lane.b32.xlu2 %v2800_v16, %s2723_s28 }
  0x8e   :  { %220 = vrot.lane.b32.xlu1 %v2800_v16, %s2724_s29 }
  0x95   :  { %166 = vrot.lane.b32.xlu0 %v2810_v20, %s2725_s30  ;;  %208 = vrot.lane.b32.xlu2 %v2810_v20, %s2723_s28 }
  0x96   :  { %222 = vrot.lane.b32.xlu1 %v2810_v20, %s2724_s29 }
  0x9d   :  { %136 = vrot.lane.b32.xlu0 %v2800_v16, %s2726_s6  ;;  %194 = vrot.lane.b32.xlu2 %v2810_v20, %s2727_s7 }
  0x9e   :  { %192 = vrot.lane.b32.xlu1 %v2800_v16, %s2727_s7 }
  0xa5   :  { %122 = vrot.lane.b32.xlu0 %v2810_v20, %s2728_s8  ;;  %164 = vrot.lane.b32.xlu2 %v2800_v16, %s2725_s30 }
  0xa6   :  { %180 = vrot.lane.b32.xlu1 %v2810_v20, %s2722_s27 }
  0xad   :  { %152 = vrot.lane.b32.xlu2 %v2810_v20, %s2729_s9 }
  0xae   :  { %150 = vrot.lane.b32.xlu1 %v2800_v16, %s2729_s9 }
  0xb5   :  { %120 = vrot.lane.b32.xlu2 %v2800_v16, %s2728_s8 }
  0xb6   :  { %138 = vrot.lane.b32.xlu1 %v2810_v20, %s2726_s6 }
  0xbd   :  { %235 = vperm.xlu2 %2525, %v2776_v2  }
  0xbe   :  { %240 = vperm.xlu1 %2524, %v2896_v57  }
  0xc5   :  { %2526 = vset.pattern.permute.xlu2 %v4157_v7 }
  0xe7   :  { %v207_v21 = vpop.permute.xlu2 %206 }
  0xef   :  { %v209_v23 = vpop.permute.xlu2 %208 }
  0xf0   :  { %v211_v36 = vsel %vm210_vm3, %v207_v21, %v209_v23  ;;  %v212_v37 = vsel %vm210_vm3, %v209_v23, %v207_v21  ;;  %v21_v23 = vld [vmem:[%s4150_s2 + $0x2] sm:$0x3] }
  0xf1   :  { %v218_v42 = vmul.f32 %v2852_v32, %v211_v36  ;;  %v219_v43 = vmul.f32 %v2854_v33, %v212_v37  ;;  %v2941_v27 = vperm.slane %v21_v23, 0 }
  0xf7   :  { %v195_v38 = vpop.permute.xlu2 %194 }
  0xff   :  { %v179_v30 = vpop.permute.xlu0 %178  ;;  %v165_v53 = vpop.permute.xlu2 %164 }
 0x100   :  { %v221_v24 = vpop.permute.xlu1 %220 }
 0x107   :  { %v167_v49 = vpop.permute.xlu0 %166  ;;  %v153_v10 = vpop.permute.xlu2 %152 }
 0x108   :  { %v223_v31 = vpop.permute.xlu1 %222  ;;  %v170_v4 = vsel %vm4184_vm6, %v167_v49, %v165_v53  ;;  %v169_v5 = vsel %vm4184_vm6, %v165_v53, %v167_v49 }
 0x109   :  { %v225_v34 = vsel %vm224_vm2, %v221_v24, %v223_v31  ;;  %v226_v35 = vsel %vm224_vm2, %v223_v31, %v221_v24  ;;  %v176_v11 = vmul.f32 %v2906_v0, %v170_v4  ;;  %v177_v12 = vmul.f32 %v2908_v3, %v169_v5  ;;  %v20_v24 = vld [vmem:[%s4150_s2] sm:$0x3] }
 0x10a   :  { %v232_v39 = vmul.f32 %v2847_v28, %v225_v34  ;;  %v233_v40 = vmul.f32 %v2849_v29, %v226_v35  ;;  %v2946_v35 = vperm.slane %v20_v24, 0  ;;  %v2948_v36 = vperm.slane %v20_v24, 1  ;;  %v34_v24 = vld [vmem:[%s4148_s4 + $0x40] sm:$0xff] }
 0x10c   :  { %257 = vmatpush.msra.mxu2 %v232_v39  ;;  %280 = vmatpush.msra.mxu3 %v233_v40 }
 0x10e   :  { %258 = vmatpush.msra.mxu2 %v218_v42  ;;  %281 = vmatpush.msra.mxu3 %v219_v43 }
 0x10f   :  { %v137_v9 = vpop.permute.xlu0 %136  ;;  %v121_v31 = vpop.permute.xlu2 %120 }
 0x110   :  { %v193_v46 = vpop.permute.xlu1 %192 }
 0x111   :  { %v197_v47 = vsel %vm196_vm4, %v193_v46, %v195_v38  ;;  %v198_v48 = vsel %vm196_vm4, %v195_v38, %v193_v46 }
 0x112   :  { %v204_v50 = vmul.f32 %v2872_v44, %v197_v47  ;;  %v205_v51 = vmul.f32 %v2874_v45, %v198_v48  ;;  %v30_v47 = vld [vmem:[%s4148_s4 + $0x10] sm:$0xff]  ;;  %v31_v48 = vld [vmem:[%s4148_s4 + $0x20] sm:$0xff] }
 0x114   :  { %259 = vmatpush.msra.mxu2 %v204_v50  ;;  %282 = vmatpush.msra.mxu3 %v205_v51 }
 0x117   :  { %v123_v26 = vpop.permute.xlu0 %122  ;;  %v2972_v49 = vpop.permute.xlu2 %235 }
 0x118   :  { %v181_v58 = vpop.permute.xlu1 %180  ;;  %v128_v39 = vsel %vm4163_vm9, %v123_v26, %v121_v31  ;;  %v127_v40 = vsel %vm4163_vm9, %v121_v31, %v123_v26 }
 0x119   :  { %v183_v60 = vsel %vm4185_vm5, %v179_v30, %v181_v58  ;;  %v184_v61 = vsel %vm4185_vm5, %v181_v58, %v179_v30  ;;  %v2943_v30 = vperm.slane %v21_v23, 1  ;;  %v134_v43 = vmul.f32 %v2946_v35, %v128_v39 }
 0x11a   :  { %v190_v62 = vmul.f32 %v2886_v54, %v183_v60  ;;  %v191_v63 = vmul.f32 %v2888_v55, %v184_v61  ;;  %v135_v46 = vmul.f32 %v2948_v36, %v127_v40  ;;  %v2732_v40 = vmov 4  }
 0x11c   :  { %260 = vmatpush.msra.mxu2 %v190_v62  ;;  %283 = vmatpush.msra.mxu3 %v191_v63 }
 0x11e   :  { %261 = vmatpush.msra.mxu2 %v2800_v16  ;;  %284 = vmatpush.msra.mxu3 %v2810_v20 }
 0x120   :  { %262 = vmatpush.msra.mxu2 %v176_v11  ;;  %285 = vmatpush.msra.mxu3 %v177_v12  ;;  %v151_v17 = vpop.permute.xlu1 %150 }
 0x121   :  { %v156_v18 = vsel %vm4183_vm7, %v153_v10, %v151_v17  ;;  %v155_v19 = vsel %vm4183_vm7, %v151_v17, %v153_v10 }
 0x122   :  { %v162_v21 = vmul.f32 %v2923_v14, %v156_v18  ;;  %v163_v22 = vmul.f32 %v2925_v15, %v155_v19 }
 0x124   :  { %263 = vmatpush.msra.mxu2 %v162_v21  ;;  %286 = vmatpush.msra.mxu3 %v163_v22  ;;  %v33_v22 = vld [vmem:[%s4148_s4 + $0x30] sm:$0xff] }
 0x128   :  { %v139_v34 = vpop.permute.xlu1 %138 }
 0x129   :  { %v142_v37 = vsel %vm4164_vm8, %v139_v34, %v137_v9  ;;  %v141_v38 = vsel %vm4164_vm8, %v137_v9, %v139_v34 }
 0x12a   :  { %v148_v41 = vmul.f32 %v2941_v27, %v142_v37  ;;  %v149_v42 = vmul.f32 %v2943_v30, %v141_v38  ;;  %v2731_v38 = vmov 3  }
 0x12b   :  { %2529 = vset.pattern.permute.xlu1 %v2731_v38 }
 0x12c   :  { %264 = vmatpush.msra.mxu2 %v148_v41  ;;  %287 = vmatpush.msra.mxu3 %v149_v42 }
 0x12e   :  { %265 = vmatpush.msra.mxu2 %v134_v43  ;;  %288 = vmatpush.msra.mxu3 %v135_v46 }
 0x12f   :  { %2432 = vmatmul.msk.f32.vlgmr.msra.gmra.mxu2 %vm4152_vm10, %v30_v47  ;;  %2434 = vmatmul.msk.f32.vlgmr.msra.gmra.mxu3 %vm4152_vm10, %v30_v47 }
 0x130   :  { %v2982_v58 = vpop.permute.xlu1 %240 }
 0x137   :  { %2433 = vmatmul.msk.f32.gmra.mxu2 %vm4152_vm10, %v31_v48  ;;  %2435 = vmatmul.msk.f32.gmra.mxu3 %vm4152_vm10, %v31_v48 }
 0x1b2   :  { %v267_v50 = vpop.f32.mrf.mxu2  ;;  %v290_v51 = vpop.f32.mrf.mxu3 }
 0x1b3   :  { %v2975_v52 = vadd.f32 %v267_v50, %v2972_v49  ;;  %v2978_v53 = vadd.f32 %v290_v51, %v2972_v49 }
 0x1b5   :  { %v296_v56 = vadd.f32 %v2978_v53, %v2975_v52  ;;  %v302_v59 = vmul.f32 %v2975_v52, %v2975_v52  ;;  %v303_v60 = vmul.f32 %v2978_v53, %v2978_v53 }
 0x1b7   :  { %297 = vadd.xlane.f32.xlu2 %v296_v56  ;;  %v306_v5 = vadd.f32 %v303_v60, %v302_v59 }
 0x1ba   :  { %v270_v61 = vpop.f32.mrf.mxu2  ;;  %v293_v62 = vpop.f32.mrf.mxu3 }
 0x1bb   :  { %v2989_v63 = vadd.f32 %v270_v61, %v2982_v58  ;;  %v2992_v4 = vadd.f32 %v293_v62, %v2982_v58 }
 0x1bd   :  { %v299_v6 = vadd.f32 %v2992_v4, %v2989_v63  ;;  %v304_v9 = vmul.f32 %v2989_v63, %v2989_v63  ;;  %v305_v10 = vmul.f32 %v2992_v4, %v2992_v4 }
 0x1bf   :  { %307 = vadd.xlane.f32.xlu2 %v306_v5  ;;  %300 = vadd.xlane.f32.xlu0 %v299_v6  ;;  %v309_v11 = vadd.f32 %v305_v10, %v304_v9 }
 0x1c1   :  { %310 = vadd.xlane.f32.xlu1 %v309_v11 }
 0x22a   :  { %v298_v12 = vpop.xlane.xlu2 %297 }
 0x232   :  { %v308_v17 = vpop.xlane.xlu2 %307  ;;  %v301_v18 = vpop.xlane.xlu0 %300 }
 0x233   :  { %v313_v23 = vsel %vm4155_vm11, %v298_v12, %v308_v17 }
 0x234   :  { %v311_v19 = vpop.xlane.xlu1 %310 }
 0x235   :  { %v314_v21 = vsel %vm4155_vm11, %v301_v18, %v311_v19 }
 0x236   :  { %336 = vmatpush.msrb.mxu0 %v314_v21 }
 0x238   :  { %337 = vmatpush.msrb.mxu0 %v313_v23 }
 0x239   :  { %2436 = vmatmul.msk.f32.vlgmr.msrb.gmra.mxu0 %vm4156_vm12, %v33_v22 }
 0x241   :  { %2437 = vmatmul.msk.f32.gmra.mxu0 %vm4156_vm12, %v34_v24 }
 0x2b6   :  { %v339_v26 = vpop.f32.mrf.mxu0 }
 0x2b7   :  { %v345_v31 = vmul.f32 %v339_v26, %v339_v26 }
 0x2b9   :  { %349 = vrot.lane.b32.xlu1 %v345_v31, %s2725_s30 }
 0x2be   :  { %v342_v34 = vpop.f32.mrf.mxu0 }
 0x2bf   :  { %v346_v37 = vmul.f32 %v342_v34, %v342_v34  ;;  %386 = vperm.xlu2 %2526, %v342_v34  }
 0x2c1   :  { %351 = vrot.lane.b32.xlu0 %v346_v37, %s2725_s30  ;;  %408 = vperm.xlu1 %2529, %v2776_v2  }
 0x2c7   :  { %2528 = vset.pattern.permute.xlu2 %v2731_v38 }
 0x2c8   :  { %412 = vperm.xlu2 %2528, %v2896_v57  }
 0x2c9   :  { %381 = vperm.xlu0 %2523, %v339_v26   ;;  %2531 = vset.pattern.permute.xlu1 %v4159_v1 }
 0x2d0   :  { %2530 = vset.pattern.permute.xlu2 %v2732_v40 }
 0x2d1   :  { %2527 = vset.pattern.permute.xlu0 %v4159_v1  ;;  %424 = vperm.xlu2 %2530, %v2896_v57  }
 0x319   :  { %v387_v19 = vpop.permute.xlu2 %386 }
 0x322   :  { %v3024_v38 = vpop.permute.xlu2 %412 }
 0x32b   :  { %v350_v39 = vpop.permute.xlu1 %349 }
 0x32c   :  { %v355_v41 = vsub.f32 %v339_v26, %v350_v39 }
 0x32e   :  { %v357_v42 = vadd.f32 1e-05, %v355_v41 }
 0x330   :  { %2563 = vrsqrt.f32 %v357_v42  ;;  %vm365_vm14 = vweird.f32 %v357_v42 }
 0x333   :  { %v352_v43 = vpop.permute.xlu0 %351  ;;  %v3018_v17 = vpop.permute.xlu1 %408 }
 0x334   :  { %v356_v46 = vsub.f32 %v342_v34, %v352_v43 }
 0x336   :  { %v2564_v47 = vpop.eup %2563  ;;  %v358_v48 = vadd.f32 1e-05, %v356_v46 }
 0x337   :  { %v360_v50 = vmul.f32 %v2564_v47, %v357_v42  ;;  %vm366_vm13 = vweird.f32 %v2564_v47  ;;  %v392_v42 = vsub.f32 %v2992_v4, %v387_v19 }
 0x338   :  { %2565 = vrsqrt.f32 %v358_v48  ;;  %vm367_vm15 = vmor %vm365_vm14, %vm366_vm13  ;;  %vm375_vm1 = vweird.f32 %v358_v48 }
 0x339   :  { %v361_v51 = vmul.f32 %v2564_v47, %v360_v50 }
 0x33b   :  { %v362_v56 = vmul.f32 0.5, %v361_v51  ;;  %v382_v18 = vpop.permute.xlu0 %381 }
 0x33c   :  { %v389_v23 = vsub.f32 %v2975_v52, %v382_v18  ;;  %v390_v24 = vsub.f32 %v2978_v53, %v382_v18 }
 0x33d   :  { %v363_v59 = vsub.f32 1.5, %v362_v56 }
 0x33e   :  { %v2566_v60 = vpop.eup %2565 }
 0x33f   :  { %v370_v61 = vmul.f32 %v2566_v60, %v358_v48  ;;  %v364_v62 = vmul.f32 %v2564_v47, %v363_v59  ;;  %vm376_vm10 = vweird.f32 %v2566_v60  ;;  %v391_v48 = vsub.f32 %v2989_v63, %v387_v19 }
 0x340   :  { %vm377_vm0 = vmor %vm375_vm1, %vm376_vm10 }
 0x341   :  { %v371_v5 = vmul.f32 %v2566_v60, %v370_v61  ;;  %v368_v6 = vsel %vm367_vm15, %v2564_v47, %v364_v62  ;;  %v3032_v47 = vpop.permute.xlu2 %424 }
 0x342   :  { %395 = vperm.xlu0 %2527, %v368_v6   ;;  %4192 = vst [vmem:[#allocation2_spill] sm:$0xff] %v3032_v47 }
 0x343   :  { %v372_v9 = vmul.f32 0.5, %v371_v5 }
 0x345   :  { %v373_v10 = vsub.f32 1.5, %v372_v9 }
 0x347   :  { %v374_v11 = vmul.f32 %v2566_v60, %v373_v10 }
 0x349   :  { %v378_v12 = vsel %vm377_vm0, %v2566_v60, %v374_v11 }
 0x34a   :  { %400 = vperm.xlu1 %2531, %v378_v12  }
 0x352   :  { %2532 = vset.pattern.permute.xlu1 %v2732_v40 }
 0x353   :  { %420 = vperm.xlu1 %2532, %v2776_v2  }
 0x3b4   :  { %v396_v22 = vpop.permute.xlu0 %395 }
 0x3b5   :  { %v403_v26 = vmul.f32 %v396_v22, %v389_v23  ;;  %v404_v31 = vmul.f32 %v396_v22, %v390_v24 }
 0x3b7   :  { %v415_v34 = vmul.f32 %v3018_v17, %v403_v26  ;;  %v416_v37 = vmul.f32 %v3018_v17, %v404_v31 }
 0x3bc   :  { %v401_v21 = vpop.permute.xlu1 %400 }
 0x3bd   :  { %v406_v46 = vmul.f32 %v401_v21, %v392_v42  ;;  %v405_v56 = vmul.f32 %v401_v21, %v391_v48 }
 0x3bf   :  { %v418_v53 = vmul.f32 %v3024_v38, %v406_v46  ;;  %v417_v4 = vmul.f32 %v3024_v38, %v405_v56 }
 0x3c1   :  { %v3036_v59 = vadd.f32 %v3032_v47, %v418_v53  ;;  %v3041_v6 = vadd.f32 %v3032_v47, %v417_v4 }
 0x3c3   :  { %v2441_v62 = vmul.f32 -1.442695, %v3036_v59  ;;  %v2440_v12 = vmul.f32 -1.442695, %v3041_v6 }
 0x3c5   :  { %v3026_v39 = vpop.permute.xlu1 %420 }
 0x3c6   :  { %v427_v40 = vadd.f32 %v3026_v39, %v415_v34  ;;  %v428_v41 = vadd.f32 %v3026_v39, %v416_v37 }
 0x3c8   :  { %v2438_v43 = vmul.f32 -1.442695, %v427_v40  ;;  %v2439_v52 = vmul.f32 -1.442695, %v428_v41 }
 0x3ca   :  { %2567 = vpow2.f32 %v2438_v43 }
 0x3cb   :  { %2569 = vpow2.f32 %v2439_v52 }
 0x3d0   :  { %v2568_v50 = vpop.eup %2567 }
 0x3d1   :  { %v2570_v51 = vpop.eup %2569  ;;  %v443_v60 = vadd.f32 1.0, %v2568_v50 }
 0x3d2   :  { %v444_v61 = vadd.f32 1.0, %v2570_v51 }
 0x3d3   :  { %2571 = vrcp.f32 %v443_v60  ;;  %v458_v18 = vand.u32 2147483648, %v443_v60  ;;  %v456_v22 = vand.u32 2147483647, %v443_v60  ;;  %vm452_vm10 = vweird.f32 %v443_v60 }
 0x3d4   :  { %2573 = vrcp.f32 %v444_v61  ;;  %v473_v23 = vand.u32 2147483648, %v444_v61  ;;  %v471_v31 = vand.u32 2147483647, %v444_v61  ;;  %vm467_vm14 = vweird.f32 %v444_v61 }
 0x3d5   :  { %2575 = vpow2.f32 %v2441_v62  ;;  %v459_v37 = vor.u32 1.1754944e-38, %v458_v18  ;;  %vm457_vm15 = vcmp.eq.f32.partialorder %v456_v22, 8.507059e+37 }
 0x3d6   :  { %2577 = vpow2.f32 %v2440_v12  ;;  %v474_v46 = vor.u32 1.1754944e-38, %v473_v23  ;;  %vm472_vm12 = vcmp.eq.f32.partialorder %v471_v31, 8.507059e+37 }
 0x3d9   :  { %v2572_v5 = vpop.eup %2571 }
 0x3da   :  { %v2574_v63 = vpop.eup %2573  ;;  %v448_v9 = vmul.f32 %v2572_v5, %v443_v60  ;;  %vm453_vm0 = vweird.f32 %v2572_v5 }
 0x3db   :  { %v463_v10 = vmul.f32 %v2574_v63, %v444_v61  ;;  %v2576_v24 = vpop.eup %2575  ;;  %vm468_vm1 = vweird.f32 %v2574_v63  ;;  %vm454_vm13 = vmor %vm452_vm10, %vm453_vm0 }
 0x3dc   :  { %v449_v11 = vsub.f32 1.0, %v448_v9  ;;  %v446_v43 = vadd.f32 1.0, %v2576_v24  ;;  %vm469_vm11 = vmor %vm467_vm14, %vm468_vm1  ;;  %v2578_v60 = vpop.eup %2577 }
 0x3dd   :  { %v464_v19 = vsub.f32 1.0, %v463_v10  ;;  %v445_v61 = vadd.f32 1.0, %v2578_v60 }
 0x3de   :  { %v450_v21 = vmul.f32 %v2572_v5, %v449_v11  ;;  %2579 = vrcp.f32 %v446_v43  ;;  %v503_v11 = vand.u32 2147483648, %v446_v43  ;;  %v501_v12 = vand.u32 2147483647, %v446_v43 }
 0x3df   :  { %v465_v26 = vmul.f32 %v2574_v63, %v464_v19  ;;  %2581 = vrcp.f32 %v445_v61  ;;  %v488_v24 = vand.u32 2147483648, %v445_v61 }
 0x3e0   :  { %v451_v34 = vadd.f32 %v2572_v5, %v450_v21  ;;  %v504_v21 = vor.u32 1.1754944e-38, %v503_v11  ;;  %vm502_vm1 = vcmp.eq.f32.partialorder %v501_v12, 8.507059e+37 }
 0x3e1   :  { %v466_v42 = vadd.f32 %v2574_v63, %v465_v26  ;;  %v486_v26 = vand.u32 2147483647, %v445_v61 }
 0x3e2   :  { %v455_v52 = vsel %vm454_vm13, %v2572_v5, %v451_v34  ;;  %vm482_vm13 = vweird.f32 %v445_v61 }
 0x3e3   :  { %v460_v53 = vsel %vm457_vm15, %v459_v37, %v455_v52  ;;  %v470_v48 = vsel %vm469_vm11, %v2574_v63, %v466_v42  ;;  %v489_v37 = vor.u32 1.1754944e-38, %v488_v24  ;;  %vm487_vm15 = vcmp.eq.f32.partialorder %v486_v26, 8.507059e+37 }
 0x3e4   :  { %v475_v50 = vsel %vm472_vm12, %v474_v46, %v470_v48  ;;  %v3044_v51 = vmul.f32 %v460_v53, %v427_v40  ;;  %v2580_v4 = vpop.eup %2579  ;;  %vm497_vm12 = vweird.f32 %v446_v43 }
 0x3e5   :  { %v3046_v56 = vmul.f32 %v475_v50, %v428_v41  ;;  %v493_v40 = vmul.f32 %v2580_v4, %v446_v43  ;;  %v2582_v62 = vpop.eup %2581  ;;  %vm498_vm11 = vweird.f32 %v2580_v4 }
 0x3e6   :  { %607 = vrot.lane.b32.xlu1 %v3044_v51, %s2723_s28  ;;  %v478_v5 = vmul.f32 %v2582_v62, %v445_v61  ;;  %vm499_vm0 = vmor %vm497_vm12, %vm498_vm11  ;;  %vm483_vm10 = vweird.f32 %v2582_v62  ;;  %vm4193_vm11 = vcmask 130048  }
 0x3e7   :  { %595 = vrot.lane.b32.xlu2 %v3046_v56, %s2727_s7  ;;  %611 = vrot.lane.b32.xlu0 %v3046_v56, %s2723_s28  ;;  %v494_v41 = vsub.f32 1.0, %v493_v40  ;;  %vm484_vm14 = vmor %vm482_vm13, %vm483_vm10  ;;  %vm4199_vm10 = vcmask 7168  }
 0x3e8   :  { %v479_v9 = vsub.f32 1.0, %v478_v5  ;;  %vm4194_vm12 = vmmov %vm4193_vm11 }
 0x3e9   :  { %v495_v63 = vmul.f32 %v2580_v4, %v494_v41  ;;  %vm4200_vm13 = vmmov %vm4199_vm10 }
 0x3ea   :  { %v480_v18 = vmul.f32 %v2582_v62, %v479_v9 }
 0x3eb   :  { %v496_v10 = vadd.f32 %v2580_v4, %v495_v63 }
 0x3ec   :  { %v481_v23 = vadd.f32 %v2582_v62, %v480_v18 }
 0x3ed   :  { %v500_v19 = vsel %vm499_vm0, %v2580_v4, %v496_v10  ;;  %vm4195_vm0 = vmmov %vm4193_vm11 }
 0x3ee   :  { %579 = vrot.lane.b32.xlu1 %v3046_v56, %s2722_s27  ;;  %v505_v22 = vsel %vm502_vm1, %v504_v21, %v500_v19  ;;  %v485_v34 = vsel %vm484_vm14, %v2582_v62, %v481_v23  ;;  %vm4196_vm1 = vmmov %vm4195_vm0 }
 0x3ef   :  { %575 = vrot.lane.b32.xlu2 %v3044_v51, %s2722_s27  ;;  %591 = vrot.lane.b32.xlu0 %v3044_v51, %s2727_s7  ;;  %v3073_v31 = vmul.f32 %v505_v22, %v3036_v59  ;;  %v490_v42 = vsel %vm487_vm15, %v489_v37, %v485_v34  ;;  %vm4201_vm14 = vmmov %vm4195_vm0 }
 0x3f0   :  { %v3082_v43 = vmul.f32 %v490_v42, %v3041_v6  ;;  %vm4202_vm15 = vmmov %vm4195_vm0 }
 0x3f6   :  { %559 = vrot.lane.b32.xlu1 %v3044_v51, %s2725_s30 }
 0x3f7   :  { %547 = vrot.lane.b32.xlu2 %v3046_v56, %s2729_s9  ;;  %563 = vrot.lane.b32.xlu0 %v3046_v56, %s2725_s30 }
 0x3fe   :  { %531 = vrot.lane.b32.xlu1 %v3046_v56, %s2726_s6 }
 0x3ff   :  { %527 = vrot.lane.b32.xlu2 %v3044_v51, %s2726_s6  ;;  %543 = vrot.lane.b32.xlu0 %v3044_v51, %s2729_s9 }
 0x406   :  { %511 = vrot.lane.b32.xlu1 %v3044_v51, %s2728_s8 }
 0x407   :  { %613 = vrot.lane.b32.xlu2 %v3073_v31, %s2723_s28  ;;  %515 = vrot.lane.b32.xlu0 %v3046_v56, %s2728_s8 }
 0x40e   :  { %597 = vrot.lane.b32.xlu1 %v3073_v31, %s2727_s7 }
 0x40f   :  { %593 = vrot.lane.b32.xlu2 %v3082_v43, %s2727_s7  ;;  %609 = vrot.lane.b32.xlu0 %v3082_v43, %s2723_s28 }
 0x416   :  { %577 = vrot.lane.b32.xlu1 %v3082_v43, %s2722_s27 }
 0x417   :  { %565 = vrot.lane.b32.xlu2 %v3073_v31, %s2725_s30  ;;  %581 = vrot.lane.b32.xlu0 %v3073_v31, %s2722_s27 }
 0x41e   :  { %549 = vrot.lane.b32.xlu1 %v3073_v31, %s2729_s9 }
 0x41f   :  { %545 = vrot.lane.b32.xlu2 %v3082_v43, %s2729_s9  ;;  %561 = vrot.lane.b32.xlu0 %v3082_v43, %s2725_s30 }
 0x426   :  { %529 = vrot.lane.b32.xlu1 %v3082_v43, %s2726_s6 }
 0x427   :  { %517 = vrot.lane.b32.xlu2 %v3073_v31, %s2728_s8  ;;  %533 = vrot.lane.b32.xlu0 %v3073_v31, %s2726_s6 }
 0x42e   :  { %629 = vrot.lane.b32.xlu1 %v3073_v31, %s2724_s29 }
 0x42f   :  { %625 = vrot.lane.b32.xlu2 %v3082_v43, %s2724_s29  ;;  %513 = vrot.lane.b32.xlu0 %v3082_v43, %s2728_s8 }
 0x437   :  { %627 = vrot.lane.b32.xlu2 %v3046_v56, %s2724_s29  ;;  %623 = vrot.lane.b32.xlu0 %v3044_v51, %s2724_s29 }
 0x441   :  { %v596_v59 = vpop.permute.xlu2 %595 }
 0x449   :  { %v576_v6 = vpop.permute.xlu2 %575 }
 0x451   :  { %v3118_v46 = vpop.permute.xlu2 %547 }
 0x458   :  { %v608_v52 = vpop.permute.xlu1 %607 }
 0x459   :  { %v612_v53 = vpop.permute.xlu0 %611  ;;  %v3120_v60 = vpop.permute.xlu2 %527 }
 0x45a   :  { %v615_v21 = vsel %vm210_vm3, %v608_v52, %v612_v53  ;;  %v617_v22 = vsel %vm210_vm3, %v612_v53, %v608_v52 }
 0x45b   :  { %v619_v37 = vmul.f32 %v615_v21, %v2852_v32  ;;  %v620_v42 = vmul.f32 %v617_v22, %v2854_v33 }
 0x460   :  { %v580_v48 = vpop.permute.xlu1 %579 }
 0x461   :  { %v592_v50 = vpop.permute.xlu0 %591  ;;  %v614_v40 = vpop.permute.xlu2 %613  ;;  %v585_v22 = vsel %vm4185_vm5, %v580_v48, %v576_v6 }
 0x462   :  { %v601_v52 = vsel %vm196_vm4, %v596_v59, %v592_v50 }
 0x468   :  { %v560_v61 = vpop.permute.xlu1 %559 }
 0x469   :  { %v564_v4 = vpop.permute.xlu0 %563  ;;  %v594_v5 = vpop.permute.xlu2 %593 }
 0x470   :  { %v3122_v41 = vpop.permute.xlu1 %531 }
 0x471   :  { %v3124_v62 = vpop.permute.xlu0 %543  ;;  %v566_v11 = vpop.permute.xlu2 %565 }
 0x478   :  { %v3126_v63 = vpop.permute.xlu1 %511 }
 0x479   :  { %v3128_v9 = vpop.permute.xlu0 %515 }
 0x480   :  { %v598_v10 = vpop.permute.xlu1 %597 }
 0x481   :  { %v610_v12 = vpop.permute.xlu0 %609  ;;  %v600_v26 = vsel %vm196_vm4, %v594_v5, %v598_v10  ;;  %v602_v34 = vsel %vm196_vm4, %v598_v10, %v594_v5 }
 0x482   :  { %v616_v18 = vsel %vm210_vm3, %v610_v12, %v614_v40  ;;  %v618_v19 = vsel %vm210_vm3, %v614_v40, %v610_v12  ;;  %v599_v40 = vsel %vm196_vm4, %v592_v50, %v596_v59  ;;  %v605_v53 = vmul.f32 %v600_v26, %v2872_v44 }
 0x483   :  { %v621_v23 = vmul.f32 %v616_v18, %v2852_v32  ;;  %v622_v24 = vmul.f32 %v618_v19, %v2854_v33  ;;  %v606_v12 = vmul.f32 %v602_v34, %v2874_v45  ;;  %v603_v10 = vmul.f32 %v599_v40, %v2872_v44 }
 0x484   :  { %v604_v19 = vmul.f32 %v601_v52, %v2874_v45  ;;  %v583_v50 = vsel %vm4185_vm5, %v576_v6, %v580_v48  ;;  %v569_v52 = vsel %vm4184_vm6, %v564_v4, %v560_v61 }
 0x485   :  { %653 = vmatpush.msrb.mxu1 %v621_v23  ;;  %699 = vmatpush.msrb.mxu2 %v622_v24  ;;  %v546_v23 = vpop.permute.xlu2 %545  ;;  %v587_v34 = vmul.f32 %v583_v50, %v2886_v54 }
 0x487   :  { %654 = vmatpush.msrb.mxu1 %v619_v37  ;;  %700 = vmatpush.msrb.mxu2 %v620_v42  ;;  %v588_v37 = vmul.f32 %v585_v22, %v2888_v55  ;;  %v537_v22 = vsel %vm4164_vm8, %v3122_v41, %v3120_v60 }
 0x488   :  { %v578_v18 = vpop.permute.xlu1 %577 }
 0x489   :  { %v582_v5 = vpop.permute.xlu0 %581  ;;  %655 = vmatpush.msrb.mxu1 %v605_v53  ;;  %701 = vmatpush.msrb.mxu2 %v606_v12  ;;  %v567_v53 = vsel %vm4184_vm6, %v560_v61, %v564_v4 }
 0x48a   :  { %v584_v21 = vsel %vm4185_vm5, %v578_v18, %v582_v5  ;;  %v586_v59 = vsel %vm4185_vm5, %v582_v5, %v578_v18  ;;  %v571_v5 = vmul.f32 %v569_v52, %v2906_v0  ;;  %v572_v61 = vmul.f32 %v567_v53, %v2908_v3 }
 0x48b   :  { %656 = vmatpush.msrb.mxu1 %v603_v10  ;;  %702 = vmatpush.msrb.mxu2 %v604_v19  ;;  %v589_v24 = vmul.f32 %v584_v21, %v2886_v54  ;;  %v590_v26 = vmul.f32 %v586_v59, %v2888_v55  ;;  %v2733_v21 = vmov 5   ;;  %v535_v59 = vsel %vm4164_vm8, %v3120_v60, %v3122_v41 }
 0x48c   :  { %2534 = vset.pattern.permute.xlu0 %v2733_v21  ;;  %2533 = vset.pattern.permute.xlu1 %v2733_v21  ;;  %v539_v60 = vmul.f32 %v537_v22, %v2941_v27  ;;  %v540_v41 = vmul.f32 %v535_v59, %v2943_v30  ;;  %v36_v21 = vld [vmem:[%s4148_s4 + $0x58] sm:$0xff]  ;;  %v37_v59 = vld [vmem:[%s4148_s4 + $0x60] sm:$0xff] }
 0x48d   :  { %657 = vmatpush.msrb.mxu1 %v589_v24  ;;  %703 = vmatpush.msrb.mxu2 %v590_v26  ;;  %v518_v18 = vpop.permute.xlu2 %517 }
 0x48e   :  { %640 = vperm.xlu0 %2534, %v2776_v2   ;;  %644 = vperm.xlu1 %2533, %v2896_v57   ;;  %v519_v2 = vsel %vm4163_vm9, %v3126_v63, %v3128_v9 }
 0x48f   :  { %658 = vmatpush.msrb.mxu1 %v587_v34  ;;  %704 = vmatpush.msrb.mxu2 %v588_v37 }
 0x490   :  { %v550_v42 = vpop.permute.xlu1 %549 }
 0x491   :  { %v562_v40 = vpop.permute.xlu0 %561  ;;  %659 = vmatpush.msrb.mxu1 %v3082_v43  ;;  %705 = vmatpush.msrb.mxu2 %v3073_v31  ;;  %v552_v12 = vsel %vm4183_vm7, %v546_v23, %v550_v42 }
 0x492   :  { %v568_v6 = vsel %vm4184_vm6, %v562_v40, %v566_v11  ;;  %v570_v48 = vsel %vm4184_vm6, %v566_v11, %v562_v40  ;;  %v554_v11 = vsel %vm4183_vm7, %v550_v42, %v546_v23  ;;  %v558_v10 = vmul.f32 %v552_v12, %v2925_v15 }
 0x493   :  { %660 = vmatpush.msrb.mxu1 %v3044_v51  ;;  %706 = vmatpush.msrb.mxu2 %v3046_v56  ;;  %v573_v43 = vmul.f32 %v570_v48, %v2906_v0  ;;  %v574_v31 = vmul.f32 %v568_v6, %v2908_v3  ;;  %v551_v51 = vsel %vm4183_vm7, %v3124_v62, %v3118_v46 }
 0x494   :  { %v553_v56 = vsel %vm4183_vm7, %v3118_v46, %v3124_v62  ;;  %v557_v4 = vmul.f32 %v554_v11, %v2923_v14  ;;  %v556_v62 = vmul.f32 %v551_v51, %v2925_v15  ;;  %v521_v40 = vsel %vm4163_vm9, %v3128_v9, %v3126_v63 }
 0x495   :  { %661 = vmatpush.msrb.mxu1 %v573_v43  ;;  %707 = vmatpush.msrb.mxu2 %v574_v31  ;;  %v555_v46 = vmul.f32 %v553_v56, %v2923_v14  ;;  %v626_v37 = vpop.permute.xlu2 %625  ;;  %v523_v11 = vmul.f32 %v521_v40, %v2946_v35 }
 0x496   :  { %2535 = vset.pattern.permute.xlu0 %v4157_v7  ;;  %2536 = vset.pattern.permute.xlu1 %v4157_v7 }
 0x497   :  { %662 = vmatpush.msrb.mxu1 %v571_v5  ;;  %708 = vmatpush.msrb.mxu2 %v572_v61  ;;  %v35_v5 = vld [vmem:[%s4148_s4 + $0x50] sm:$0xff] }
 0x498   :  { %v530_v19 = vpop.permute.xlu1 %529 }
 0x499   :  { %v534_v50 = vpop.permute.xlu0 %533  ;;  %663 = vmatpush.msrb.mxu1 %v557_v4  ;;  %709 = vmatpush.msrb.mxu2 %v558_v10 }
 0x49a   :  { %v536_v23 = vsel %vm4164_vm8, %v530_v19, %v534_v50  ;;  %v538_v24 = vsel %vm4164_vm8, %v534_v50, %v530_v19  ;;  %v38_v50 = vld [vmem:[%s4148_s4 + $0x68] sm:$0xff] }
 0x49b   :  { %664 = vmatpush.msrb.mxu1 %v555_v46  ;;  %710 = vmatpush.msrb.mxu2 %v556_v62  ;;  %v541_v26 = vmul.f32 %v538_v24, %v2941_v27  ;;  %v542_v34 = vmul.f32 %v536_v23, %v2943_v30 }
 0x49d   :  { %665 = vmatpush.msrb.mxu1 %v541_v26  ;;  %711 = vmatpush.msrb.mxu2 %v542_v34  ;;  %v628_v61 = vpop.permute.xlu2 %627 }
 0x49f   :  { %666 = vmatpush.msrb.mxu1 %v539_v60  ;;  %712 = vmatpush.msrb.mxu2 %v540_v41 }
 0x4a0   :  { %v630_v42 = vpop.permute.xlu1 %629 }
 0x4a1   :  { %v514_v6 = vpop.permute.xlu0 %513  ;;  %v632_v48 = vsel %vm224_vm2, %v626_v37, %v630_v42  ;;  %v634_v52 = vsel %vm224_vm2, %v630_v42, %v626_v37 }
 0x4a2   :  { %v520_v53 = vsel %vm4163_vm9, %v514_v6, %v518_v18  ;;  %v522_v43 = vsel %vm4163_vm9, %v518_v18, %v514_v6  ;;  %v637_v31 = vmul.f32 %v632_v48, %v2847_v28  ;;  %v638_v12 = vmul.f32 %v634_v52, %v2849_v29 }
 0x4a3   :  { %v525_v63 = vmul.f32 %v522_v43, %v2946_v35  ;;  %v526_v9 = vmul.f32 %v520_v53, %v2948_v36  ;;  %v524_v18 = vmul.f32 %v519_v2, %v2948_v36 }
 0x4a4   :  { %690 = vmatpush.msra.mxu0 %v637_v31  ;;  %736 = vmatpush.msrb.mxu3 %v638_v12 }
 0x4a5   :  { %667 = vmatpush.msrb.mxu1 %v525_v63  ;;  %713 = vmatpush.msrb.mxu2 %v526_v9 }
 0x4a7   :  { %668 = vmatpush.msrb.mxu1 %v523_v11  ;;  %714 = vmatpush.msrb.mxu2 %v524_v18 }
 0x4a8   :  { %715 = vmatmul.f32.vlgmr.msrb.gmra.mxu2 %v35_v5  ;;  %669 = vmatmul.f32.vlgmr.msrb.gmra.mxu1 %v35_v5 }
 0x4a9   :  { %v624_v51 = vpop.permute.xlu0 %623 }
 0x4aa   :  { %v631_v56 = vsel %vm224_vm2, %v624_v51, %v628_v61  ;;  %v633_v4 = vsel %vm224_vm2, %v628_v61, %v624_v51 }
 0x4ab   :  { %v635_v10 = vmul.f32 %v631_v56, %v2847_v28  ;;  %v636_v19 = vmul.f32 %v633_v4, %v2849_v29 }
 0x4ad   :  { %691 = vmatpush.msra.mxu0 %v635_v10  ;;  %737 = vmatpush.msrb.mxu3 %v636_v19 }
 0x4ae   :  { %2444 = vmatmul.msk.f32.vlgmr.msrb.gmra.mxu3 %vm4193_vm11, %v36_v21  ;;  %2442 = vmatmul.msk.f32.vlgmr.msra.gmra.mxu0 %vm4194_vm12, %v36_v21  ;;  %v39_v21 = vld [vmem:[%s4148_s4 + $0x70] sm:$0xff] }
 0x4b0   :  { %718 = vmatmul.f32.gmra.mxu2 %v37_v59  ;;  %672 = vmatmul.f32.gmra.mxu1 %v37_v59 }
 0x4b6   :  { %2445 = vmatmul.msk.f32.gmra.mxu3 %vm4195_vm0, %v38_v50  ;;  %2443 = vmatmul.msk.f32.gmra.mxu0 %vm4196_vm1, %v38_v50  ;;  %v40_v50 = vld [vmem:[%s4148_s4 + $0x80] sm:$0xff] }
 0x500   :  { %v3262_v62 = vpop.permute.xlu0 %640  ;;  %v3266_v60 = vpop.permute.xlu1 %644 }
 0x501   :  { %4197 = vst [vmem:[#allocation3_spill] sm:$0xff] %v3262_v62 }
 0x502   :  { %4198 = vst [vmem:[#allocation4_spill] sm:$0xff] %v3266_v60 }
 0x525   :  { %v670_v46 = vpop.f32.mrf.mxu1 }
 0x526   :  { %v671_v24 = vadd.f32 %v670_v46, %v3262_v62 }
 0x52b   :  { %v716_v22 = vpop.f32.mrf.mxu2  ;;  %v693_v23 = vpop.f32.mrf.mxu0 }
 0x52c   :  { %v717_v26 = vadd.f32 %v716_v22, %v3262_v62  ;;  %v3268_v41 = vadd.f32 %v693_v23, %v671_v24 }
 0x52d   :  { %v673_v34 = vpop.f32.mrf.mxu1 }
 0x52e   :  { %v674_v2 = vadd.f32 %v673_v34, %v3266_v60  ;;  %v751_v18 = vmul.f32 %v3268_v41, %v3268_v41  ;;  %v2734_v34 = vmov 6  }
 0x52f   :  { %2537 = vset.pattern.permute.xlu2 %v2734_v34 }
 0x531   :  { %v739_v37 = vpop.f32.mrf.mxu3 }
 0x532   :  { %v3270_v42 = vadd.f32 %v739_v37, %v717_v26  ;;  %v964_v26 = vadd.f32 %v2810_v20, %v2800_v16  ;;  %v3307_v37 = vld [vmem:[%s4147_s3] sm:$0xff] }
 0x533   :  { %v719_v40 = vpop.f32.mrf.mxu2  ;;  %v696_v6 = vpop.f32.mrf.mxu0 }
 0x534   :  { %v745_v48 = vadd.f32 %v3270_v42, %v3268_v41  ;;  %v3275_v52 = vadd.f32 %v696_v6, %v674_v2  ;;  %v720_v53 = vadd.f32 %v719_v40, %v3266_v60  ;;  %v752_v5 = vmul.f32 %v3270_v42, %v3270_v42 }
 0x536   :  { %746 = vadd.xlane.f32.xlu0 %v745_v48  ;;  %v753_v12 = vmul.f32 %v3275_v52, %v3275_v52  ;;  %v755_v61 = vadd.f32 %v752_v5, %v751_v18 }
 0x539   :  { %v742_v43 = vpop.f32.mrf.mxu3 }
 0x53a   :  { %v3278_v31 = vadd.f32 %v742_v43, %v720_v53 }
 0x53c   :  { %v748_v63 = vadd.f32 %v3278_v31, %v3275_v52  ;;  %v754_v9 = vmul.f32 %v3278_v31, %v3278_v31 }
 0x53e   :  { %749 = vadd.xlane.f32.xlu2 %v748_v63  ;;  %v758_v11 = vadd.f32 %v754_v9, %v753_v12 }
 0x540   :  { %759 = vadd.xlane.f32.xlu1 %v758_v11 }
 0x546   :  { %756 = vadd.xlane.f32.xlu2 %v755_v61 }
 0x5a9   :  { %v747_v10 = vpop.xlane.xlu0 %746 }
 0x5b1   :  { %v750_v51 = vpop.xlane.xlu2 %749 }
 0x5b3   :  { %v760_v56 = vpop.xlane.xlu1 %759 }
 0x5b4   :  { %v762_v4 = vsel %vm4199_vm10, %v750_v51, %v760_v56 }
 0x5b5   :  { %783 = vmatpush.msrb.mxu0 %v762_v4 }
 0x5b9   :  { %v757_v19 = vpop.xlane.xlu2 %756 }
 0x5ba   :  { %v761_v59 = vsel %vm4200_vm13, %v747_v10, %v757_v19 }
 0x5bb   :  { %784 = vmatpush.msrb.mxu0 %v761_v59 }
 0x5bc   :  { %2446 = vmatmul.msk.f32.vlgmr.msrb.gmra.mxu0 %vm4201_vm14, %v39_v21 }
 0x5c4   :  { %2447 = vmatmul.msk.f32.gmra.mxu0 %vm4202_vm15, %v40_v50  ;;  %v3318_v50 = vld [vmem:[%s4147_s3 + $0x8] sm:$0xff] }
 0x639   :  { %v786_v46 = vpop.f32.mrf.mxu0 }
 0x63a   :  { %v792_v22 = vmul.f32 %v786_v46, %v786_v46 }
 0x63c   :  { %796 = vrot.lane.b32.xlu2 %v792_v22, %s2725_s30  ;;  %v972_v22 = vmul.f32 %v2810_v20, %v2810_v20 }
 0x641   :  { %v789_v23 = vpop.f32.mrf.mxu0 }
 0x642   :  { %v793_v24 = vmul.f32 %v789_v23, %v789_v23  ;;  %833 = vperm.xlu0 %2535, %v789_v23  }
 0x644   :  { %798 = vrot.lane.b32.xlu1 %v793_v24, %s2725_s30  ;;  %859 = vperm.xlu2 %2537, %v2896_v57   ;;  %v2735_v57 = vmov 7  }
 0x64c   :  { %828 = vperm.xlu1 %2536, %v786_v46   ;;  %2540 = vset.pattern.permute.xlu2 %v4159_v1 }
 0x654   :  { %2538 = vset.pattern.permute.xlu1 %v2734_v34 }
 0x655   :  { %855 = vperm.xlu1 %2538, %v3307_v37  }
 0x65d   :  { %2539 = vset.pattern.permute.xlu1 %v4159_v1 }
 0x66c   :  { %965 = vadd.xlane.f32.xlu0 %v964_v26 }
 0x696   :  { %v797_v2 = vpop.permute.xlu2 %796 }
 0x697   :  { %v802_v40 = vsub.f32 %v786_v46, %v797_v2  ;;  %v971_v46 = vmul.f32 %v2800_v16, %v2800_v16 }
 0x699   :  { %v804_v6 = vadd.f32 1e-05, %v802_v40 }
 0x69b   :  { %2583 = vrsqrt.f32 %v804_v6  ;;  %vm812_vm12 = vweird.f32 %v804_v6 }
 0x69e   :  { %v3328_v34 = vpop.permute.xlu2 %859 }
 0x69f   :  { %4204 = vst [vmem:[#allocation6_spill] sm:$0xff] %v3328_v34 }
 0x6a1   :  { %v2584_v48 = vpop.eup %2583 }
 0x6a2   :  { %v807_v53 = vmul.f32 %v2584_v48, %v804_v6  ;;  %vm813_vm11 = vweird.f32 %v2584_v48 }
 0x6a3   :  { %vm814_vm0 = vmor %vm812_vm12, %vm813_vm11 }
 0x6a4   :  { %v808_v43 = vmul.f32 %v2584_v48, %v807_v53 }
 0x6a6   :  { %v809_v12 = vmul.f32 0.5, %v808_v43 }
 0x6a8   :  { %v810_v63 = vsub.f32 1.5, %v809_v12 }
 0x6aa   :  { %v811_v9 = vmul.f32 %v2584_v48, %v810_v63 }
 0x6ac   :  { %v815_v11 = vsel %vm814_vm0, %v2584_v48, %v811_v9 }
 0x6ad   :  { %842 = vperm.xlu1 %2539, %v815_v11  }
 0x6b4   :  { %v834_v43 = vpop.permute.xlu0 %833 }
 0x6b5   :  { %2542 = vset.pattern.permute.xlu1 %v2735_v57 }
 0x6b6   :  { %867 = vperm.xlu1 %2542, %v3307_v37   ;;  %v799_v18 = vpop.permute.xlu1 %798 }
 0x6b7   :  { %v803_v5 = vsub.f32 %v789_v23, %v799_v18  ;;  %v979_v23 = vadd.f32 %v972_v22, %v971_v46  ;;  %v839_v18 = vsub.f32 %v3278_v31, %v834_v43 }
 0x6b9   :  { %v805_v61 = vadd.f32 1e-05, %v803_v5 }
 0x6bb   :  { %2585 = vrsqrt.f32 %v805_v61  ;;  %vm822_vm10 = vweird.f32 %v805_v61 }
 0x6be   :  { %2544 = vset.pattern.permute.xlu1 %v4157_v7  ;;  %v829_v24 = vpop.permute.xlu1 %828 }
 0x6bf   :  { %v836_v40 = vsub.f32 %v3268_v41, %v829_v24  ;;  %v837_v6 = vsub.f32 %v3270_v42, %v829_v24 }
 0x6c1   :  { %v2586_v51 = vpop.eup %2585 }
 0x6c2   :  { %v817_v56 = vmul.f32 %v2586_v51, %v805_v61  ;;  %vm823_vm1 = vweird.f32 %v2586_v51 }
 0x6c3   :  { %vm824_vm13 = vmor %vm822_vm10, %vm823_vm1 }
 0x6c4   :  { %v818_v4 = vmul.f32 %v2586_v51, %v817_v56 }
 0x6c6   :  { %v819_v10 = vmul.f32 0.5, %v818_v4 }
 0x6c7   :  { %v3326_v26 = vpop.permute.xlu1 %855 }
 0x6c8   :  { %v820_v19 = vsub.f32 1.5, %v819_v10  ;;  %4203 = vst [vmem:[#allocation5_spill] sm:$0xff] %v3326_v26 }
 0x6ca   :  { %v821_v21 = vmul.f32 %v2586_v51, %v820_v19 }
 0x6cc   :  { %v825_v59 = vsel %vm824_vm13, %v2586_v51, %v821_v21 }
 0x6cd   :  { %847 = vperm.xlu2 %2540, %v825_v59  }
 0x6d5   :  { %2541 = vset.pattern.permute.xlu2 %v2735_v57  ;;  %v838_v57 = vsub.f32 %v3275_v52, %v834_v43 }
 0x6d6   :  { %871 = vperm.xlu2 %2541, %v3318_v50  }
 0x6de   :  { %2543 = vset.pattern.permute.xlu2 %v4157_v7 }
 0x6ff   :  { %980 = vadd.xlane.f32.xlu2 %v979_v23 }
 0x71f   :  { %v843_v2 = vpop.permute.xlu1 %842 }
 0x720   :  { %v850_v48 = vmul.f32 %v843_v2, %v836_v40  ;;  %v851_v53 = vmul.f32 %v843_v2, %v837_v6 }
 0x722   :  { %v862_v12 = vmul.f32 %v3326_v26, %v850_v48  ;;  %v863_v63 = vmul.f32 %v3326_v26, %v851_v53 }
 0x727   :  { %v848_v9 = vpop.permute.xlu2 %847 }
 0x728   :  { %v3334_v11 = vpop.permute.xlu1 %867  ;;  %v852_v61 = vmul.f32 %v848_v9, %v838_v57  ;;  %v853_v42 = vmul.f32 %v848_v9, %v839_v18 }
 0x729   :  { %4205 = vst [vmem:[#allocation7_spill] sm:$0xff] %v3334_v11  ;;  %v874_v5 = vadd.f32 %v3334_v11, %v862_v12  ;;  %v875_v41 = vadd.f32 %v3334_v11, %v863_v63 }
 0x72a   :  { %v864_v4 = vmul.f32 %v3328_v34, %v852_v61  ;;  %v865_v10 = vmul.f32 %v3328_v34, %v853_v42 }
 0x72b   :  { %v2448_v51 = vmul.f32 -1.442695, %v874_v5  ;;  %v2449_v56 = vmul.f32 -1.442695, %v875_v41 }
 0x72d   :  { %2587 = vpow2.f32 %v2448_v51 }
 0x72e   :  { %2589 = vpow2.f32 %v2449_v56 }
 0x730   :  { %v3342_v19 = vpop.permute.xlu2 %871 }
 0x731   :  { %4206 = vst [vmem:[#allocation8_spill] sm:$0xff] %v3342_v19  ;;  %v3345_v52 = vadd.f32 %v3342_v19, %v864_v4  ;;  %v3348_v31 = vadd.f32 %v3342_v19, %v865_v10 }
 0x733   :  { %v2588_v21 = vpop.eup %2587  ;;  %v2450_v59 = vmul.f32 -1.442695, %v3345_v52  ;;  %v2451_v23 = vmul.f32 -1.442695, %v3348_v31 }
 0x734   :  { %v2590_v46 = vpop.eup %2589  ;;  %v890_v22 = vadd.f32 1.0, %v2588_v21 }
 0x735   :  { %v891_v24 = vadd.f32 1.0, %v2590_v46  ;;  %2591 = vpow2.f32 %v2450_v59 }
 0x736   :  { %2593 = vrcp.f32 %v890_v22  ;;  %v903_v57 = vand.u32 2147483647, %v890_v22  ;;  %v905_v18 = vand.u32 2147483648, %v890_v22  ;;  %vm899_vm11 = vweird.f32 %v890_v22 }
 0x737   :  { %2595 = vrcp.f32 %v891_v24  ;;  %v920_v51 = vand.u32 2147483648, %v891_v24  ;;  %v918_v4 = vand.u32 2147483647, %v891_v24  ;;  %vm914_vm0 = vweird.f32 %v891_v24 }
 0x738   :  { %2597 = vpow2.f32 %v2451_v23  ;;  %v906_v59 = vor.u32 1.1754944e-38, %v905_v18  ;;  %vm904_vm1 = vcmp.eq.f32.partialorder %v903_v57, 8.507059e+37 }
 0x739   :  { %vm919_vm13 = vcmp.eq.f32.partialorder %v918_v4, 8.507059e+37 }
 0x73b   :  { %v2592_v2 = vpop.eup %2591 }
 0x73c   :  { %v2594_v40 = vpop.eup %2593  ;;  %v892_v6 = vadd.f32 1.0, %v2592_v2  ;;  %v921_v2 = vor.u32 1.1754944e-38, %v920_v51 }
 0x73d   :  { %v2596_v48 = vpop.eup %2595  ;;  %v895_v53 = vmul.f32 %v2594_v40, %v890_v22  ;;  %vm900_vm14 = vweird.f32 %v2594_v40 }
 0x73e   :  { %v2598_v43 = vpop.eup %2597  ;;  %2599 = vrcp.f32 %v892_v6  ;;  %v910_v12 = vmul.f32 %v2596_v48, %v891_v24  ;;  %vm915_vm15 = vweird.f32 %v2596_v48  ;;  %vm901_vm12 = vmor %vm899_vm11, %vm900_vm14  ;;  %v935_v22 = vand.u32 2147483648, %v892_v6 }
 0x73f   :  { %v893_v63 = vadd.f32 1.0, %v2598_v43  ;;  %v896_v9 = vsub.f32 1.0, %v895_v53  ;;  %vm916_vm10 = vmor %vm914_vm0, %vm915_vm15  ;;  %v933_v24 = vand.u32 2147483647, %v892_v6  ;;  %vm929_vm15 = vweird.f32 %v892_v6 }
 0x740   :  { %v911_v61 = vsub.f32 1.0, %v910_v12 }
 0x741   :  { %2601 = vrcp.f32 %v893_v63  ;;  %v897_v42 = vmul.f32 %v2594_v40, %v896_v9  ;;  %v948_v4 = vand.u32 2147483647, %v893_v63  ;;  %vm934_vm0 = vcmp.eq.f32.partialorder %v933_v24, 8.507059e+37 }
 0x742   :  { %v912_v56 = vmul.f32 %v2596_v48, %v911_v61 }
 0x743   :  { %v898_v10 = vadd.f32 %v2594_v40, %v897_v42 }
 0x744   :  { %v2600_v21 = vpop.eup %2599  ;;  %v913_v46 = vadd.f32 %v2596_v48, %v912_v56  ;;  %v936_v56 = vor.u32 1.1754944e-38, %v935_v22 }
 0x745   :  { %v902_v23 = vsel %vm901_vm12, %v2594_v40, %v898_v10  ;;  %v925_v53 = vmul.f32 %v2600_v21, %v892_v6  ;;  %vm930_vm14 = vweird.f32 %v2600_v21 }
 0x746   :  { %v907_v43 = vsel %vm904_vm1, %v906_v59, %v902_v23  ;;  %v917_v12 = vsel %vm916_vm10, %v2596_v48, %v913_v46  ;;  %v950_v48 = vand.u32 2147483648, %v893_v63  ;;  %vm931_vm11 = vmor %vm929_vm15, %vm930_vm14  ;;  %vm944_vm1 = vweird.f32 %v893_v63 }
 0x747   :  { %v2602_v9 = vpop.eup %2601  ;;  %v922_v7 = vsel %vm919_vm13, %v921_v2, %v917_v12  ;;  %v3352_v61 = vmul.f32 %v907_v43, %v874_v5  ;;  %v926_v1 = vsub.f32 1.0, %v925_v53  ;;  %vm949_vm13 = vcmp.eq.f32.partialorder %v948_v4, 8.507059e+37  ;;  %v966_v43 = vpop.xlane.xlu0 %965 }
 0x748   :  { %v3354_v42 = vmul.f32 %v922_v7, %v875_v41  ;;  %v940_v19 = vmul.f32 %v2602_v9, %v893_v63  ;;  %vm945_vm12 = vweird.f32 %v2602_v9  ;;  %vm4207_vm14 = vcmask 7168  }
 0x749   :  { %v927_v18 = vmul.f32 %v2600_v21, %v926_v1  ;;  %vm946_vm10 = vmor %vm944_vm1, %vm945_vm12  ;;  %v951_v1 = vor.u32 1.1754944e-38, %v950_v48 }
 0x74a   :  { %v958_v40 = vadd.f32 %v3354_v42, %v3352_v61  ;;  %v941_v57 = vsub.f32 1.0, %v940_v19  ;;  %v968_v53 = vmul.f32 %v3354_v42, %v3354_v42  ;;  %vm4208_vm15 = vmmov %vm4207_vm14 }
 0x74b   :  { %v928_v51 = vadd.f32 %v2600_v21, %v927_v18  ;;  %vm4209_vm12 = vmmov %vm4207_vm14 }
 0x74c   :  { %959 = vadd.xlane.f32.xlu2 %v958_v40  ;;  %v942_v5 = vmul.f32 %v2602_v9, %v941_v57 }
 0x74d   :  { %v932_v7 = vsel %vm931_vm11, %v2600_v21, %v928_v51  ;;  %v41_v51 = vld [vmem:[%s4148_s4 + $0x90] sm:$0xff]  ;;  %vm985_vm11 = vcmask 195584  }
 0x74e   :  { %v937_v41 = vsel %vm934_vm0, %v936_v56, %v932_v7  ;;  %v943_v10 = vadd.f32 %v2602_v9, %v942_v5  ;;  %v42_v56 = vld [vmem:[%s4148_s4 + $0xa0] sm:$0xff]  ;;  %v43_v5 = vld [vmem:[%s4148_s4 + $0xb0] sm:$0xff] }
 0x74f   :  { %v3359_v59 = vmul.f32 %v937_v41, %v3345_v52  ;;  %v967_v52 = vmul.f32 %v3352_v61, %v3352_v61 }
 0x750   :  { %v947_v19 = vsel %vm946_vm10, %v2602_v9, %v943_v10 }
 0x751   :  { %v952_v6 = vsel %vm949_vm13, %v951_v1, %v947_v19  ;;  %v969_v23 = vmul.f32 %v3359_v59, %v3359_v59 }
 0x752   :  { %v3362_v46 = vmul.f32 %v952_v6, %v3348_v31  ;;  %v973_v31 = vadd.f32 %v968_v53, %v967_v52  ;;  %v4210_v6 = vmov 1  }
 0x754   :  { %v961_v21 = vadd.f32 %v3362_v46, %v3359_v59  ;;  %v970_v63 = vmul.f32 %v3362_v46, %v3362_v46 }
 0x756   :  { %962 = vadd.xlane.f32.xlu1 %v961_v21  ;;  %v976_v2 = vadd.f32 %v970_v63, %v969_v23  ;;  %v2736_v63 = vmov 8  }
 0x758   :  { %977 = vadd.xlane.f32.xlu0 %v976_v2  ;;  %v44_v2 = vld [vmem:[%s4147_s3 + $0x10] sm:$0xff] }
 0x75e   :  { %974 = vadd.xlane.f32.xlu1 %v973_v31 }
 0x772   :  { %v981_v12 = vpop.xlane.xlu2 %980 }
 0x773   :  { %v984_v9 = vsel %vm4207_vm14, %v966_v43, %v981_v12  ;;  %v2737_v43 = vmov 9  }
 0x774   :  { %1008 = vmatpush.msra.mxu1 %v984_v9 }
 0x7bf   :  { %v960_v40 = vpop.xlane.xlu2 %959 }
 0x7c9   :  { %v963_v22 = vpop.xlane.xlu1 %962 }
 0x7cb   :  { %v978_v18 = vpop.xlane.xlu0 %977 }
 0x7cc   :  { %v983_v24 = vsel %vm4208_vm15, %v963_v22, %v978_v18 }
 0x7cd   :  { %1009 = vmatpush.msra.mxu1 %v983_v24 }
 0x7d1   :  { %v975_v57 = vpop.xlane.xlu1 %974 }
 0x7d2   :  { %v982_v48 = vsel %vm4209_vm12, %v960_v40, %v975_v57 }
 0x7d3   :  { %1010 = vmatpush.msra.mxu1 %v982_v48 }
 0x7d4   :  { %2452 = vmatmul.msk.f32.vlgmr.msra.gmra.mxu1 %vm985_vm11, %v41_v51 }
 0x7dc   :  { %2453 = vmatmul.msk.f32.gmra.mxu1 %vm985_vm11, %v42_v56 }
 0x7e4   :  { %2454 = vmatmul.msk.f32.gmra.mxu1 %vm985_vm11, %v43_v5 }
 0x851   :  { %v1012_v4 = vpop.f32.mrf.mxu1 }
 0x852   :  { %v1021_v7 = vmul.f32 %v1012_v4, %v1012_v4 }
 0x854   :  { %1027 = vrot.lane.b32.xlu1 %v1021_v7, %s2725_s30 }
 0x859   :  { %v1015_v41 = vpop.f32.mrf.mxu1 }
 0x85a   :  { %v1022_v10 = vmul.f32 %v1015_v41, %v1015_v41 }
 0x85c   :  { %1074 = vperm.xlu1 %2544, %v1012_v4   ;;  %1029 = vrot.lane.b32.xlu2 %v1022_v10, %s2725_s30 }
 0x861   :  { %v1018_v1 = vpop.f32.mrf.mxu1 }
 0x862   :  { %v1023_v19 = vmul.f32 %v1018_v1, %v1018_v1 }
 0x864   :  { %1079 = vperm.xlu2 %2543, %v1015_v41   ;;  %1031 = vrot.lane.b32.xlu0 %v1023_v19, %s2725_s30 }
 0x865   :  { %2545 = vset.pattern.permute.xlu1 %v2736_v63 }
 0x866   :  { %1124 = vperm.xlu1 %2545, %v44_v2  }
 0x86c   :  { %1084 = vperm.xlu0 %2535, %v1018_v1   ;;  %2546 = vset.pattern.permute.xlu2 %v4210_v6 }
 0x86e   :  { %2549 = vset.pattern.permute.xlu1 %v2737_v43 }
 0x86f   :  { %1142 = vperm.xlu1 %2549, %v44_v2  }
 0x874   :  { %2547 = vset.pattern.permute.xlu0 %v4210_v6 }
 0x877   :  { %1138 = vperm.xlu1 %2549, %v3318_v50  }
 0x8b6   :  { %v1030_v23 = vpop.permute.xlu2 %1029 }
 0x8b7   :  { %v1037_v21 = vsub.f32 %v1015_v41, %v1030_v23  ;;  %v4211_v41 = vmov 0  }
 0x8b8   :  { %2552 = vset.pattern.permute.xlu1 %v4211_v41 }
 0x8b9   :  { %v1040_v52 = vadd.f32 1e-05, %v1037_v21 }
 0x8bb   :  { %2603 = vrsqrt.f32 %v1040_v52  ;;  %vm1058_vm14 = vweird.f32 %v1040_v52 }
 0x8c1   :  { %v2604_v9 = vpop.eup %2603 }
 0x8c2   :  { %v1053_v22 = vmul.f32 %v2604_v9, %v1040_v52  ;;  %vm1059_vm13 = vweird.f32 %v2604_v9  ;;  %v1080_v52 = vpop.permute.xlu2 %1079 }
 0x8c3   :  { %vm1060_vm15 = vmor %vm1058_vm14, %vm1059_vm13 }
 0x8c4   :  { %v1054_v40 = vmul.f32 %v2604_v9, %v1053_v22 }
 0x8c6   :  { %v1028_v53 = vpop.permute.xlu1 %1027  ;;  %v1055_v5 = vmul.f32 0.5, %v1054_v40 }
 0x8c7   :  { %v1036_v31 = vsub.f32 %v1012_v4, %v1028_v53 }
 0x8c8   :  { %v1056_v23 = vsub.f32 1.5, %v1055_v5 }
 0x8c9   :  { %v1039_v12 = vadd.f32 1e-05, %v1036_v31 }
 0x8ca   :  { %v1057_v21 = vmul.f32 %v2604_v9, %v1056_v23 }
 0x8cb   :  { %2605 = vrsqrt.f32 %v1039_v12  ;;  %vm1048_vm1 = vweird.f32 %v1039_v12 }
 0x8cc   :  { %v1061_v31 = vsel %vm1060_vm15, %v2604_v9, %v1057_v21 }
 0x8d1   :  { %v2606_v18 = vpop.eup %2605 }
 0x8d2   :  { %v1043_v24 = vmul.f32 %v2606_v18, %v1039_v12  ;;  %vm1049_vm0 = vweird.f32 %v2606_v18 }
 0x8d3   :  { %vm1050_vm10 = vmor %vm1048_vm1, %vm1049_vm0 }
 0x8d4   :  { %v1044_v57 = vmul.f32 %v2606_v18, %v1043_v24 }
 0x8d6   :  { %v1045_v51 = vmul.f32 0.5, %v1044_v57  ;;  %v1032_v48 = vpop.permute.xlu0 %1031 }
 0x8d7   :  { %v1038_v56 = vsub.f32 %v1018_v1, %v1032_v48 }
 0x8d8   :  { %v1046_v7 = vsub.f32 1.5, %v1045_v51  ;;  %v1075_v51 = vpop.permute.xlu1 %1074 }
 0x8d9   :  { %v1041_v4 = vadd.f32 1e-05, %v1038_v56  ;;  %v1087_v48 = vsub.f32 %v3352_v61, %v1075_v51  ;;  %v1088_v56 = vsub.f32 %v3354_v42, %v1075_v51 }
 0x8da   :  { %v1047_v10 = vmul.f32 %v2606_v18, %v1046_v7 }
 0x8db   :  { %2607 = vrsqrt.f32 %v1041_v4  ;;  %vm1068_vm9 = vweird.f32 %v1041_v4 }
 0x8dc   :  { %v1051_v19 = vsel %vm1050_vm10, %v2606_v18, %v1047_v10 }
 0x8dd   :  { %1095 = vperm.xlu2 %2546, %v1051_v19  }
 0x8de   :  { %v1085_v42 = vpop.permute.xlu0 %1084 }
 0x8df   :  { %v1091_v23 = vsub.f32 %v2800_v16, %v1085_v42  ;;  %v1092_v21 = vsub.f32 %v2810_v20, %v1085_v42  ;;  %v1089_v20 = vsub.f32 %v3359_v59, %v1080_v52 }
 0x8e0   :  { %v3420_v19 = vpop.permute.xlu1 %1124 }
 0x8e1   :  { %v2608_v2 = vpop.eup %2607  ;;  %4214 = vst [vmem:[#allocation11_spill] sm:$0xff] %v3420_v19 }
 0x8e2   :  { %v1063_v53 = vmul.f32 %v2608_v2, %v1041_v4  ;;  %vm1069_vm12 = vweird.f32 %v2608_v2 }
 0x8e3   :  { %vm1070_vm8 = vmor %vm1068_vm9, %vm1069_vm12 }
 0x8e4   :  { %v1064_v1 = vmul.f32 %v2608_v2, %v1063_v53 }
 0x8e5   :  { %1100 = vperm.xlu2 %2546, %v1061_v31  }
 0x8e6   :  { %v1065_v22 = vmul.f32 0.5, %v1064_v1 }
 0x8e8   :  { %v1066_v24 = vsub.f32 1.5, %v1065_v22  ;;  %v3424_v31 = vpop.permute.xlu1 %1142 }
 0x8e9   :  { %4215 = vst [vmem:[#allocation12_spill] sm:$0xff] %v3424_v31 }
 0x8ea   :  { %v1067_v40 = vmul.f32 %v2608_v2, %v1066_v24 }
 0x8ec   :  { %v1071_v12 = vsel %vm1070_vm8, %v2608_v2, %v1067_v40 }
 0x8ed   :  { %2550 = vset.pattern.permute.xlu2 %v2736_v63  ;;  %1105 = vperm.xlu0 %2547, %v1071_v12  }
 0x8ee   :  { %1115 = vperm.xlu2 %2550, %v3307_v37  }
 0x8f0   :  { %v3448_v42 = vpop.permute.xlu1 %1138 }
 0x8f1   :  { %4217 = vst [vmem:[#allocation14_spill] sm:$0xff] %v3448_v42 }
 0x8f5   :  { %2548 = vset.pattern.permute.xlu0 %v2736_v63 }
 0x8f6   :  { %2551 = vset.pattern.permute.xlu2 %v2737_v43  ;;  %1119 = vperm.xlu0 %2548, %v3318_v50  }
 0x8f7   :  { %1134 = vperm.xlu2 %2551, %v3307_v37  }
 0x8fe   :  { %2553 = vset.pattern.permute.xlu0 %v4211_v41 }
 0x8ff   :  { %2554 = vset.pattern.permute.xlu2 %v4210_v6 }
 0x937   :  { %v1096_v9 = vpop.permute.xlu2 %1095 }
 0x938   :  { %v1108_v63 = vmul.f32 %v1096_v9, %v1087_v48  ;;  %v1109_v43 = vmul.f32 %v1096_v9, %v1088_v56  ;;  %v1090_v56 = vsub.f32 %v3362_v46, %v1080_v52 }
 0x93f   :  { %v1101_v18 = vpop.permute.xlu2 %1100 }
 0x948   :  { %v3404_v57 = vpop.permute.xlu2 %1115 }
 0x949   :  { %4212 = vst [vmem:[#allocation9_spill] sm:$0xff] %v3404_v57  ;;  %v1127_v50 = vmul.f32 %v3404_v57, %v1108_v63  ;;  %v1128_v37 = vmul.f32 %v3404_v57, %v1109_v43 }
 0x951   :  { %v3410_v5 = vpop.permute.xlu2 %1134 }
 0x952   :  { %4213 = vst [vmem:[#allocation10_spill] sm:$0xff] %v3410_v5  ;;  %v3413_v7 = vadd.f32 %v3410_v5, %v1127_v50  ;;  %v3416_v4 = vadd.f32 %v3410_v5, %v1128_v37  ;;  %v1110_v50 = vmul.f32 %v1101_v18, %v1089_v20  ;;  %v1111_v37 = vmul.f32 %v1101_v18, %v1090_v56 }
 0x954   :  { %v2455_v10 = vmul.f32 -1.442695, %v3413_v7  ;;  %v2456_v61 = vmul.f32 -1.442695, %v3416_v4 }
 0x956   :  { %2609 = vpow2.f32 %v2455_v10 }
 0x957   :  { %2611 = vpow2.f32 %v2456_v61 }
 0x95c   :  { %v2610_v2 = vpop.eup %2609 }
 0x95d   :  { %v2612_v1 = vpop.eup %2611  ;;  %v3426_v40 = vadd.f32 1.0, %v2610_v2 }
 0x95e   :  { %v3430_v51 = vadd.f32 1.0, %v2612_v1 }
 0x95f   :  { %v1106_v53 = vpop.permute.xlu0 %1105  ;;  %2613 = vrcp.f32 %v3426_v40  ;;  %vm1180_vm8 = vweird.f32 %v3426_v40 }
 0x960   :  { %v1112_v22 = vmul.f32 %v1106_v53, %v1091_v23  ;;  %v1113_v24 = vmul.f32 %v1106_v53, %v1092_v21  ;;  %2615 = vrcp.f32 %v3430_v51  ;;  %vm1195_vm0 = vweird.f32 %v3430_v51 }
 0x962   :  { %v1131_v12 = vmul.f32 %v3420_v19, %v1112_v22  ;;  %v1132_v9 = vmul.f32 %v3420_v19, %v1113_v24 }
 0x964   :  { %v3433_v48 = vadd.f32 %v3424_v31, %v1131_v12  ;;  %v3436_v16 = vadd.f32 %v3424_v31, %v1132_v9 }
 0x965   :  { %v3456_v23 = vpop.eup %2613 }
 0x966   :  { %v2459_v63 = vmul.f32 -1.442695, %v3433_v48  ;;  %v2460_v43 = vmul.f32 -1.442695, %v3436_v16  ;;  %v3458_v18 = vpop.eup %2615  ;;  %v1176_v12 = vmul.f32 %v3456_v23, %v3426_v40  ;;  %vm1181_vm10 = vweird.f32 %v3456_v23 }
 0x967   :  { %v1191_v9 = vmul.f32 %v3458_v18, %v3430_v51  ;;  %vm1196_vm13 = vweird.f32 %v3458_v18 }
 0x968   :  { %2617 = vpow2.f32 %v2459_v63  ;;  %v3444_v10 = vpop.permute.xlu0 %1119 }
 0x969   :  { %4216 = vst [vmem:[#allocation13_spill] sm:$0xff] %v3444_v10  ;;  %2619 = vpow2.f32 %v2460_v43  ;;  %v1129_v61 = vmul.f32 %v3444_v10, %v1110_v50  ;;  %v1130_v59 = vmul.f32 %v3444_v10, %v1111_v37  ;;  %v1177_v43 = vsub.f32 1.0, %v1176_v12 }
 0x96a   :  { %v1192_v50 = vsub.f32 1.0, %v1191_v9 }
 0x96b   :  { %v3451_v46 = vadd.f32 %v3448_v42, %v1129_v61  ;;  %v3454_v52 = vadd.f32 %v3448_v42, %v1130_v59 }
 0x96c   :  { %v1193_v12 = vmul.f32 %v3458_v18, %v1192_v50 }
 0x96d   :  { %v2457_v21 = vmul.f32 -1.442695, %v3451_v46  ;;  %v2458_v2 = vmul.f32 -1.442695, %v3454_v52 }
 0x96e   :  { %v2618_v53 = vpop.eup %2617 }
 0x96f   :  { %v2620_v1 = vpop.eup %2619  ;;  %v1173_v22 = vadd.f32 1.0, %v2618_v53  ;;  %2621 = vpow2.f32 %v2457_v21  ;;  %v1184_v53 = vand.u32 2147483647, %v3426_v40 }
 0x970   :  { %v1174_v24 = vadd.f32 1.0, %v2620_v1  ;;  %2623 = vpow2.f32 %v2458_v2  ;;  %v1186_v1 = vand.u32 2147483648, %v3426_v40 }
 0x971   :  { %2625 = vrcp.f32 %v1173_v22  ;;  %v1244_v9 = vand.u32 2147483647, %v1173_v22  ;;  %vm1240_vm14 = vweird.f32 %v1173_v22 }
 0x972   :  { %2627 = vrcp.f32 %v1174_v24  ;;  %v1259_v42 = vand.u32 2147483647, %v1174_v24  ;;  %v1261_v10 = vand.u32 2147483648, %v1174_v24  ;;  %vm1255_vm12 = vweird.f32 %v1174_v24 }
 0x973   :  { %vm1245_vm7 = vcmp.eq.f32.partialorder %v1244_v9, 8.507059e+37 }
 0x974   :  { %vm1260_vm5 = vcmp.eq.f32.partialorder %v1259_v42, 8.507059e+37  ;;  %v1262_v60 = vor.u32 1.1754944e-38, %v1261_v10  ;;  %v1187_v42 = vor.u32 1.1754944e-38, %v1186_v1 }
 0x975   :  { %v2622_v20 = vpop.eup %2621 }
 0x976   :  { %v2624_v56 = vpop.eup %2623  ;;  %v3466_v63 = vadd.f32 1.0, %v2622_v20  ;;  %v1178_v20 = vmul.f32 %v3456_v23, %v1177_v43 }
 0x977   :  { %v2626_v37 = vpop.eup %2625  ;;  %v3468_v61 = vadd.f32 1.0, %v2624_v56  ;;  %v1246_v56 = vand.u32 2147483648, %v1173_v22 }
 0x978   :  { %v2628_v59 = vpop.eup %2627  ;;  %v1236_v21 = vmul.f32 %v2626_v37, %v1173_v22  ;;  %2629 = vrcp.f32 %v3466_v63  ;;  %vm1241_vm9 = vweird.f32 %v2626_v37  ;;  %v1179_v50 = vadd.f32 %v3456_v23, %v1178_v20 }
 0x979   :  { %v1251_v2 = vmul.f32 %v2628_v59, %v1174_v24  ;;  %2631 = vrcp.f32 %v3468_v61  ;;  %vm1256_vm1 = vweird.f32 %v2628_v59  ;;  %vm1242_vm15 = vmor %vm1240_vm14, %vm1241_vm9  ;;  %v1216_v24 = vand.u32 2147483648, %v3466_v63 }
 0x97a   :  { %v1237_v5 = vsub.f32 1.0, %v1236_v21  ;;  %vm1257_vm6 = vmor %vm1255_vm12, %vm1256_vm1  ;;  %v1229_v40 = vand.u32 2147483647, %v3468_v61 }
 0x97b   :  { %v1252_v57 = vsub.f32 1.0, %v1251_v2  ;;  %v1194_v2 = vadd.f32 %v3458_v18, %v1193_v12  ;;  %v1217_v10 = vor.u32 1.1754944e-38, %v1216_v24 }
 0x97c   :  { %v1238_v19 = vmul.f32 %v2626_v37, %v1237_v5  ;;  %v1247_v5 = vor.u32 1.1754944e-38, %v1246_v56  ;;  %v1214_v56 = vand.u32 2147483647, %v3466_v63 }
 0x97d   :  { %v1253_v21 = vmul.f32 %v2628_v59, %v1252_v57 }
 0x97e   :  { %v2630_v43 = vpop.eup %2629  ;;  %v1239_v34 = vadd.f32 %v2626_v37, %v1238_v19  ;;  %vm1215_vm14 = vcmp.eq.f32.partialorder %v1214_v56, 8.507059e+37 }
 0x97f   :  { %v1254_v31 = vadd.f32 %v2628_v59, %v1253_v21  ;;  %v1206_v11 = vmul.f32 %v2630_v43, %v3466_v63  ;;  %v2632_v26 = vpop.eup %2631  ;;  %vm1211_vm9 = vweird.f32 %v2630_v43 }
 0x980   :  { %v1243_v57 = vsel %vm1242_vm15, %v2626_v37, %v1239_v34  ;;  %v1221_v20 = vmul.f32 %v2632_v26, %v3468_v61  ;;  %vm1225_vm15 = vweird.f32 %v3468_v61 }
 0x981   :  { %v1248_v62 = vsel %vm1245_vm7, %v1247_v5, %v1243_v57  ;;  %v1258_v19 = vsel %vm1257_vm6, %v2628_v59, %v1254_v31  ;;  %v1207_v22 = vsub.f32 1.0, %v1206_v11  ;;  %vm3494_vm6 = vmor %vm1180_vm8, %vm1181_vm10  ;;  %vm1226_vm7 = vweird.f32 %v2632_v26 }
 0x982   :  { %v1269_v12 = vmul.f32 %v1248_v62, %v3433_v48  ;;  %v1263_v47 = vsel %vm1260_vm5, %v1262_v60, %v1258_v19  ;;  %v1222_v37 = vsub.f32 1.0, %v1221_v20  ;;  %vm1210_vm5 = vweird.f32 %v3466_v63  ;;  %vm3509_vm8 = vmor %vm1195_vm0, %vm1196_vm13 }
 0x983   :  { %v1270_v21 = vmul.f32 %v1263_v47, %v3436_v16  ;;  %v1208_v34 = vmul.f32 %v2630_v43, %v1207_v22  ;;  %v1231_v62 = vand.u32 2147483648, %v3468_v61  ;;  %v1183_v47 = vsel %vm3494_vm6, %v3456_v23, %v1179_v50  ;;  %vm1212_vm1 = vmor %vm1210_vm5, %vm1211_vm9  ;;  %v45_v61 = vld [vmem:[%s4148_s4 + $0xc0] sm:$0x7] }
 0x984   :  { %1292 = vmatpush.msra.mxu3 %v1269_v12  ;;  %v1201_v60 = vand.u32 2147483648, %v3430_v51  ;;  %v1223_v48 = vmul.f32 %v2632_v26, %v1222_v37  ;;  %vm1185_vm10 = vcmp.eq.f32.partialorder %v1184_v53, 8.507059e+37  ;;  %v1198_v23 = vsel %vm3509_vm8, %v3458_v18, %v1194_v2  ;;  %vm1227_vm12 = vmor %vm1225_vm15, %vm1226_vm7  ;;  %v1339_v2 = vld.sshfl [vmem:[#allocation1] sm:$0xff pattern:$0x75316420] }
 0x985   :  { %1312 = vmatpush.msra.mxu0 %v1270_v21  ;;  %v1209_v31 = vadd.f32 %v2630_v43, %v1208_v34  ;;  %v1232_v50 = vor.u32 1.1754944e-38, %v1231_v62  ;;  %v1188_v5 = vsel %vm1185_vm10, %v1187_v42, %v1183_v47  ;;  %vm1230_vm0 = vcmp.eq.f32.partialorder %v1229_v40, 8.507059e+37 }
 0x986   :  { %v1224_v59 = vadd.f32 %v2632_v26, %v1223_v48  ;;  %v1202_v57 = vor.u32 1.1754944e-38, %v1201_v60  ;;  %v4222_v53 = vand.u32 2147483647, %v3430_v51  ;;  %v1340_v51 = vld.sshfl [vmem:[#allocation1 + $0x8] sm:$0xff pattern:$0x75316420] }
 0x987   :  { %v1213_v63 = vsel %vm1212_vm1, %v2630_v43, %v1209_v31  ;;  %v1265_v43 = vmul.f32 %v1188_v5, %v3413_v7  ;;  %vm4223_vm9 = vcmask 1042432   ;;  %v2705_v7 = vld [vmem:[%s4148_s4] sm:$0xff]  ;;  %vm4225_vm5 = vcmask 23552  }
 0x988   :  { %v1218_v9 = vsel %vm1215_vm14, %v1217_v10, %v1213_v63  ;;  %v1228_v22 = vsel %vm1227_vm12, %v2632_v26, %v1224_v59  ;;  %vm1200_vm13 = vcmp.eq.f32.partialorder %v4222_v53, 8.507059e+37  ;;  %vm4224_vm6 = vmmov %vm4223_vm9  ;;  %vm4227_vm8 = vcmp.lt.s32.totalorder %v2838_v25, 127 }
 0x989   :  { %v1267_v19 = vmul.f32 %v1218_v9, %v3451_v46  ;;  %v1233_v1 = vsel %vm1230_vm0, %v1232_v50, %v1228_v22  ;;  %v1203_v20 = vsel %vm1200_vm13, %v1202_v57, %v1198_v23  ;;  %vm4226_vm7 = vmmov %vm4225_vm5  ;;  %vm4229_vm10 = vcmp.lt.s32.totalorder %v2838_v25, 1 }
 0x98a   :  { %v1268_v18 = vmul.f32 %v1233_v1, %v3454_v52  ;;  %v1266_v26 = vmul.f32 %v1203_v20, %v3416_v4  ;;  %v2464_v4 = vld [vmem:[%s4149_s1 + $0x2] sm:$0x3]  ;;  %vm4228_vm1 = vmmov %vm4227_vm8  ;;  %vm4231_vm15 = vcmp.lt.s32.totalorder %v2838_v25, 15  ;;  %vm4233_vm0 = vcmp.lt.s32.totalorder %v2838_v25, 16 }
 0x98b   :  { %1293 = vmatpush.msra.mxu3 %v1267_v19  ;;  %v1332_v52 = vperm.slane %v2464_v4, 1  ;;  %v1331_v37 = vperm.slane %v2464_v4, 0  ;;  %vm4230_vm14 = vmmov %vm4229_vm10 }
 0x98c   :  { %1313 = vmatpush.msra.mxu0 %v1268_v18  ;;  %vm4232_vm12 = vmmov %vm4231_vm15 }
 0x98d   :  { %1294 = vmatpush.msra.mxu3 %v1265_v43  ;;  %v1336_v12 = vmul.f32 %v1332_v52, %v2791_v8  ;;  %v1335_v62 = vmul.f32 %v1331_v37, %v2791_v8  ;;  %vm4234_vm13 = vmmov %vm4233_vm0 }
 0x98e   :  { %2461 = vmatmul.msk.f32.vlgmr.msra.gmra.mxu3 %vm985_vm11, %v45_v61  ;;  %1314 = vmatpush.msra.mxu0 %v1266_v26 }
 0x98f   :  { %2465 = vmatpush.msk.msrb.mxu3 %vm4223_vm9, %v1339_v2  ;;  %2462 = vmatmul.msk.f32.vlgmr.msra.gmra.mxu0 %vm985_vm11, %v45_v61  ;;  %vm4235_vm9 = vcmp.lt.s32.totalorder %v2838_v25, 17 }
 0x990   :  { %2467 = vmatpush.msk.msrb.mxu0 %vm4224_vm6, %v1340_v51  ;;  %vm4236_vm6 = vmmov %vm4235_vm9 }
 0x996   :  { %2466 = vmatmul.msk.f32.vlgmr.msrb.gmra.mxu3 %vm4225_vm5, %v2705_v7  ;;  %vm4237_vm5 = vcmask 588800  }
 0x997   :  { %2468 = vmatmul.msk.f32.vlgmr.msrb.gmra.mxu0 %vm4226_vm7, %v2705_v7  ;;  %vm4238_vm7 = vmmov %vm4237_vm5 }
 0xa0c   :  { %v3535_v46 = vpop.f32.mrf.mxu0 }
 0xa11   :  { %v3541_v21 = vpop.f32.mrf.mxu3 }
 0xa14   :  { %v1382_v56 = vpop.f32.mrf.mxu0 }
 0xa15   :  { %v1383_v24 = vadd.f32 %v1382_v56, %v1336_v12 }
 0xa17   :  { %v3544_v34 = vadd.f32 %v1383_v24, %v2797_v13 }
 0xa19   :  { %1429 = vrot.lane.b32.xlu2 %v3544_v34, %s2727_s7  ;;  %1437 = vrot.lane.b32.xlu0 %v3544_v34, %s2723_s28  ;;  %v1362_v11 = vpop.f32.mrf.mxu3 }
 0xa1a   :  { %1445 = vrot.lane.b32.xlu1 %v3544_v34, %s2724_s29  ;;  %v1363_v47 = vadd.f32 %v1362_v11, %v1335_v62 }
 0xa1c   :  { %v3560_v60 = vadd.f32 %v1363_v47, %v2797_v13 }
 0xa21   :  { %1405 = vrot.lane.b32.xlu2 %v3544_v34, %s2729_s9  ;;  %1413 = vrot.lane.b32.xlu0 %v3544_v34, %s2725_s30 }
 0xa22   :  { %1421 = vrot.lane.b32.xlu1 %v3544_v34, %s2722_s27 }
 0xa29   :  { %1435 = vrot.lane.b32.xlu2 %v3560_v60, %s2723_s28  ;;  %1443 = vrot.lane.b32.xlu0 %v3560_v60, %s2724_s29 }
 0xa2a   :  { %1427 = vrot.lane.b32.xlu1 %v3560_v60, %s2727_s7 }
 0xa31   :  { %1411 = vrot.lane.b32.xlu2 %v3560_v60, %s2725_s30  ;;  %1419 = vrot.lane.b32.xlu0 %v3560_v60, %s2722_s27 }
 0xa32   :  { %1403 = vrot.lane.b32.xlu1 %v3560_v60, %s2729_s9 }
 0xa39   :  { %1387 = vrot.lane.b32.xlu2 %v3560_v60, %s2728_s8  ;;  %1395 = vrot.lane.b32.xlu0 %v3560_v60, %s2726_s6 }
 0xa3a   :  { %1397 = vrot.lane.b32.xlu1 %v3544_v34, %s2726_s6 }
 0xa41   :  { %1389 = vrot.lane.b32.xlu0 %v3544_v34, %s2728_s8 }
 0xa73   :  { %v1430_v8 = vpop.permute.xlu2 %1429 }
 0xa7b   :  { %v1406_v48 = vpop.permute.xlu2 %1405 }
 0xa83   :  { %v1436_v10 = vpop.permute.xlu2 %1435 }
 0xa8b   :  { %v1438_v13 = vpop.permute.xlu0 %1437  ;;  %v1412_v51 = vpop.permute.xlu2 %1411 }
 0xa8c   :  { %v1446_v31 = vpop.permute.xlu1 %1445  ;;  %v1439_v23 = vsel %vm210_vm3, %v1436_v10, %v1438_v13  ;;  %v1440_v63 = vsel %vm210_vm3, %v1438_v13, %v1436_v10 }
 0xa8d   :  { %v1441_v53 = vmul.f32 %v1439_v23, %v2852_v32  ;;  %v1442_v1 = vmul.f32 %v1440_v63, %v2854_v33 }
 0xa93   :  { %v1414_v40 = vpop.permute.xlu0 %1413  ;;  %v1388_v10 = vpop.permute.xlu2 %1387 }
 0xa94   :  { %v1422_v16 = vpop.permute.xlu1 %1421  ;;  %v1415_v52 = vsel %vm4229_vm10, %v1412_v51, %v1414_v40  ;;  %v1416_v12 = vsel %vm4230_vm14, %v1414_v40, %v1412_v51  ;;  %vm4241_vm10 = vcmask 7168  }
 0xa95   :  { %v1417_v37 = vmul.f32 %v1416_v12, %v2906_v0  ;;  %v1418_v11 = vmul.f32 %v1415_v52, %v2908_v3  ;;  %vm4242_vm14 = vmmov %vm4241_vm10 }
 0xa9b   :  { %v1444_v42 = vpop.permute.xlu0 %1443 }
 0xa9c   :  { %v1428_v59 = vpop.permute.xlu1 %1427  ;;  %v1447_v9 = vsel %vm224_vm2, %v1444_v42, %v1446_v31  ;;  %v1448_v50 = vsel %vm224_vm2, %v1446_v31, %v1444_v42 }
 0xa9d   :  { %v1449_v5 = vmul.f32 %v1447_v9, %v2847_v28  ;;  %v1450_v57 = vmul.f32 %v1448_v50, %v2849_v29  ;;  %v1431_v19 = vsel %vm196_vm4, %v1428_v59, %v1430_v8  ;;  %v1432_v22 = vsel %vm196_vm4, %v1430_v8, %v1428_v59  ;;  %v2706_v50 = vld [vmem:[%s4148_s4 + $0x10] sm:$0xff] }
 0xa9e   :  { %v1433_v20 = vmul.f32 %v1431_v19, %v2872_v44  ;;  %v1434_v18 = vmul.f32 %v1432_v22, %v2874_v45 }
 0xa9f   :  { %1458 = vmatpush.msra.mxu2 %v1449_v5  ;;  %1481 = vmatpush.msrb.mxu1 %v1450_v57  ;;  %v2707_v5 = vld [vmem:[%s4148_s4 + $0x20] sm:$0xff] }
 0xaa1   :  { %1459 = vmatpush.msra.mxu2 %v1441_v53  ;;  %1482 = vmatpush.msrb.mxu1 %v1442_v1 }
 0xaa3   :  { %1460 = vmatpush.msra.mxu2 %v1433_v20  ;;  %1483 = vmatpush.msrb.mxu1 %v1434_v18  ;;  %v1420_v43 = vpop.permute.xlu0 %1419 }
 0xaa4   :  { %v1404_v61 = vpop.permute.xlu1 %1403  ;;  %v1423_v2 = vsel %vm4227_vm8, %v1420_v43, %v1422_v16  ;;  %v1424_v26 = vsel %vm4228_vm1, %v1422_v16, %v1420_v43  ;;  %vm4239_vm8 = vmmov %vm4237_vm5 }
 0xaa5   :  { %v1425_v7 = vmul.f32 %v1423_v2, %v2886_v54  ;;  %v1426_v4 = vmul.f32 %v1424_v26, %v2888_v55  ;;  %v1407_v56 = vsel %vm4231_vm15, %v1404_v61, %v1406_v48  ;;  %v1408_v24 = vsel %vm4232_vm12, %v1406_v48, %v1404_v61  ;;  %vm4240_vm1 = vmmov %vm4237_vm5 }
 0xaa6   :  { %v1409_v62 = vmul.f32 %v1408_v24, %v2923_v14  ;;  %v1410_v47 = vmul.f32 %v1407_v56, %v2925_v15  ;;  %vm4243_vm15 = vcmask 130048  }
 0xaa7   :  { %1461 = vmatpush.msra.mxu2 %v1425_v7  ;;  %1484 = vmatpush.msrb.mxu1 %v1426_v4  ;;  %vm4244_vm12 = vmmov %vm4243_vm15 }
 0xaa9   :  { %1462 = vmatpush.msra.mxu2 %v3560_v60  ;;  %1485 = vmatpush.msrb.mxu1 %v3544_v34 }
 0xaab   :  { %1463 = vmatpush.msra.mxu2 %v1417_v37  ;;  %1486 = vmatpush.msrb.mxu1 %v1418_v11  ;;  %v1396_v8 = vpop.permute.xlu0 %1395 }
 0xaac   :  { %v1398_v13 = vpop.permute.xlu1 %1397 }
 0xaad   :  { %v1399_v31 = vsel %vm4233_vm0, %v1396_v8, %v1398_v13  ;;  %v1400_v48 = vsel %vm4234_vm13, %v1398_v13, %v1396_v8  ;;  %1464 = vmatpush.msra.mxu2 %v1409_v62  ;;  %1487 = vmatpush.msrb.mxu1 %v1410_v47  ;;  %v2708_v62 = vld [vmem:[%s4148_s4 + $0x30] sm:$0xff]  ;;  %v2709_v47 = vld [vmem:[%s4148_s4 + $0x40] sm:$0xff] }
 0xaae   :  { %v1401_v40 = vmul.f32 %v1400_v48, %v2941_v27  ;;  %v1402_v16 = vmul.f32 %v1399_v31, %v2943_v30 }
 0xab0   :  { %1465 = vmatpush.msra.mxu2 %v1401_v40  ;;  %1488 = vmatpush.msrb.mxu1 %v1402_v16 }
 0xab3   :  { %v1390_v42 = vpop.permute.xlu0 %1389 }
 0xab4   :  { %v1391_v23 = vsel %vm4235_vm9, %v1388_v10, %v1390_v42  ;;  %v1392_v63 = vsel %vm4236_vm6, %v1390_v42, %v1388_v10 }
 0xab5   :  { %v1393_v59 = vmul.f32 %v1392_v63, %v2946_v35  ;;  %v1394_v9 = vmul.f32 %v1391_v23, %v2948_v36 }
 0xab7   :  { %1466 = vmatpush.msra.mxu2 %v1393_v59  ;;  %1489 = vmatpush.msrb.mxu1 %v1394_v9 }
 0xab8   :  { %2469 = vmatmul.msk.f32.vlgmr.msra.gmra.mxu2 %vm4237_vm5, %v2706_v50  ;;  %2471 = vmatmul.msk.f32.vlgmr.msrb.gmra.mxu1 %vm4238_vm7, %v2706_v50 }
 0xac0   :  { %2470 = vmatmul.msk.f32.gmra.mxu2 %vm4239_vm8, %v2707_v5  ;;  %2472 = vmatmul.msk.f32.gmra.mxu1 %vm4240_vm1, %v2707_v5 }
 0xb35   :  { %v1491_v57 = vpop.f32.mrf.mxu1 }
 0xb36   :  { %v3643_v22 = vadd.f32 %v1491_v57, %v2972_v49 }
 0xb38   :  { %v1504_v4 = vmul.f32 %v3643_v22, %v3643_v22 }
 0xb3b   :  { %v1468_v19 = vpop.f32.mrf.mxu2 }
 0xb3c   :  { %v3646_v53 = vadd.f32 %v1468_v19, %v2972_v49 }
 0xb3d   :  { %v1494_v20 = vpop.f32.mrf.mxu1 }
 0xb3e   :  { %v1497_v1 = vadd.f32 %v3643_v22, %v3646_v53  ;;  %v3651_v18 = vadd.f32 %v1494_v20, %v2982_v58  ;;  %v1503_v7 = vmul.f32 %v3646_v53, %v3646_v53 }
 0xb40   :  { %1498 = vadd.xlane.f32.xlu0 %v1497_v1  ;;  %v1506_v49 = vmul.f32 %v3651_v18, %v3651_v18 }
 0xb43   :  { %v1471_v43 = vpop.f32.mrf.mxu2 }
 0xb44   :  { %v3654_v61 = vadd.f32 %v1471_v43, %v2982_v58  ;;  %v1507_v58 = vadd.f32 %v1504_v4, %v1503_v7 }
 0xb46   :  { %v1500_v2 = vadd.f32 %v3651_v18, %v3654_v61  ;;  %v1505_v26 = vmul.f32 %v3654_v61, %v3654_v61 }
 0xb48   :  { %1501 = vadd.xlane.f32.xlu1 %v1500_v2  ;;  %v1510_v51 = vadd.f32 %v1506_v49, %v1505_v26 }
 0xb4a   :  { %1511 = vadd.xlane.f32.xlu2 %v1510_v51 }
 0xb50   :  { %1508 = vadd.xlane.f32.xlu1 %v1507_v58 }
 0xbb3   :  { %v1499_v24 = vpop.xlane.xlu0 %1498 }
 0xbbb   :  { %v1502_v52 = vpop.xlane.xlu1 %1501 }
 0xbbd   :  { %v1512_v12 = vpop.xlane.xlu2 %1511 }
 0xbbe   :  { %v1514_v56 = vsel %vm4241_vm10, %v1502_v52, %v1512_v12 }
 0xbbf   :  { %1529 = vmatpush.msra.mxu3 %v1514_v56 }
 0xbc3   :  { %v1509_v37 = vpop.xlane.xlu1 %1508 }
 0xbc4   :  { %v1513_v11 = vsel %vm4242_vm14, %v1499_v24, %v1509_v37 }
 0xbc5   :  { %1530 = vmatpush.msra.mxu3 %v1513_v11 }
 0xbc6   :  { %2473 = vmatmul.msk.f32.vlgmr.msra.gmra.mxu3 %vm4243_vm15, %v2708_v62 }
 0xbce   :  { %2474 = vmatmul.msk.f32.gmra.mxu3 %vm4244_vm12, %v2709_v47 }
 0xc49   :  { %v1532_v8 = vpop.f32.mrf.mxu3 }
 0xc4a   :  { %v1538_v13 = vmul.f32 %v1532_v8, %v1532_v8 }
 0xc4c   :  { %1542 = vrot.lane.b32.xlu0 %v1538_v13, %s2725_s30 }
 0xc51   :  { %v1535_v31 = vpop.f32.mrf.mxu3 }
 0xc52   :  { %v1539_v48 = vmul.f32 %v1535_v31, %v1535_v31  ;;  %1579 = vperm.xlu1 %2552, %v1535_v31  }
 0xc54   :  { %1574 = vperm.xlu0 %2553, %v1532_v8   ;;  %1544 = vrot.lane.b32.xlu2 %v1539_v48, %s2725_s30 }
 0xc5a   :  { %2555 = vset.pattern.permute.xlu1 %v4210_v6 }
 0xcae   :  { %v1545_v40 = vpop.permute.xlu2 %1544 }
 0xcaf   :  { %v1549_v16 = vsub.f32 %v1535_v31, %v1545_v40 }
 0xcb1   :  { %v1551_v10 = vadd.f32 1e-05, %v1549_v16 }
 0xcb3   :  { %2633 = vrsqrt.f32 %v1551_v10  ;;  %vm1568_vm13 = vweird.f32 %v1551_v10 }
 0xcb9   :  { %v2634_v42 = vpop.eup %2633 }
 0xcba   :  { %v1563_v23 = vmul.f32 %v2634_v42, %v1551_v10  ;;  %vm1569_vm0 = vweird.f32 %v2634_v42 }
 0xcbb   :  { %vm1570_vm9 = vmor %vm1568_vm13, %vm1569_vm0 }
 0xcbc   :  { %v1564_v63 = vmul.f32 %v2634_v42, %v1563_v23  ;;  %v4245_v23 = vld [vmem:[#allocation2_spill] sm:$0xff] }
 0xcbe   :  { %v1565_v59 = vmul.f32 0.5, %v1564_v63  ;;  %v1543_v9 = vpop.permute.xlu0 %1542 }
 0xcbf   :  { %v1548_v50 = vsub.f32 %v1532_v8, %v1543_v9 }
 0xcc0   :  { %v1566_v5 = vsub.f32 1.5, %v1565_v59 }
 0xcc1   :  { %v1550_v57 = vadd.f32 1e-05, %v1548_v50 }
 0xcc2   :  { %v1567_v19 = vmul.f32 %v2634_v42, %v1566_v5 }
 0xcc3   :  { %2635 = vrsqrt.f32 %v1550_v57  ;;  %vm1558_vm5 = vweird.f32 %v1550_v57 }
 0xcc4   :  { %v1571_v1 = vsel %vm1570_vm9, %v2634_v42, %v1567_v19  ;;  %v1580_v4 = vpop.permute.xlu1 %1579 }
 0xcc5   :  { %1593 = vperm.xlu2 %2554, %v1571_v1   ;;  %v1585_v8 = vsub.f32 %v3651_v18, %v1580_v4  ;;  %v1584_v48 = vsub.f32 %v3654_v61, %v1580_v4 }
 0xcc6   :  { %v1575_v58 = vpop.permute.xlu0 %1574 }
 0xcc7   :  { %v1582_v52 = vsub.f32 %v3646_v53, %v1575_v58  ;;  %v1583_v12 = vsub.f32 %v3643_v22, %v1575_v58 }
 0xcc9   :  { %v2636_v20 = vpop.eup %2635 }
 0xcca   :  { %v1553_v43 = vmul.f32 %v2636_v20, %v1550_v57  ;;  %vm1559_vm6 = vweird.f32 %v2636_v20 }
 0xccb   :  { %vm1560_vm7 = vmor %vm1558_vm5, %vm1559_vm6 }
 0xccc   :  { %v1554_v2 = vmul.f32 %v2636_v20, %v1553_v43 }
 0xcce   :  { %v1555_v26 = vmul.f32 0.5, %v1554_v2 }
 0xcd0   :  { %v1556_v49 = vsub.f32 1.5, %v1555_v26 }
 0xcd2   :  { %v1557_v51 = vmul.f32 %v2636_v20, %v1556_v49 }
 0xcd4   :  { %v1561_v7 = vsel %vm1560_vm7, %v2636_v20, %v1557_v51 }
 0xcd5   :  { %1588 = vperm.xlu1 %2555, %v1561_v7  }
 0xcdd   :  { %2556 = vset.pattern.permute.xlu1 %v4211_v41 }
 0xd1f   :  { %v1594_v47 = vpop.permute.xlu2 %1593 }
 0xd20   :  { %v1599_v40 = vmul.f32 %v1594_v47, %v1585_v8  ;;  %v1598_v22 = vmul.f32 %v1594_v47, %v1584_v48 }
 0xd22   :  { %v1603_v10 = vmul.f32 %v1599_v40, %v3024_v38  ;;  %v1602_v42 = vmul.f32 %v1598_v22, %v3024_v38 }
 0xd24   :  { %v3691_v63 = vadd.f32 %v1603_v10, %v4245_v23  ;;  %v3694_v59 = vadd.f32 %v1602_v42, %v4245_v23 }
 0xd26   :  { %v2478_v9 = vmul.f32 -1.442695, %v3691_v63  ;;  %v2477_v50 = vmul.f32 -1.442695, %v3694_v59 }
 0xd47   :  { %v1589_v56 = vpop.permute.xlu1 %1588 }
 0xd48   :  { %v1596_v24 = vmul.f32 %v1589_v56, %v1582_v52  ;;  %v1597_v37 = vmul.f32 %v1589_v56, %v1583_v12 }
 0xd4a   :  { %v1600_v11 = vmul.f32 %v1596_v24, %v3018_v17  ;;  %v1601_v62 = vmul.f32 %v1597_v37, %v3018_v17 }
 0xd4c   :  { %v1604_v13 = vadd.f32 %v1600_v11, %v3026_v39  ;;  %v1605_v31 = vadd.f32 %v1601_v62, %v3026_v39 }
 0xd4e   :  { %v2475_v53 = vmul.f32 -1.442695, %v1604_v13  ;;  %v2476_v16 = vmul.f32 -1.442695, %v1605_v31 }
 0xd50   :  { %2637 = vpow2.f32 %v2475_v53 }
 0xd51   :  { %2639 = vpow2.f32 %v2476_v16 }
 0xd56   :  { %v2638_v17 = vpop.eup %2637 }
 0xd57   :  { %v2640_v18 = vpop.eup %2639  ;;  %v1620_v39 = vadd.f32 1.0, %v2638_v17 }
 0xd58   :  { %v1621_v61 = vadd.f32 1.0, %v2640_v18 }
 0xd59   :  { %2641 = vrcp.f32 %v1620_v39  ;;  %v1635_v20 = vand.u32 2147483648, %v1620_v39  ;;  %v1633_v49 = vand.u32 2147483647, %v1620_v39  ;;  %vm1629_vm10 = vweird.f32 %v1620_v39 }
 0xd5a   :  { %2643 = vrcp.f32 %v1621_v61  ;;  %v1650_v51 = vand.u32 2147483648, %v1621_v61  ;;  %v1648_v58 = vand.u32 2147483647, %v1621_v61  ;;  %vm1644_vm15 = vweird.f32 %v1621_v61 }
 0xd5b   :  { %2645 = vpow2.f32 %v2478_v9  ;;  %v1636_v56 = vor.u32 1.1754944e-38, %v1635_v20  ;;  %vm1634_vm12 = vcmp.eq.f32.partialorder %v1633_v49, 8.507059e+37 }
 0xd5c   :  { %2647 = vpow2.f32 %v2477_v50  ;;  %v1651_v62 = vor.u32 1.1754944e-38, %v1650_v51  ;;  %vm1649_vm13 = vcmp.eq.f32.partialorder %v1648_v58, 8.507059e+37 }
 0xd5f   :  { %v2642_v5 = vpop.eup %2641 }
 0xd60   :  { %v2644_v38 = vpop.eup %2643  ;;  %v1625_v57 = vmul.f32 %v2642_v5, %v1620_v39  ;;  %vm1630_vm8 = vweird.f32 %v2642_v5 }
 0xd61   :  { %v1640_v19 = vmul.f32 %v2644_v38, %v1621_v61  ;;  %v2646_v2 = vpop.eup %2645  ;;  %vm1645_vm1 = vweird.f32 %v2644_v38  ;;  %vm1631_vm14 = vmor %vm1629_vm10, %vm1630_vm8 }
 0xd62   :  { %v1626_v1 = vsub.f32 1.0, %v1625_v57  ;;  %v2648_v7 = vpop.eup %2647  ;;  %v1623_v12 = vadd.f32 1.0, %v2646_v2  ;;  %vm1646_vm0 = vmor %vm1644_vm15, %vm1645_vm1 }
 0xd63   :  { %v1641_v43 = vsub.f32 1.0, %v1640_v19  ;;  %v1622_v37 = vadd.f32 1.0, %v2648_v7 }
 0xd64   :  { %v1627_v26 = vmul.f32 %v2642_v5, %v1626_v1  ;;  %2649 = vrcp.f32 %v1623_v12  ;;  %v1680_v61 = vand.u32 2147483648, %v1623_v12  ;;  %vm1674_vm5 = vweird.f32 %v1623_v12 }
 0xd65   :  { %v1642_v4 = vmul.f32 %v2644_v38, %v1641_v43  ;;  %2651 = vrcp.f32 %v1622_v37  ;;  %v1665_v9 = vand.u32 2147483648, %v1622_v37  ;;  %v1678_v50 = vand.u32 2147483647, %v1623_v12 }
 0xd66   :  { %v1628_v52 = vadd.f32 %v2642_v5, %v1627_v26  ;;  %vm1659_vm7 = vweird.f32 %v1622_v37  ;;  %v1681_v19 = vor.u32 1.1754944e-38, %v1680_v61 }
 0xd67   :  { %v1643_v24 = vadd.f32 %v2644_v38, %v1642_v4  ;;  %v1666_v1 = vor.u32 1.1754944e-38, %v1665_v9  ;;  %vm1679_vm10 = vcmp.eq.f32.partialorder %v1678_v50, 8.507059e+37 }
 0xd68   :  { %v1632_v11 = vsel %vm1631_vm14, %v2642_v5, %v1628_v52  ;;  %v1663_v5 = vand.u32 2147483647, %v1622_v37 }
 0xd69   :  { %v1637_v47 = vsel %vm1634_vm12, %v1636_v56, %v1632_v11  ;;  %v1647_v8 = vsel %vm1646_vm0, %v2644_v38, %v1643_v24  ;;  %vm4250_vm0 = vcmp.lt.s32.totalorder %v2838_v25, 1 }
 0xd6a   :  { %v1652_v48 = vsel %vm1649_vm13, %v1651_v62, %v1647_v8  ;;  %v3698_v40 = vmul.f32 %v1637_v47, %v1604_v13  ;;  %v2650_v16 = vpop.eup %2649  ;;  %vm1664_vm14 = vcmp.eq.f32.partialorder %v1663_v5, 8.507059e+37  ;;  %vm4251_vm13 = vmmov %vm4250_vm0 }
 0xd6b   :  { %v3700_v53 = vmul.f32 %v1652_v48, %v1605_v31  ;;  %v2652_v22 = vpop.eup %2651  ;;  %v1670_v10 = vmul.f32 %v2650_v16, %v1623_v12  ;;  %vm1675_vm9 = vweird.f32 %v2650_v16 }
 0xd6c   :  { %1784 = vrot.lane.b32.xlu1 %v3698_v40, %s2723_s28  ;;  %v1655_v13 = vmul.f32 %v2652_v22, %v1622_v37  ;;  %vm1660_vm6 = vweird.f32 %v2652_v22  ;;  %vm1676_vm8 = vmor %vm1674_vm5, %vm1675_vm9  ;;  %vm4254_vm5 = vcmp.lt.s32.totalorder %v2838_v25, 15 }
 0xd6d   :  { %1772 = vrot.lane.b32.xlu0 %v3700_v53, %s2727_s7  ;;  %1788 = vrot.lane.b32.xlu2 %v3700_v53, %s2723_s28  ;;  %v1671_v31 = vsub.f32 1.0, %v1670_v10  ;;  %vm1661_vm1 = vmor %vm1659_vm7, %vm1660_vm6 }
 0xd6e   :  { %v1656_v42 = vsub.f32 1.0, %v1655_v13  ;;  %vm4252_vm9 = vmmov %vm4250_vm0 }
 0xd6f   :  { %v1672_v17 = vmul.f32 %v2650_v16, %v1671_v31  ;;  %vm4253_vm6 = vmmov %vm4250_vm0 }
 0xd70   :  { %v1657_v23 = vmul.f32 %v2652_v22, %v1656_v42  ;;  %vm4255_vm7 = vmmov %vm4254_vm5 }
 0xd71   :  { %v1673_v18 = vadd.f32 %v2650_v16, %v1672_v17 }
 0xd72   :  { %v1658_v39 = vadd.f32 %v2652_v22, %v1657_v23 }
 0xd73   :  { %v1677_v38 = vsel %vm1676_vm8, %v2650_v16, %v1673_v18  ;;  %vm4256_vm8 = vmmov %vm4254_vm5 }
 0xd74   :  { %1756 = vrot.lane.b32.xlu1 %v3700_v53, %s2722_s27  ;;  %v1662_v57 = vsel %vm1661_vm1, %v2652_v22, %v1658_v39  ;;  %v1682_v20 = vsel %vm1679_vm10, %v1681_v19, %v1677_v38  ;;  %vm4257_vm1 = vmmov %vm4254_vm5  ;;  %vm4258_vm10 = vcmp.lt.s32.totalorder %v2838_v25, 16 }
 0xd75   :  { %1752 = vrot.lane.b32.xlu0 %v3698_v40, %s2722_s27  ;;  %1768 = vrot.lane.b32.xlu2 %v3698_v40, %s2727_s7  ;;  %v1667_v43 = vsel %vm1664_vm14, %v1666_v1, %v1662_v57  ;;  %v3727_v2 = vmul.f32 %v1682_v20, %v3691_v63  ;;  %vm4259_vm14 = vmmov %vm4258_vm10 }
 0xd76   :  { %v3730_v26 = vmul.f32 %v1667_v43, %v3694_v59 }
 0xd7c   :  { %1736 = vrot.lane.b32.xlu1 %v3698_v40, %s2725_s30 }
 0xd7d   :  { %1724 = vrot.lane.b32.xlu0 %v3700_v53, %s2729_s9  ;;  %1740 = vrot.lane.b32.xlu2 %v3700_v53, %s2725_s30 }
 0xd84   :  { %1708 = vrot.lane.b32.xlu1 %v3700_v53, %s2726_s6 }
 0xd85   :  { %1704 = vrot.lane.b32.xlu0 %v3698_v40, %s2726_s6  ;;  %1720 = vrot.lane.b32.xlu2 %v3698_v40, %s2729_s9 }
 0xd8c   :  { %1774 = vrot.lane.b32.xlu1 %v3727_v2, %s2727_s7 }
 0xd8d   :  { %1790 = vrot.lane.b32.xlu0 %v3727_v2, %s2723_s28  ;;  %1786 = vrot.lane.b32.xlu2 %v3730_v26, %s2723_s28 }
 0xd94   :  { %1754 = vrot.lane.b32.xlu1 %v3730_v26, %s2722_s27 }
 0xd95   :  { %1770 = vrot.lane.b32.xlu0 %v3730_v26, %s2727_s7  ;;  %1758 = vrot.lane.b32.xlu2 %v3727_v2, %s2722_s27 }
 0xd9c   :  { %1726 = vrot.lane.b32.xlu1 %v3727_v2, %s2729_s9 }
 0xd9d   :  { %1742 = vrot.lane.b32.xlu0 %v3727_v2, %s2725_s30  ;;  %1738 = vrot.lane.b32.xlu2 %v3730_v26, %s2725_s30 }
 0xda4   :  { %1706 = vrot.lane.b32.xlu1 %v3730_v26, %s2726_s6 }
 0xda5   :  { %1722 = vrot.lane.b32.xlu0 %v3730_v26, %s2729_s9  ;;  %1710 = vrot.lane.b32.xlu2 %v3727_v2, %s2726_s6 }
 0xdac   :  { %1688 = vrot.lane.b32.xlu1 %v3698_v40, %s2728_s8 }
 0xdad   :  { %1694 = vrot.lane.b32.xlu0 %v3727_v2, %s2728_s8  ;;  %1690 = vrot.lane.b32.xlu2 %v3730_v26, %s2728_s8 }
 0xdb4   :  { %1806 = vrot.lane.b32.xlu1 %v3727_v2, %s2724_s29 }
 0xdb5   :  { %1802 = vrot.lane.b32.xlu0 %v3730_v26, %s2724_s29  ;;  %1692 = vrot.lane.b32.xlu2 %v3700_v53, %s2728_s8 }
 0xdbd   :  { %1804 = vrot.lane.b32.xlu0 %v3700_v53, %s2724_s29  ;;  %1800 = vrot.lane.b32.xlu2 %v3698_v40, %s2724_s29 }
 0xdc7   :  { %v1789_v63 = vpop.permute.xlu2 %1788 }
 0xdcf   :  { %v1769_v59 = vpop.permute.xlu2 %1768 }
 0xdd7   :  { %v1741_v49 = vpop.permute.xlu2 %1740 }
 0xdde   :  { %v1785_v51 = vpop.permute.xlu1 %1784 }
 0xddf   :  { %v1773_v7 = vpop.permute.xlu0 %1772  ;;  %v3772_v4 = vpop.permute.xlu2 %1720  ;;  %v1792_v48 = vsel %vm210_vm3, %v1785_v51, %v1789_v63  ;;  %v1794_v16 = vsel %vm210_vm3, %v1789_v63, %v1785_v51 }
 0xde0   :  { %v1796_v17 = vmul.f32 %v1792_v48, %v2852_v32  ;;  %v1797_v23 = vmul.f32 %v1794_v16, %v2854_v33  ;;  %v1776_v61 = vsel %vm196_vm4, %v1769_v59, %v1773_v7  ;;  %v1778_v9 = vsel %vm196_vm4, %v1773_v7, %v1769_v59 }
 0xde1   :  { %v1780_v19 = vmul.f32 %v1776_v61, %v2872_v44  ;;  %v1781_v1 = vmul.f32 %v1778_v9, %v2874_v45 }
 0xde6   :  { %v1757_v58 = vpop.permute.xlu1 %1756 }
 0xde7   :  { %v1753_v52 = vpop.permute.xlu0 %1752  ;;  %v1787_v12 = vpop.permute.xlu2 %1786 }
 0xdee   :  { %v1737_v56 = vpop.permute.xlu1 %1736 }
 0xdef   :  { %v3774_v24 = vpop.permute.xlu0 %1724  ;;  %v1759_v11 = vpop.permute.xlu2 %1758 }
 0xdf6   :  { %v3776_v37 = vpop.permute.xlu1 %1708 }
 0xdf7   :  { %v3778_v62 = vpop.permute.xlu0 %1704  ;;  %v1739_v13 = vpop.permute.xlu2 %1738 }
 0xdfe   :  { %v1775_v47 = vpop.permute.xlu1 %1774 }
 0xdff   :  { %v1791_v8 = vpop.permute.xlu0 %1790  ;;  %v1711_v20 = vpop.permute.xlu2 %1710 }
 0xe00   :  { %v1793_v22 = vsel %vm210_vm3, %v1787_v12, %v1791_v8  ;;  %v1795_v10 = vsel %vm210_vm3, %v1791_v8, %v1787_v12  ;;  %vm4246_vm3 = vcmp.lt.s32.totalorder %v2838_v25, 127 }
 0xe01   :  { %v1798_v31 = vmul.f32 %v1793_v22, %v2852_v32  ;;  %v1799_v42 = vmul.f32 %v1795_v10, %v2854_v33  ;;  %vm4247_vm15 = vmmov %vm4246_vm3 }
 0xe02   :  { %vm4248_vm12 = vmmov %vm4246_vm3 }
 0xe03   :  { %1816 = vmatpush.msra.mxu0 %v1798_v31  ;;  %1862 = vmatpush.msrb.mxu2 %v1799_v42  ;;  %v1760_v43 = vsel %vm4248_vm12, %v1753_v52, %v1757_v58  ;;  %vm4262_vm12 = vcmp.lt.s32.totalorder %v2838_v25, 17  ;;  %v2713_v25 = vld [vmem:[%s4148_s4 + $0x68] sm:$0xff] }
 0xe05   :  { %1817 = vmatpush.msra.mxu0 %v1796_v17  ;;  %1863 = vmatpush.msrb.mxu2 %v1797_v23 }
 0xe06   :  { %v1755_v18 = vpop.permute.xlu1 %1754 }
 0xe07   :  { %v1771_v39 = vpop.permute.xlu0 %1770  ;;  %v1761_v38 = vsel %vm4246_vm3, %v1755_v18, %v1759_v11  ;;  %v1763_v57 = vsel %vm4247_vm15, %v1759_v11, %v1755_v18 }
 0xe08   :  { %v1777_v50 = vsel %vm196_vm4, %v1771_v39, %v1775_v47  ;;  %v1779_v32 = vsel %vm196_vm4, %v1775_v47, %v1771_v39  ;;  %vm4249_vm4 = vmmov %vm4246_vm3  ;;  %v1766_v59 = vmul.f32 %v1761_v38, %v2886_v54  ;;  %v1767_v51 = vmul.f32 %v1763_v57, %v2888_v55 }
 0xe09   :  { %v1782_v33 = vmul.f32 %v1777_v50, %v2872_v44  ;;  %v1783_v5 = vmul.f32 %v1779_v32, %v2874_v45  ;;  %v1762_v63 = vsel %vm4249_vm4, %v1757_v58, %v1753_v52  ;;  %v1764_v44 = vmul.f32 %v1760_v43, %v2886_v54  ;;  %v1691_v52 = vpop.permute.xlu2 %1690  ;;  %vm4260_vm3 = vmmov %vm4258_vm10 }
 0xe0a   :  { %v1765_v45 = vmul.f32 %v1762_v63, %v2888_v55  ;;  %v1744_v54 = vsel %vm4252_vm9, %v1737_v56, %v1741_v49  ;;  %v1746_v55 = vsel %vm4253_vm6, %v1741_v49, %v1737_v56  ;;  %v1728_v49 = vsel %vm4254_vm5, %v3772_v4, %v3774_v24  ;;  %vm4261_vm15 = vmmov %vm4260_vm3 }
 0xe0b   :  { %1818 = vmatpush.msra.mxu0 %v1782_v33  ;;  %1864 = vmatpush.msrb.mxu2 %v1783_v5  ;;  %v1714_v31 = vsel %vm4261_vm15, %v3776_v37, %v3778_v62  ;;  %vm4263_vm4 = vmmov %vm4262_vm12  ;;  %v2710_v33 = vld [vmem:[%s4148_s4 + $0x50] sm:$0xff]  ;;  %vm4266_vm9 = vcmask 130048  }
 0xe0c   :  { %vm4267_vm6 = vmmov %vm4266_vm9 }
 0xe0d   :  { %1819 = vmatpush.msra.mxu0 %v1780_v19  ;;  %1865 = vmatpush.msrb.mxu2 %v1781_v1  ;;  %v2711_v1 = vld [vmem:[%s4148_s4 + $0x60] sm:$0xff] }
 0xe0e   :  { %v1727_v7 = vpop.permute.xlu1 %1726 }
 0xe0f   :  { %v1743_v12 = vpop.permute.xlu0 %1742  ;;  %1820 = vmatpush.msra.mxu0 %v1766_v59  ;;  %1866 = vmatpush.msrb.mxu2 %v1767_v51 }
 0xe10   :  { %v1745_v11 = vsel %vm4250_vm0, %v1739_v13, %v1743_v12  ;;  %v1747_v58 = vsel %vm4251_vm13, %v1743_v12, %v1739_v13  ;;  %v1712_v13 = vsel %vm4260_vm3, %v3778_v62, %v3776_v37  ;;  %vm4264_vm0 = vmmov %vm4263_vm4 }
 0xe11   :  { %1821 = vmatpush.msra.mxu0 %v1764_v44  ;;  %1867 = vmatpush.msrb.mxu2 %v1765_v45  ;;  %v1750_v47 = vmul.f32 %v1747_v58, %v2906_v0  ;;  %v1751_v8 = vmul.f32 %v1745_v11, %v2908_v3  ;;  %v1717_v23 = vmul.f32 %v1712_v13, %v2943_v30  ;;  %v1693_v18 = vpop.permute.xlu2 %1692  ;;  %vm4265_vm13 = vmmov %vm4264_vm0  ;;  %v2712_v44 = vld [vmem:[%s4148_s4 + $0x58] sm:$0xff]  ;;  %v4270_v11 = vld [vmem:[#allocation3_spill] sm:$0xff] }
 0xe13   :  { %1822 = vmatpush.msra.mxu0 %v3730_v26  ;;  %1868 = vmatpush.msrb.mxu2 %v3727_v2  ;;  %v1748_v26 = vmul.f32 %v1746_v55, %v2906_v0  ;;  %v1749_v2 = vmul.f32 %v1744_v54, %v2908_v3 }
 0xe15   :  { %1823 = vmatpush.msra.mxu0 %v3698_v40  ;;  %1869 = vmatpush.msrb.mxu2 %v3700_v53  ;;  %v1730_v40 = vsel %vm4255_vm7, %v3774_v24, %v3772_v4  ;;  %v1733_v24 = vmul.f32 %v1728_v49, %v2925_v15  ;;  %vm4272_vm7 = vcmask 7168  }
 0xe16   :  { %v1707_v48 = vpop.permute.xlu1 %1706  ;;  %v1732_v4 = vmul.f32 %v1730_v40, %v2923_v14 }
 0xe17   :  { %v1723_v16 = vpop.permute.xlu0 %1722  ;;  %1824 = vmatpush.msra.mxu0 %v1750_v47  ;;  %1870 = vmatpush.msrb.mxu2 %v1751_v8  ;;  %v1713_v22 = vsel %vm4258_vm10, %v1707_v48, %v1711_v20  ;;  %v1715_v10 = vsel %vm4259_vm14, %v1711_v20, %v1707_v48 }
 0xe18   :  { %v1729_v53 = vsel %vm4256_vm8, %v1723_v16, %v1727_v7  ;;  %v1731_v0 = vsel %vm4257_vm1, %v1727_v7, %v1723_v16  ;;  %v1718_v42 = vmul.f32 %v1715_v10, %v2941_v27  ;;  %v1719_v17 = vmul.f32 %v1713_v22, %v2943_v30  ;;  %vm4273_vm8 = vmmov %vm4272_vm7 }
 0xe19   :  { %v1734_v3 = vmul.f32 %v1731_v0, %v2923_v14  ;;  %v1735_v56 = vmul.f32 %v1729_v53, %v2925_v15  ;;  %1825 = vmatpush.msra.mxu0 %v1748_v26  ;;  %1871 = vmatpush.msrb.mxu2 %v1749_v2  ;;  %v1716_v15 = vmul.f32 %v1714_v31, %v2941_v27  ;;  %v1801_v20 = vpop.permute.xlu2 %1800  ;;  %v4271_v2 = vld [vmem:[#allocation4_spill] sm:$0xff] }
 0xe1b   :  { %1826 = vmatpush.msra.mxu0 %v1734_v3  ;;  %1872 = vmatpush.msrb.mxu2 %v1735_v56 }
 0xe1d   :  { %1827 = vmatpush.msra.mxu0 %v1732_v4  ;;  %1873 = vmatpush.msrb.mxu2 %v1733_v24 }
 0xe1e   :  { %v1689_v14 = vpop.permute.xlu1 %1688 }
 0xe1f   :  { %v1695_v39 = vpop.permute.xlu0 %1694  ;;  %1828 = vmatpush.msra.mxu0 %v1718_v42  ;;  %1874 = vmatpush.msrb.mxu2 %v1719_v17  ;;  %v1696_v61 = vsel %vm4262_vm12, %v1689_v14, %v1693_v18  ;;  %v1698_v37 = vsel %vm4263_vm4, %v1693_v18, %v1689_v14  ;;  %v2714_v18 = vld [vmem:[%s4148_s4 + $0x70] sm:$0xff] }
 0xe20   :  { %v1697_v62 = vsel %vm4264_vm0, %v1691_v52, %v1695_v39  ;;  %v1699_v9 = vsel %vm4265_vm13, %v1695_v39, %v1691_v52  ;;  %v1700_v50 = vmul.f32 %v1698_v37, %v2946_v35  ;;  %v1701_v32 = vmul.f32 %v1696_v61, %v2948_v36  ;;  %v2715_v39 = vld [vmem:[%s4148_s4 + $0x80] sm:$0xff] }
 0xe21   :  { %v1702_v27 = vmul.f32 %v1699_v9, %v2946_v35  ;;  %v1703_v30 = vmul.f32 %v1697_v62, %v2948_v36  ;;  %1829 = vmatpush.msra.mxu0 %v1716_v15  ;;  %1875 = vmatpush.msrb.mxu2 %v1717_v23 }
 0xe23   :  { %1830 = vmatpush.msra.mxu0 %v1702_v27  ;;  %1876 = vmatpush.msrb.mxu2 %v1703_v30  ;;  %v2105_v27 = vadd.f32 %v3544_v34, %v3560_v60 }
 0xe25   :  { %1831 = vmatpush.msra.mxu0 %v1700_v50  ;;  %1877 = vmatpush.msrb.mxu2 %v1701_v32 }
 0xe26   :  { %1832 = vmatmul.f32.vlgmr.msra.gmra.mxu0 %v2710_v33  ;;  %1878 = vmatmul.f32.vlgmr.msrb.gmra.mxu2 %v2710_v33  ;;  %v1807_v5 = vpop.permute.xlu1 %1806 }
 0xe27   :  { %v1803_v38 = vpop.permute.xlu0 %1802 }
 0xe28   :  { %v1809_v57 = vsel %vm224_vm2, %v1803_v38, %v1807_v5  ;;  %v1811_v35 = vsel %vm224_vm2, %v1807_v5, %v1803_v38 }
 0xe29   :  { %v1814_v36 = vmul.f32 %v1809_v57, %v2847_v28  ;;  %v1815_v19 = vmul.f32 %v1811_v35, %v2849_v29 }
 0xe2b   :  { %1853 = vmatpush.msrb.mxu3 %v1814_v36  ;;  %1899 = vmatpush.msra.mxu1 %v1815_v19 }
 0xe2c   :  { %2501 = vmatpush.msra.mxu2 %v1815_v19 }
 0xe2e   :  { %1835 = vmatmul.f32.gmra.mxu0 %v2711_v1  ;;  %1881 = vmatmul.f32.gmra.mxu2 %v2711_v1 }
 0xe2f   :  { %v1805_v43 = vpop.permute.xlu0 %1804 }
 0xe30   :  { %v1808_v63 = vsel %vm224_vm2, %v1801_v20, %v1805_v43  ;;  %v1810_v59 = vsel %vm224_vm2, %v1805_v43, %v1801_v20  ;;  %vm4268_vm2 = vmmov %vm4267_vm6 }
 0xe31   :  { %v1812_v51 = vmul.f32 %v1808_v63, %v2847_v28  ;;  %v1813_v7 = vmul.f32 %v1810_v59, %v2849_v29  ;;  %vm4269_vm5 = vmmov %vm4268_vm2 }
 0xe32   :  { %vm4274_vm1 = vmmov %vm4268_vm2 }
 0xe33   :  { %1854 = vmatpush.msrb.mxu3 %v1812_v51  ;;  %1900 = vmatpush.msra.mxu1 %v1813_v7  ;;  %vm4275_vm10 = vmmov %vm4274_vm1 }
 0xe34   :  { %2502 = vmatpush.msra.mxu2 %v1813_v7  ;;  %2479 = vmatmul.msk.f32.vlgmr.msrb.gmra.mxu3 %vm4266_vm9, %v2712_v44 }
 0xe35   :  { %2481 = vmatmul.msk.f32.vlgmr.msra.gmra.mxu1 %vm4267_vm6, %v2712_v44 }
 0xe36   :  { %2482 = vmatmul.msk.f32.vlgmr.msra.gmra.mxu2 %vm4268_vm2, %v2713_v25 }
 0xe3c   :  { %2480 = vmatmul.msk.f32.gmra.mxu3 %vm4269_vm5, %v2713_v25 }
 0xea3   :  { %v1833_v29 = vpop.f32.mrf.mxu0 }
 0xea4   :  { %v1834_v58 = vadd.f32 %v1833_v29, %v4270_v11  ;;  %v2112_v29 = vmul.f32 %v3560_v60, %v3560_v60 }
 0xea9   :  { %v1879_v28 = vpop.f32.mrf.mxu2 }
 0xeaa   :  { %v1880_v54 = vadd.f32 %v1879_v28, %v4270_v11 }
 0xeab   :  { %v1836_v48 = vpop.f32.mrf.mxu0 }
 0xeac   :  { %v1837_v49 = vadd.f32 %v1836_v48, %v4271_v2 }
 0xeb1   :  { %v1882_v45 = vpop.f32.mrf.mxu2 }
 0xeb2   :  { %v1902_v12 = vpop.f32.mrf.mxu1  ;;  %v1883_v16 = vadd.f32 %v1882_v45, %v4271_v2  ;;  %v2113_v45 = vmul.f32 %v3544_v34, %v3544_v34 }
 0xeb3   :  { %v3906_v52 = vadd.f32 %v1902_v12, %v1880_v54 }
 0xeb4   :  { %v2120_v12 = vadd.f32 %v2113_v45, %v2112_v29 }
 0xeb5   :  { %v1915_v24 = vmul.f32 %v3906_v52, %v3906_v52 }
 0xeb7   :  { %v1856_v55 = vpop.f32.mrf.mxu3 }
 0xeb8   :  { %v3908_v47 = vadd.f32 %v1856_v55, %v1834_v58 }
 0xeb9   :  { %v1905_v26 = vpop.f32.mrf.mxu2 }
 0xeba   :  { %v1908_v8 = vadd.f32 %v3906_v52, %v3908_v47  ;;  %v3914_v40 = vadd.f32 %v1905_v26, %v1883_v16  ;;  %v1914_v4 = vmul.f32 %v3908_v47, %v3908_v47  ;;  %v4276_v26 = vld [vmem:[#allocation5_spill] sm:$0xff] }
 0xebc   :  { %1909 = vadd.xlane.f32.xlu0 %v1908_v8  ;;  %v1917_v3 = vmul.f32 %v3914_v40, %v3914_v40  ;;  %v1918_v13 = vadd.f32 %v1915_v24, %v1914_v4 }
 0xebf   :  { %v1859_v53 = vpop.f32.mrf.mxu3 }
 0xec0   :  { %v3916_v0 = vadd.f32 %v1859_v53, %v1837_v49  ;;  %v4277_v49 = vld [vmem:[#allocation7_spill] sm:$0xff] }
 0xec2   :  { %v1916_v56 = vmul.f32 %v3916_v0, %v3916_v0  ;;  %v1911_v22 = vadd.f32 %v3914_v40, %v3916_v0 }
 0xec4   :  { %1912 = vadd.xlane.f32.xlu1 %v1911_v22  ;;  %v1921_v10 = vadd.f32 %v1917_v3, %v1916_v56 }
 0xec6   :  { %1922 = vadd.xlane.f32.xlu2 %v1921_v10 }
 0xece   :  { %1919 = vadd.xlane.f32.xlu2 %v1918_v13 }
 0xf2f   :  { %v1910_v14 = vpop.xlane.xlu0 %1909 }
 0xf37   :  { %v1913_v31 = vpop.xlane.xlu1 %1912 }
 0xf39   :  { %v1923_v42 = vpop.xlane.xlu2 %1922 }
 0xf3a   :  { %v1925_v17 = vsel %vm4272_vm7, %v1913_v31, %v1923_v42 }
 0xf3b   :  { %1940 = vmatpush.msra.mxu3 %v1925_v17 }
 0xf41   :  { %v1920_v15 = vpop.xlane.xlu2 %1919 }
 0xf42   :  { %v1924_v23 = vsel %vm4273_vm8, %v1910_v14, %v1920_v15 }
 0xf43   :  { %1941 = vmatpush.msra.mxu3 %v1924_v23 }
 0xf44   :  { %2483 = vmatmul.msk.f32.vlgmr.msra.gmra.mxu3 %vm4274_vm1, %v2714_v18 }
 0xf4c   :  { %2484 = vmatmul.msk.f32.gmra.mxu3 %vm4275_vm10, %v2715_v39  ;;  %vm4280_vm10 = vcmask 7168  }
 0xfc7   :  { %v1943_v61 = vpop.f32.mrf.mxu3 }
 0xfc8   :  { %v1949_v37 = vmul.f32 %v1943_v61, %v1943_v61 }
 0xfca   :  { %1953 = vrot.lane.b32.xlu2 %v1949_v37, %s2725_s30 }
 0xfcf   :  { %v1946_v62 = vpop.f32.mrf.mxu3 }
 0xfd0   :  { %v1950_v9 = vmul.f32 %v1946_v62, %v1946_v62  ;;  %1990 = vperm.xlu0 %2553, %v1946_v62  }
 0xfd2   :  { %1955 = vrot.lane.b32.xlu1 %v1950_v9, %s2725_s30 }
 0xfd8   :  { %2557 = vset.pattern.permute.xlu0 %v4210_v6 }
 0xfda   :  { %1985 = vperm.xlu1 %2556, %v1943_v61  }
 0xfe2   :  { %2560 = vset.pattern.permute.xlu1 %v4210_v6 }
0x1004   :  { %2106 = vadd.xlane.f32.xlu1 %v2105_v27 }
0x1024   :  { %v1954_v30 = vpop.permute.xlu2 %1953 }
0x1025   :  { %v1959_v50 = vsub.f32 %v1943_v61, %v1954_v30 }
0x1027   :  { %v1961_v32 = vadd.f32 1e-05, %v1959_v50 }
0x1029   :  { %2653 = vrsqrt.f32 %v1961_v32  ;;  %vm1969_vm3 = vweird.f32 %v1961_v32 }
0x102f   :  { %v2654_v33 = vpop.eup %2653 }
0x1030   :  { %v1964_v5 = vmul.f32 %v2654_v33, %v1961_v32  ;;  %vm1970_vm14 = vweird.f32 %v2654_v33 }
0x1031   :  { %vm1971_vm15 = vmor %vm1969_vm3, %vm1970_vm14 }
0x1032   :  { %v1965_v38 = vmul.f32 %v2654_v33, %v1964_v5 }
0x1034   :  { %v1966_v57 = vmul.f32 0.5, %v1965_v38 }
0x1036   :  { %v1967_v35 = vsub.f32 1.5, %v1966_v57 }
0x1038   :  { %v1968_v36 = vmul.f32 %v2654_v33, %v1967_v35 }
0x103a   :  { %v1972_v19 = vsel %vm1971_vm15, %v2654_v33, %v1968_v36 }
0x103b   :  { %1999 = vperm.xlu2 %2554, %v1972_v19  }
0x1042   :  { %v1991_v35 = vpop.permute.xlu0 %1990 }
0x1043   :  { %2559 = vset.pattern.permute.xlu2 %v4211_v41  ;;  %v1995_v36 = vsub.f32 %v3916_v0, %v1991_v35  ;;  %v1996_v19 = vsub.f32 %v3914_v40, %v1991_v35  ;;  %v2717_v35 = vld [vmem:[%s4148_s4 + $0xa0] sm:$0xff] }
0x1044   :  { %v1956_v1 = vpop.permute.xlu1 %1955 }
0x1045   :  { %v1960_v20 = vsub.f32 %v1946_v62, %v1956_v1 }
0x1047   :  { %v1962_v43 = vadd.f32 1e-05, %v1960_v20 }
0x1049   :  { %2655 = vrsqrt.f32 %v1962_v43  ;;  %vm1979_vm4 = vweird.f32 %v1962_v43 }
0x104c   :  { %v1986_v11 = vpop.permute.xlu1 %1985 }
0x104d   :  { %v1993_v58 = vsub.f32 %v3908_v47, %v1986_v11  ;;  %v1994_v54 = vsub.f32 %v3906_v52, %v1986_v11 }
0x104f   :  { %v2656_v63 = vpop.eup %2655 }
0x1050   :  { %v1974_v59 = vmul.f32 %v2656_v63, %v1962_v43  ;;  %vm1980_vm12 = vweird.f32 %v2656_v63 }
0x1051   :  { %vm1981_vm0 = vmor %vm1979_vm4, %vm1980_vm12 }
0x1052   :  { %v1975_v51 = vmul.f32 %v2656_v63, %v1974_v59 }
0x1054   :  { %v1976_v7 = vmul.f32 0.5, %v1975_v51 }
0x1056   :  { %v1977_v44 = vsub.f32 1.5, %v1976_v7  ;;  %v4279_v7 = vld [vmem:[#allocation8_spill] sm:$0xff] }
0x1058   :  { %v1978_v25 = vmul.f32 %v2656_v63, %v1977_v44 }
0x105a   :  { %v1982_v28 = vsel %vm1981_vm0, %v2656_v63, %v1978_v25  ;;  %v4278_v63 = vld [vmem:[#allocation6_spill] sm:$0xff] }
0x105b   :  { %2004 = vperm.xlu0 %2557, %v1982_v28  }
0x1063   :  { %2558 = vset.pattern.permute.xlu0 %v4211_v41 }
0x1064   :  { %2121 = vadd.xlane.f32.xlu2 %v2120_v12 }
0x1077   :  { %v2107_v45 = vpop.xlane.xlu1 %2106 }
0x1095   :  { %v2000_v55 = vpop.permute.xlu2 %1999 }
0x1096   :  { %v2007_v8 = vmul.f32 %v2000_v55, %v1993_v58  ;;  %v2008_v48 = vmul.f32 %v2000_v55, %v1994_v54 }
0x1098   :  { %v2011_v2 = vmul.f32 %v2007_v8, %v4276_v26  ;;  %v2012_v16 = vmul.f32 %v2008_v48, %v4276_v26 }
0x109a   :  { %v2015_v53 = vadd.f32 %v2011_v2, %v4277_v49  ;;  %v2016_v3 = vadd.f32 %v2012_v16, %v4277_v49 }
0x109c   :  { %v2485_v56 = vmul.f32 -1.442695, %v2015_v53  ;;  %v2486_v22 = vmul.f32 -1.442695, %v2016_v3 }
0x109e   :  { %2657 = vpow2.f32 %v2485_v56 }
0x109f   :  { %2659 = vpow2.f32 %v2486_v22 }
0x10a4   :  { %v2658_v41 = vpop.eup %2657 }
0x10a5   :  { %v2660_v10 = vpop.eup %2659  ;;  %v2031_v47 = vadd.f32 1.0, %v2658_v41 }
0x10a6   :  { %v2032_v4 = vadd.f32 1.0, %v2660_v10 }
0x10a7   :  { %2661 = vrcp.f32 %v2031_v47  ;;  %v2046_v17 = vand.u32 2147483648, %v2031_v47  ;;  %v2044_v23 = vand.u32 2147483647, %v2031_v47  ;;  %vm2040_vm6 = vweird.f32 %v2031_v47 }
0x10a8   :  { %2663 = vrcp.f32 %v2032_v4  ;;  %v2061_v18 = vand.u32 2147483648, %v2032_v4  ;;  %v2059_v61 = vand.u32 2147483647, %v2032_v4  ;;  %vm2055_vm5 = vweird.f32 %v2032_v4 }
0x10a9   :  { %v2047_v62 = vor.u32 1.1754944e-38, %v2046_v17  ;;  %vm2045_vm7 = vcmp.eq.f32.partialorder %v2044_v23, 8.507059e+37 }
0x10aa   :  { %v2062_v30 = vor.u32 1.1754944e-38, %v2061_v18  ;;  %vm2060_vm1 = vcmp.eq.f32.partialorder %v2059_v61, 8.507059e+37 }
0x10ad   :  { %v2662_v52 = vpop.eup %2661 }
0x10ae   :  { %v2664_v24 = vpop.eup %2663  ;;  %v2036_v13 = vmul.f32 %v2662_v52, %v2031_v47  ;;  %vm2041_vm13 = vweird.f32 %v2662_v52 }
0x10af   :  { %v2051_v31 = vmul.f32 %v2664_v24, %v2032_v4  ;;  %vm2056_vm9 = vweird.f32 %v2664_v24  ;;  %vm2042_vm2 = vmor %vm2040_vm6, %vm2041_vm13 }
0x10b0   :  { %v2037_v42 = vsub.f32 1.0, %v2036_v13  ;;  %vm2057_vm8 = vmor %vm2055_vm5, %vm2056_vm9 }
0x10b1   :  { %v2052_v14 = vsub.f32 1.0, %v2051_v31  ;;  %vm4281_vm6 = vmmov %vm4280_vm10 }
0x10b2   :  { %v2038_v15 = vmul.f32 %v2662_v52, %v2037_v42 }
0x10b3   :  { %v2053_v39 = vmul.f32 %v2664_v24, %v2052_v14 }
0x10b4   :  { %v2039_v37 = vadd.f32 %v2662_v52, %v2038_v15 }
0x10b5   :  { %v2054_v9 = vadd.f32 %v2664_v24, %v2053_v39 }
0x10b6   :  { %v2043_v27 = vsel %vm2042_vm2, %v2662_v52, %v2039_v37  ;;  %vm4282_vm2 = vmmov %vm4281_vm6 }
0x10b7   :  { %v2048_v50 = vsel %vm2045_vm7, %v2047_v62, %v2043_v27  ;;  %v2058_v32 = vsel %vm2057_vm8, %v2664_v24, %v2054_v9 }
0x10b8   :  { %v2063_v33 = vsel %vm2060_vm1, %v2062_v30, %v2058_v32  ;;  %v3956_v5 = vmul.f32 %v2048_v50, %v2015_v53  ;;  %vm1322_vm1 = vcmask 1043456  }
0x10b9   :  { %v3958_v38 = vmul.f32 %v2063_v33, %v2016_v3 }
0x10ba   :  { %v2108_v61 = vmul.f32 %v3956_v5, %v3956_v5 }
0x10bb   :  { %v2099_v57 = vadd.f32 %v3958_v38, %v3956_v5  ;;  %v2109_v37 = vmul.f32 %v3958_v38, %v3958_v38 }
0x10bd   :  { %2100 = vadd.xlane.f32.xlu2 %v2099_v57  ;;  %v2114_v62 = vadd.f32 %v2109_v37, %v2108_v61  ;;  %v2716_v57 = vld [vmem:[%s4148_s4 + $0x90] sm:$0xff] }
0x10cd   :  { %v2005_v1 = vpop.permute.xlu0 %2004 }
0x10ce   :  { %v2009_v20 = vmul.f32 %v2005_v1, %v1995_v36  ;;  %v2010_v43 = vmul.f32 %v2005_v1, %v1996_v19  ;;  %v2718_v36 = vld [vmem:[%s4148_s4 + $0xb0] sm:$0xff] }
0x10d0   :  { %v2013_v59 = vmul.f32 %v2009_v20, %v4278_v63  ;;  %v2014_v51 = vmul.f32 %v2010_v43, %v4278_v63 }
0x10d2   :  { %v2017_v44 = vadd.f32 %v2013_v59, %v4279_v7  ;;  %v2018_v25 = vadd.f32 %v2014_v51, %v4279_v7  ;;  %v46_v51 = vld [vmem:[%s4147_s3] sm:$0x7]  ;;  %v2738_v7 = vmov 10  }
0x10d4   :  { %v2487_v28 = vmul.f32 -1.442695, %v2017_v44  ;;  %v2488_v29 = vmul.f32 -1.442695, %v2018_v25 }
0x10d6   :  { %2665 = vpow2.f32 %v2487_v28 }
0x10d7   :  { %2667 = vpow2.f32 %v2488_v29  ;;  %v2122_v12 = vpop.xlane.xlu2 %2121 }
0x10d8   :  { %v2125_v0 = vsel %vm4280_vm10, %v2107_v45, %v2122_v12 }
0x10d9   :  { %2139 = vmatpush.msrb.mxu1 %v2125_v0 }
0x10dc   :  { %v2666_v40 = vpop.eup %2665 }
0x10dd   :  { %v2668_v11 = vpop.eup %2667  ;;  %v2033_v58 = vadd.f32 1.0, %v2666_v40 }
0x10de   :  { %v2034_v54 = vadd.f32 1.0, %v2668_v11 }
0x10df   :  { %2669 = vrcp.f32 %v2033_v58  ;;  %v2076_v16 = vand.u32 2147483648, %v2033_v58  ;;  %v2074_v3 = vand.u32 2147483647, %v2033_v58  ;;  %vm2070_vm15 = vweird.f32 %v2033_v58 }
0x10e0   :  { %2671 = vrcp.f32 %v2034_v54  ;;  %v2091_v56 = vand.u32 2147483648, %v2034_v54  ;;  %v2089_v41 = vand.u32 2147483647, %v2034_v54  ;;  %vm2085_vm4 = vweird.f32 %v2034_v54 }
0x10e1   :  { %v2077_v47 = vor.u32 1.1754944e-38, %v2076_v16  ;;  %vm2075_vm0 = vcmp.eq.f32.partialorder %v2074_v3, 8.507059e+37 }
0x10e2   :  { %v2092_v24 = vor.u32 1.1754944e-38, %v2091_v56  ;;  %vm2090_vm9 = vcmp.eq.f32.partialorder %v2089_v41, 8.507059e+37 }
0x10e5   :  { %v2670_v55 = vpop.eup %2669 }
0x10e6   :  { %v2672_v8 = vpop.eup %2671  ;;  %v2066_v48 = vmul.f32 %v2670_v55, %v2033_v58  ;;  %vm2071_vm14 = vweird.f32 %v2670_v55 }
0x10e7   :  { %v2081_v26 = vmul.f32 %v2672_v8, %v2034_v54  ;;  %vm2086_vm3 = vweird.f32 %v2672_v8  ;;  %vm2072_vm12 = vmor %vm2070_vm15, %vm2071_vm14 }
0x10e8   :  { %v2067_v2 = vsub.f32 1.0, %v2066_v48  ;;  %vm2087_vm13 = vmor %vm2085_vm4, %vm2086_vm3 }
0x10e9   :  { %v2082_v49 = vsub.f32 1.0, %v2081_v26 }
0x10ea   :  { %v2068_v53 = vmul.f32 %v2670_v55, %v2067_v2 }
0x10eb   :  { %v2083_v22 = vmul.f32 %v2672_v8, %v2082_v49 }
0x10ec   :  { %v2069_v10 = vadd.f32 %v2670_v55, %v2068_v53 }
0x10ed   :  { %v2084_v4 = vadd.f32 %v2672_v8, %v2083_v22 }
0x10ee   :  { %v2073_v52 = vsel %vm2072_vm12, %v2670_v55, %v2069_v10 }
0x10ef   :  { %v2078_v13 = vsel %vm2075_vm0, %v2077_v47, %v2073_v52  ;;  %v2088_v31 = vsel %vm2087_vm13, %v2672_v8, %v2084_v4 }
0x10f0   :  { %v2093_v42 = vsel %vm2090_vm9, %v2092_v24, %v2088_v31  ;;  %v3969_v17 = vmul.f32 %v2078_v13, %v2017_v44 }
0x10f1   :  { %v3971_v14 = vmul.f32 %v2093_v42, %v2018_v25 }
0x10f2   :  { %v2110_v15 = vmul.f32 %v3969_v17, %v3969_v17 }
0x10f3   :  { %v2102_v23 = vadd.f32 %v3971_v14, %v3969_v17  ;;  %v2111_v18 = vmul.f32 %v3971_v14, %v3971_v14 }
0x10f5   :  { %2103 = vadd.xlane.f32.xlu0 %v2102_v23  ;;  %v2117_v39 = vadd.f32 %v2111_v18, %v2110_v15 }
0x10f7   :  { %2118 = vadd.xlane.f32.xlu1 %v2117_v39 }
0x10ff   :  { %2115 = vadd.xlane.f32.xlu1 %v2114_v62 }
0x1130   :  { %v2101_v50 = vpop.xlane.xlu2 %2100 }
0x1168   :  { %v2104_v9 = vpop.xlane.xlu0 %2103 }
0x116a   :  { %v2119_v27 = vpop.xlane.xlu1 %2118 }
0x116b   :  { %v2124_v30 = vsel %vm4281_vm6, %v2104_v9, %v2119_v27 }
0x116c   :  { %2140 = vmatpush.msrb.mxu1 %v2124_v30  ;;  %v4283_v30 = vld [vmem:[#allocation13_spill] sm:$0xff] }
0x1172   :  { %v2116_v32 = vpop.xlane.xlu1 %2115 }
0x1173   :  { %v2123_v33 = vsel %vm4282_vm2, %v2101_v50, %v2116_v32 }
0x1174   :  { %2141 = vmatpush.msrb.mxu1 %v2123_v33  ;;  %v4284_v33 = vld [vmem:[#allocation14_spill] sm:$0xff] }
0x1175   :  { %2489 = vmatmul.msk.f32.vlgmr.msrb.gmra.mxu1 %vm985_vm11, %v2716_v57 }
0x117d   :  { %2490 = vmatmul.msk.f32.gmra.mxu1 %vm985_vm11, %v2717_v35 }
0x1185   :  { %2491 = vmatmul.msk.f32.gmra.mxu1 %vm985_vm11, %v2718_v36 }
0x11f2   :  { %v2143_v19 = vpop.f32.mrf.mxu1 }
0x11f3   :  { %v2152_v1 = vmul.f32 %v2143_v19, %v2143_v19 }
0x11f5   :  { %2158 = vrot.lane.b32.xlu1 %v2152_v1, %s2725_s30 }
0x11fa   :  { %v2146_v20 = vpop.f32.mrf.mxu1 }
0x11fb   :  { %v2153_v43 = vmul.f32 %v2146_v20, %v2146_v20 }
0x11fd   :  { %2160 = vrot.lane.b32.xlu2 %v2153_v43, %s2725_s30 }
0x1202   :  { %v2149_v63 = vpop.f32.mrf.mxu1 }
0x1203   :  { %v2154_v59 = vmul.f32 %v2149_v63, %v2149_v63 }
0x1205   :  { %2210 = vperm.xlu2 %2559, %v2146_v20   ;;  %2162 = vrot.lane.b32.xlu0 %v2154_v59, %s2725_s30 }
0x120d   :  { %2205 = vperm.xlu2 %2559, %v2143_v19   ;;  %2215 = vperm.xlu0 %2558, %v2149_v63  }
0x1215   :  { %2562 = vset.pattern.permute.xlu2 %v2738_v7  ;;  %2561 = vset.pattern.permute.xlu0 %v4210_v6 }
0x1216   :  { %1273 = vperm.xlu2 %2562, %v46_v51  }
0x1257   :  { %v2161_v44 = vpop.permute.xlu2 %2160 }
0x1258   :  { %v2168_v25 = vsub.f32 %v2146_v20, %v2161_v44  ;;  %v4285_v44 = vld [vmem:[#allocation11_spill] sm:$0xff] }
0x125a   :  { %v2171_v28 = vadd.f32 1e-05, %v2168_v25 }
0x125c   :  { %2673 = vrsqrt.f32 %v2171_v28  ;;  %vm2189_vm7 = vweird.f32 %v2171_v28 }
0x125f   :  { %v2211_v29 = vpop.permute.xlu2 %2210 }
0x1260   :  { %v2220_v37 = vsub.f32 %v3969_v17, %v2211_v29  ;;  %v2221_v62 = vsub.f32 %v3971_v14, %v2211_v29  ;;  %v4286_v29 = vld [vmem:[#allocation12_spill] sm:$0xff] }
0x1262   :  { %v2674_v45 = vpop.eup %2673 }
0x1263   :  { %v2184_v12 = vmul.f32 %v2674_v45, %v2171_v28  ;;  %vm2190_vm5 = vweird.f32 %v2674_v45 }
0x1264   :  { %vm2191_vm8 = vmor %vm2189_vm7, %vm2190_vm5 }
0x1265   :  { %v2185_v0 = vmul.f32 %v2674_v45, %v2184_v12 }
0x1267   :  { %v2186_v40 = vmul.f32 0.5, %v2185_v0  ;;  %v4004_v11 = vpop.permute.xlu2 %2205  ;;  %v2159_v55 = vpop.permute.xlu1 %2158 }
0x1268   :  { %v2167_v6 = vsub.f32 %v2143_v19, %v2159_v55 }
0x1269   :  { %v2187_v58 = vsub.f32 1.5, %v2186_v40 }
0x126a   :  { %v2170_v49 = vadd.f32 1e-05, %v2167_v6 }
0x126b   :  { %v2188_v54 = vmul.f32 %v2674_v45, %v2187_v58 }
0x126c   :  { %2675 = vrsqrt.f32 %v2170_v49  ;;  %vm2179_vm12 = vweird.f32 %v2170_v49 }
0x126d   :  { %v2192_v8 = vsel %vm2191_vm8, %v2674_v45, %v2188_v54 }
0x126e   :  { %2231 = vperm.xlu0 %2561, %v2192_v8   ;;  %v4287_v8 = vld [vmem:[#allocation9_spill] sm:$0xff] }
0x1270   :  { %v4006_v48 = vpop.permute.xlu2 %1273 }
0x1271   :  { %v1317_v26 = vadd.f32 %v3535_v46, %v4006_v48  ;;  %v1297_v2 = vadd.f32 %v3541_v21, %v4006_v48 }
0x1272   :  { %v2676_v41 = vpop.eup %2675 }
0x1273   :  { %v1321_v16 = vrot.slane %v1317_v26, 4  ;;  %v2174_v10 = vmul.f32 %v2676_v41, %v2170_v49  ;;  %vm2180_vm15 = vweird.f32 %v2676_v41 }
0x1274   :  { %vm2181_vm4 = vmor %vm2179_vm12, %vm2180_vm15 }
0x1275   :  { %v1323_v53 = vsel %vm1322_vm1, %v1297_v2, %v1321_v16  ;;  %v2175_v4 = vmul.f32 %v2676_v41, %v2174_v10 }
0x1276   :  { %1325 = vst [vmem:[%s4151_s5] sm:$0x77] %v1323_v53 }
0x1277   :  { %v2163_v3 = vpop.permute.xlu0 %2162  ;;  %v2176_v24 = vmul.f32 0.5, %v2175_v4 }
0x1278   :  { %v2169_v56 = vsub.f32 %v2149_v63, %v2163_v3 }
0x1279   :  { %v2177_v42 = vsub.f32 1.5, %v2176_v24 }
0x127a   :  { %v2172_v22 = vadd.f32 1e-05, %v2169_v56 }
0x127b   :  { %v2178_v23 = vmul.f32 %v2676_v41, %v2177_v42 }
0x127c   :  { %2677 = vrsqrt.f32 %v2172_v22  ;;  %vm2199_vm14 = vweird.f32 %v2172_v22 }
0x127d   :  { %v2182_v18 = vsel %vm2181_vm4, %v2676_v41, %v2178_v23 }
0x127f   :  { %v2216_v39 = vpop.permute.xlu0 %2215 }
0x1280   :  { %v2222_v14 = vsub.f32 %v3560_v60, %v2216_v39  ;;  %v2223_v1 = vsub.f32 %v3544_v34, %v2216_v39  ;;  %v2218_v34 = vsub.f32 %v3956_v5, %v4004_v11  ;;  %v2219_v60 = vsub.f32 %v3958_v38, %v4004_v11  ;;  %v4288_v38 = vld [vmem:[#allocation10_spill] sm:$0xff] }
0x1282   :  { %v2678_v46 = vpop.eup %2677 }
0x1283   :  { %v2194_v47 = vmul.f32 %v2678_v46, %v2172_v22  ;;  %vm2200_vm10 = vweird.f32 %v2678_v46 }
0x1284   :  { %vm2201_vm3 = vmor %vm2199_vm14, %vm2200_vm10 }
0x1285   :  { %v2195_v52 = vmul.f32 %v2678_v46, %v2194_v47 }
0x1287   :  { %v2196_v21 = vmul.f32 0.5, %v2195_v52 }
0x1289   :  { %v2197_v13 = vsub.f32 1.5, %v2196_v21 }
0x128b   :  { %v2198_v31 = vmul.f32 %v2678_v46, %v2197_v13 }
0x128d   :  { %v2202_v15 = vsel %vm2201_vm3, %v2678_v46, %v2198_v31 }
0x128e   :  { %2236 = vperm.xlu1 %2560, %v2202_v15  }
0x1296   :  { %2226 = vperm.xlu1 %2560, %v2182_v18  }
0x12e0   :  { %v2232_v61 = vpop.permute.xlu0 %2231 }
0x12e1   :  { %v2241_v9 = vmul.f32 %v2232_v61, %v2220_v37  ;;  %v2242_v27 = vmul.f32 %v2232_v61, %v2221_v62 }
0x12e3   :  { %v2247_v50 = vmul.f32 %v2241_v9, %v4283_v30  ;;  %v2248_v32 = vmul.f32 %v2242_v27, %v4283_v30 }
0x12e5   :  { %v4021_v57 = vadd.f32 %v2247_v50, %v4284_v33  ;;  %v4024_v35 = vadd.f32 %v2248_v32, %v4284_v33 }
0x12e7   :  { %v2494_v36 = vmul.f32 -1.442695, %v4021_v57  ;;  %v2495_v19 = vmul.f32 -1.442695, %v4024_v35 }
0x12e9   :  { %2679 = vpow2.f32 %v2494_v36 }
0x12ea   :  { %2681 = vpow2.f32 %v2495_v19 }
0x12ef   :  { %v2680_v17 = vpop.eup %2679 }
0x12f0   :  { %v2682_v20 = vpop.eup %2681  ;;  %v4030_v51 = vadd.f32 1.0, %v2680_v17 }
0x12f1   :  { %v4032_v7 = vadd.f32 1.0, %v2682_v20 }
0x12f2   :  { %2683 = vrcp.f32 %v4030_v51  ;;  %v2320_v52 = vand.u32 2147483647, %v4030_v51  ;;  %v2322_v21 = vand.u32 2147483648, %v4030_v51  ;;  %vm2316_vm0 = vweird.f32 %v4030_v51 }
0x12f3   :  { %2685 = vrcp.f32 %v4032_v7  ;;  %vm2331_vm13 = vweird.f32 %v4032_v7  ;;  %v2335_v61 = vand.u32 2147483647, %v4032_v7  ;;  %v2337_v37 = vand.u32 2147483648, %v4032_v7 }
0x12f4   :  { %vm4076_vm9 = vcmp.eq.f32.partialorder %v2320_v52, 8.507059e+37  ;;  %v2323_v27 = vor.u32 1.1754944e-38, %v2322_v21 }
0x12f5   :  { %vm4098_vm10 = vcmp.eq.f32.partialorder %v2335_v61, 8.507059e+37 }
0x12f8   :  { %v4052_v26 = vpop.eup %2683 }
0x12f9   :  { %v4054_v2 = vpop.eup %2685  ;;  %v2312_v3 = vmul.f32 %v4052_v26, %v4030_v51  ;;  %vm2317_vm6 = vweird.f32 %v4052_v26 }
0x12fa   :  { %v2327_v10 = vmul.f32 %v4054_v2, %v4032_v7  ;;  %vm2332_vm2 = vweird.f32 %v4054_v2  ;;  %vm4094_vm8 = vmor %vm2316_vm0, %vm2317_vm6 }
0x12fb   :  { %v2313_v47 = vsub.f32 1.0, %v2312_v3  ;;  %vm4109_vm3 = vmor %vm2331_vm13, %vm2332_vm2 }
0x12fc   :  { %v2328_v4 = vsub.f32 1.0, %v2327_v10 }
0x12fd   :  { %v2314_v13 = vmul.f32 %v4052_v26, %v2313_v47 }
0x12fe   :  { %v2329_v15 = vmul.f32 %v4054_v2, %v2328_v4 }
0x12ff   :  { %v2315_v32 = vadd.f32 %v4052_v26, %v2314_v13 }
0x1300   :  { %v2237_v43 = vpop.permute.xlu1 %2236  ;;  %v2330_v17 = vadd.f32 %v4054_v2, %v2329_v15 }
0x1301   :  { %v2243_v63 = vmul.f32 %v2237_v43, %v2222_v14  ;;  %v2244_v59 = vmul.f32 %v2237_v43, %v2223_v1 }
0x1303   :  { %v2249_v25 = vmul.f32 %v2243_v63, %v4285_v44  ;;  %v2250_v28 = vmul.f32 %v2244_v59, %v4285_v44 }
0x1305   :  { %v4037_v45 = vadd.f32 %v2249_v25, %v4286_v29  ;;  %v4040_v12 = vadd.f32 %v2250_v28, %v4286_v29  ;;  %v2319_v25 = vsel %vm4094_vm8, %v4052_v26, %v2315_v32  ;;  %v2338_v28 = vor.u32 1.1754944e-38, %v2337_v37 }
0x1307   :  { %v2496_v0 = vmul.f32 -1.442695, %v4037_v45  ;;  %v2497_v40 = vmul.f32 -1.442695, %v4040_v12 }
0x1308   :  { %v2227_v58 = vpop.permute.xlu1 %2226 }
0x1309   :  { %2687 = vpow2.f32 %v2496_v0  ;;  %v2239_v54 = vmul.f32 %v2227_v58, %v2218_v34  ;;  %v2240_v55 = vmul.f32 %v2227_v58, %v2219_v60  ;;  %v2334_v0 = vsel %vm4109_vm3, %v4054_v2, %v2330_v17 }
0x130a   :  { %2689 = vpow2.f32 %v2497_v40  ;;  %v2339_v2 = vsel %vm4098_vm10, %v2338_v28, %v2334_v0 }
0x130b   :  { %v2245_v6 = vmul.f32 %v2239_v54, %v4287_v8  ;;  %v2246_v5 = vmul.f32 %v2240_v55, %v4287_v8  ;;  %v2324_v8 = vsel %vm4076_vm9, %v2323_v27, %v2319_v25 }
0x130d   :  { %v4057_v11 = vadd.f32 %v2245_v6, %v4288_v38  ;;  %v4060_v16 = vadd.f32 %v2246_v5, %v4288_v38 }
0x130f   :  { %v2688_v49 = vpop.eup %2687  ;;  %v2492_v53 = vmul.f32 -1.442695, %v4057_v11  ;;  %v2493_v41 = vmul.f32 -1.442695, %v4060_v16 }
0x1310   :  { %v2690_v56 = vpop.eup %2689  ;;  %v2279_v22 = vadd.f32 1.0, %v2688_v49 }
0x1311   :  { %v2280_v46 = vadd.f32 1.0, %v2690_v56  ;;  %2691 = vpow2.f32 %v2492_v53  ;;  %v2373_v56 = vmul.f32 %v2324_v8, %v4021_v57 }
0x1312   :  { %2693 = vrcp.f32 %v2279_v22  ;;  %v2350_v33 = vand.u32 2147483647, %v2279_v22  ;;  %v2352_v36 = vand.u32 2147483648, %v2279_v22  ;;  %vm2346_vm14 = vweird.f32 %v2279_v22 }
0x1313   :  { %2695 = vrcp.f32 %v2280_v46  ;;  %v2367_v1 = vand.u32 2147483648, %v2280_v46  ;;  %v2365_v43 = vand.u32 2147483647, %v2280_v46  ;;  %vm2361_vm12 = vweird.f32 %v2280_v46 }
0x1314   :  { %2697 = vpow2.f32 %v2493_v41  ;;  %v2353_v34 = vor.u32 1.1754944e-38, %v2352_v36  ;;  %vm2351_vm4 = vcmp.eq.f32.partialorder %v2350_v33, 8.507059e+37 }
0x1315   :  { %v2368_v58 = vor.u32 1.1754944e-38, %v2367_v1  ;;  %vm2366_vm13 = vcmp.eq.f32.partialorder %v2365_v43, 8.507059e+37 }
0x1317   :  { %v2692_v24 = vpop.eup %2691 }
0x1318   :  { %v2694_v31 = vpop.eup %2693  ;;  %v4071_v42 = vadd.f32 1.0, %v2692_v24 }
0x1319   :  { %v2696_v23 = vpop.eup %2695  ;;  %v2342_v18 = vmul.f32 %v2694_v31, %v2279_v22  ;;  %vm2347_vm5 = vweird.f32 %v2694_v31 }
0x131a   :  { %v2698_v62 = vpop.eup %2697  ;;  %2699 = vrcp.f32 %v4071_v42  ;;  %v2357_v9 = vmul.f32 %v2696_v23, %v2280_v46  ;;  %vm2362_vm7 = vweird.f32 %v2696_v23  ;;  %vm2348_vm15 = vmor %vm2346_vm14, %vm2347_vm5  ;;  %v2292_v53 = vand.u32 2147483648, %v4071_v42 }
0x131b   :  { %v4084_v30 = vadd.f32 1.0, %v2698_v62  ;;  %v2343_v50 = vsub.f32 1.0, %v2342_v18  ;;  %vm2363_vm0 = vmor %vm2361_vm12, %vm2362_vm7  ;;  %v2290_v41 = vand.u32 2147483647, %v4071_v42  ;;  %vm2286_vm9 = vweird.f32 %v4071_v42 }
0x131c   :  { %v2358_v19 = vsub.f32 1.0, %v2357_v9  ;;  %v2293_v47 = vor.u32 1.1754944e-38, %v2292_v53 }
0x131d   :  { %2701 = vrcp.f32 %v4084_v30  ;;  %v2344_v14 = vmul.f32 %v2694_v31, %v2343_v50  ;;  %v2305_v57 = vand.u32 2147483647, %v4084_v30  ;;  %vm2291_vm7 = vcmp.eq.f32.partialorder %v2290_v41, 8.507059e+37 }
0x131e   :  { %v2359_v20 = vmul.f32 %v2696_v23, %v2358_v19  ;;  %vm2301_vm8 = vweird.f32 %v4084_v30 }
0x131f   :  { %v2345_v44 = vadd.f32 %v2694_v31, %v2344_v14  ;;  %vm2306_vm14 = vcmp.eq.f32.partialorder %v2305_v57, 8.507059e+37 }
0x1320   :  { %v2700_v29 = vpop.eup %2699  ;;  %v2360_v60 = vadd.f32 %v2696_v23, %v2359_v20 }
0x1321   :  { %v2349_v40 = vsel %vm2348_vm15, %v2694_v31, %v2345_v44  ;;  %v2282_v7 = vmul.f32 %v2700_v29, %v4071_v42  ;;  %vm2287_vm6 = vweird.f32 %v2700_v29 }
0x1322   :  { %v2354_v54 = vsel %vm2351_vm4, %v2353_v34, %v2349_v40  ;;  %v2364_v55 = vsel %vm2363_vm0, %v2696_v23, %v2360_v60  ;;  %vm2288_vm2 = vmor %vm2286_vm9, %vm2287_vm6  ;;  %v2719_v23 = vld [vmem:[%s4148_s4 + $0xc0] sm:$0x7] }
0x1323   :  { %v2702_v6 = vpop.eup %2701  ;;  %v2375_v5 = vmul.f32 %v2354_v54, %v4037_v45  ;;  %v2369_v26 = vsel %vm2366_vm13, %v2368_v58, %v2364_v55  ;;  %v2283_v38 = vsub.f32 1.0, %v2282_v7  ;;  %v2374_v45 = vmul.f32 %v2339_v2, %v4024_v35 }
0x1324   :  { %v2376_v49 = vmul.f32 %v2369_v26, %v4040_v12  ;;  %v2297_v3 = vmul.f32 %v2702_v6, %v4084_v30  ;;  %v2307_v12 = vand.u32 2147483648, %v4084_v30  ;;  %vm2302_vm5 = vweird.f32 %v2702_v6 }
0x1325   :  { %2390 = vmatpush.msrb.mxu0 %v2375_v5  ;;  %v2284_v22 = vmul.f32 %v2700_v29, %v2283_v38  ;;  %vm2303_vm10 = vmor %vm2301_vm8, %vm2302_vm5 }
0x1326   :  { %2410 = vmatpush.msrb.mxu3 %v2376_v49  ;;  %v2298_v10 = vsub.f32 1.0, %v2297_v3  ;;  %v2308_v13 = vor.u32 1.1754944e-38, %v2307_v12 }
0x1327   :  { %2391 = vmatpush.msrb.mxu0 %v2373_v56  ;;  %v2285_v46 = vadd.f32 %v2700_v29, %v2284_v22 }
0x1328   :  { %2411 = vmatpush.msrb.mxu3 %v2374_v45  ;;  %v2299_v4 = vmul.f32 %v2702_v6, %v2298_v10 }
0x1329   :  { %v2289_v52 = vsel %vm2288_vm2, %v2700_v29, %v2285_v46 }
0x132a   :  { %v2294_v21 = vsel %vm2291_vm7, %v2293_v47, %v2289_v52  ;;  %v2300_v24 = vadd.f32 %v2702_v6, %v2299_v4 }
0x132b   :  { %v2371_v35 = vmul.f32 %v2294_v21, %v4057_v11 }
0x132c   :  { %v2304_v31 = vsel %vm2303_vm10, %v2702_v6, %v2300_v24 }
0x132d   :  { %2392 = vmatpush.msrb.mxu0 %v2371_v35  ;;  %v2309_v42 = vsel %vm2306_vm14, %v2308_v13, %v2304_v31 }
0x132e   :  { %v2372_v15 = vmul.f32 %v2309_v42, %v4060_v16  ;;  %2498 = vmatmul.msk.f32.vlgmr.msrb.gmra.mxu0 %vm985_vm11, %v2719_v23 }
0x1330   :  { %2412 = vmatpush.msrb.mxu3 %v2372_v15 }
0x1331   :  { %2499 = vmatmul.msk.f32.vlgmr.msrb.gmra.mxu3 %vm985_vm11, %v2719_v23 }
0x13ab   :  { %v2394_v39 = vpop.f32.mrf.mxu0 }
0x13ac   :  { %v2395_v37 = vadd.f32 %v2394_v39, %v4006_v48 }
0x13b4   :  { %v2414_v18 = vpop.f32.mrf.mxu3 }
0x13b5   :  { %v2415_v11 = vadd.f32 %v2414_v18, %v4006_v48 }
0x13b7   :  { %v2419_v61 = vrot.slane %v2415_v11, 4 }
0x13b9   :  { %v2420_v62 = vsel %vm1322_vm1, %v2395_v37, %v2419_v61 }
0x13ba   :  { %2500 = vst [vmem:[%s4151_s5 + $0x8] sm:$0x77] %v2420_v62 }

</bundles_post_ra>
